<compile_context>
chip_gen: v5e
topology: v5e:2x2
jax: 0.10.0
libtpu: 0.0.40
codegen_flags: <defaults>
</compile_context>

<pallas_src>
import numpy as np
import jax
import jax.numpy as jnp
from jax.experimental import pallas as pl
from jax.experimental.pallas import tpu as pltpu

EPS = 1e-5  # InstanceNorm2d default eps


def _resnet_block_kernel(x_ref, w1_ref, w2_ref, o_ref):
    # x_ref / o_ref: (1, H, W, C) block.  w1_ref / w2_ref: (9*C, C) bf16,
    # row index = (kh*3 + kw)*C + cin.
    _, H, W, C = x_ref.shape
    x = x_ref[0]                                    # (H, W, C), input dtype (f32)
    inv_hw = jnp.float32(1.0 / (H * W))

    def conv3x3(a_bf16, w_ref):
        # ReflectionPad2d(1): padded[-1] = a[1], padded[H] = a[H-2] (same for W).
        p = jnp.concatenate([a_bf16[1:2], a_bf16, a_bf16[H - 2:H - 1]], axis=0)
        p = jnp.concatenate([p[:, 1:2], p, p[:, W - 2:W - 1]], axis=1)  # (H+2, W+2, C)
        # im2col slab (H*W, 9C), column order = (kh*3 + kw)*C + cin to match
        # the packed weights.
        pieces = [p[kh:kh + H, kw:kw + W, :].reshape(H * W, C)
                  for kh in range(3) for kw in range(3)]
        slab = jnp.concatenate(pieces, axis=-1)                         # bf16
        # Single MXU matmul: bf16 operands, f32 accumulation.
        return jnp.dot(slab, w_ref[...], preferred_element_type=jnp.float32)

    def instance_norm(y, relu):
        # One-pass per-channel statistics over H*W, kept in f32.
        s = jnp.sum(y, axis=0, keepdims=True)
        ss = jnp.sum(y * y, axis=0, keepdims=True)
        m = s * inv_hw
        v = ss * inv_hw - m * m                     # biased variance
        out = (y - m) * jax.lax.rsqrt(v + EPS)
        return jnp.maximum(out, 0.0) if relu else out

    h1 = instance_norm(conv3x3(x.astype(jnp.bfloat16), w1_ref), relu=True)
    y2 = instance_norm(conv3x3(h1.reshape(H, W, C).astype(jnp.bfloat16), w2_ref),
                       relu=False)
    o_ref[0] = (x.astype(jnp.float32) + y2.reshape(H, W, C)).astype(o_ref.dtype)


def pack_weights(w_oihw):
    """(Cout, Cin, 3, 3) OIHW -> (9*Cin, Cout) bf16, row = (kh*3 + kw)*Cin + cin."""
    cout, cin, kh, kw = w_oihw.shape
    w = jnp.transpose(w_oihw, (2, 3, 1, 0)).reshape(kh * kw * cin, cout)
    return w.astype(jnp.bfloat16)


def resnet_block_nhwc(x_nhwc, w1_packed, w2_packed):
    """Core entry point: x (N, H, W, C); weights pre-packed (9C, C) bf16."""
    N, H, W, C = x_nhwc.shape
    assert H >= 2 and W >= 2, "ReflectionPad2d(1) requires H, W >= 2"
    itemsize = np.dtype(x_nhwc.dtype).itemsize
    cost = pl.CostEstimate(
        flops=4 * N * H * W * 9 * C * C,            # 2 convs x 2 flops/MAC
        transcendentals=0,
        bytes_accessed=2 * N * H * W * C * itemsize + 2 * 9 * C * C * 2)
    return pl.pallas_call(
        _resnet_block_kernel,
        out_shape=jax.ShapeDtypeStruct((N, H, W, C), x_nhwc.dtype),
        grid_spec=pltpu.PrefetchScalarGridSpec(
            num_scalar_prefetch=0,
            grid=(N,),
            in_specs=[
                pl.BlockSpec((1, H, W, C), lambda n: (n, 0, 0, 0)),
                pl.BlockSpec((9 * C, C), lambda n: (0, 0)),
                pl.BlockSpec((9 * C, C), lambda n: (0, 0)),
            ],
            out_specs=pl.BlockSpec((1, H, W, C), lambda n: (n, 0, 0, 0)),
        ),
        compiler_params=pltpu.CompilerParams(
            dimension_semantics=("parallel",),
            vmem_limit_bytes=32 * 1024 * 1024,
        ),
        cost_estimate=cost,
    )(x_nhwc, w1_packed, w2_packed)


def resnet_block(x_nchw, w1_oihw, w2_oihw):
    """NCHW adapter matching the PyTorch module interface.

    In a full network keep activations NHWC end-to-end and call
    `resnet_block_nhwc` with weights packed once at load time; the transposes
    here round-trip the activation through HBM and the per-call weight repack
    is redundant.
    """
    x_nhwc = jnp.transpose(x_nchw, (0, 2, 3, 1))
    out = resnet_block_nhwc(x_nhwc, pack_weights(w1_oihw), pack_weights(w2_oihw))
    return jnp.transpose(out, (0, 3, 1, 2))


def _reference(x, w1, w2):
    """Pure-JAX NCHW reference matching the PyTorch module (f32)."""
    def conv(a, w):
        a = jnp.pad(a, ((0, 0), (0, 0), (1, 1), (1, 1)), mode="reflect")
        return jax.lax.conv_general_dilated(
            a, w, (1, 1), "VALID",
            dimension_numbers=("NCHW", "OIHW", "NCHW"))

    def inorm(y):
        m = jnp.mean(y, axis=(2, 3), keepdims=True)
        v = jnp.mean((y - m) ** 2, axis=(2, 3), keepdims=True)
        return (y - m) * jax.lax.rsqrt(v + EPS)

    h = jnp.maximum(inorm(conv(x, w1)), 0.0)
    return x + inorm(conv(h, w2))


if __name__ == "__main__":
    N, C, H, W = 2, 4, 16, 16
    key = jax.random.PRNGKey(0)
    kx, k1, k2 = jax.random.split(key, 3)

    x = jax.random.normal(kx, (N, C, H, W), dtype=jnp.float32)
    # Conv2d(C, C, 3, bias=False) weights, OIHW: (C, C, 3, 3)
    w1 = 0.1 * jax.random.normal(k1, (C, C, 3, 3), dtype=jnp.float32)
    w2 = 0.1 * jax.random.normal(k2, (C, C, 3, 3), dtype=jnp.float32)

    out = jax.block_until_ready(jax.jit(resnet_block)(x, w1, w2))
    ref = jax.block_until_ready(_reference(x, w1, w2))

    assert out.shape == (N, C, H, W)
    np.testing.assert_allclose(np.asarray(out), np.asarray(ref),
                               rtol=5e-2, atol=5e-2)

    print("KERNEL_OK")
</pallas_src>

<mosaic_0001>
module attributes {stable_mosaic.version = 11 : i64} {
  func.func @_resnet_block_kernel(%arg0: i32, %arg1: memref<1x16x16x4xf32, #tpu.memory_space<vmem>>, %arg2: memref<36x4xbf16, #tpu.memory_space<vmem>>, %arg3: memref<36x4xbf16, #tpu.memory_space<vmem>>, %arg4: memref<1x16x16x4xf32, #tpu.memory_space<vmem>>) attributes {dimension_semantics = [#tpu.dimension_semantics<parallel>], iteration_bounds = array<i64: 2>, scalar_prefetch = 0 : i64, scratch_operands = 0 : i64, tpu.core_type = #tpu.core_type<tc>, window_params = [{transform_indices = @transform_0, window_bounds = array<i64: 1, 16, 16, 4>}, {pipeline_mode = #tpu.pipeline_mode<synchronous>, transform_indices = @transform_1, window_bounds = array<i64: 36, 4>}, {pipeline_mode = #tpu.pipeline_mode<synchronous>, transform_indices = @transform_2, window_bounds = array<i64: 36, 4>}, {transform_indices = @transform_3, window_bounds = array<i64: 1, 16, 16, 4>}]} {
    %c0 = arith.constant 0 : index
    %c0_0 = arith.constant 0 : index
    %c0_1 = arith.constant 0 : index
    %c0_2 = arith.constant 0 : index
    %0 = vector.load %arg1[%c0, %c0_0, %c0_1, %c0_2] : memref<1x16x16x4xf32, #tpu.memory_space<vmem>>, vector<1x16x16x4xf32>
    %1 = vector.shape_cast %0 : vector<1x16x16x4xf32> to vector<16x16x4xf32>
    %2 = arith.truncf %1 : vector<16x16x4xf32> to vector<16x16x4xbf16>
    %3 = vector.extract_strided_slice %2 {offsets = [1, 0, 0], sizes = [1, 16, 4], strides = [1, 1, 1]} : vector<16x16x4xbf16> to vector<1x16x4xbf16>
    %4 = vector.extract_strided_slice %2 {offsets = [14, 0, 0], sizes = [1, 16, 4], strides = [1, 1, 1]} : vector<16x16x4xbf16> to vector<1x16x4xbf16>
    %5 = tpu.concatenate %3, %2, %4 in 0 : vector<1x16x4xbf16>, vector<16x16x4xbf16>, vector<1x16x4xbf16> -> vector<18x16x4xbf16>
    %6 = vector.extract_strided_slice %5 {offsets = [0, 1, 0], sizes = [18, 1, 4], strides = [1, 1, 1]} : vector<18x16x4xbf16> to vector<18x1x4xbf16>
    %7 = vector.extract_strided_slice %5 {offsets = [0, 14, 0], sizes = [18, 1, 4], strides = [1, 1, 1]} : vector<18x16x4xbf16> to vector<18x1x4xbf16>
    %8 = tpu.concatenate %6, %5, %7 in 1 : vector<18x1x4xbf16>, vector<18x16x4xbf16>, vector<18x1x4xbf16> -> vector<18x18x4xbf16>
    %9 = vector.extract_strided_slice %8 {offsets = [0, 0, 0], sizes = [16, 16, 4], strides = [1, 1, 1]} : vector<18x18x4xbf16> to vector<16x16x4xbf16>
    %10 = vector.shape_cast %9 : vector<16x16x4xbf16> to vector<256x4xbf16>
    %11 = vector.extract_strided_slice %8 {offsets = [0, 1, 0], sizes = [16, 16, 4], strides = [1, 1, 1]} : vector<18x18x4xbf16> to vector<16x16x4xbf16>
    %12 = vector.shape_cast %11 : vector<16x16x4xbf16> to vector<256x4xbf16>
    %13 = vector.extract_strided_slice %8 {offsets = [0, 2, 0], sizes = [16, 16, 4], strides = [1, 1, 1]} : vector<18x18x4xbf16> to vector<16x16x4xbf16>
    %14 = vector.shape_cast %13 : vector<16x16x4xbf16> to vector<256x4xbf16>
    %15 = vector.extract_strided_slice %8 {offsets = [1, 0, 0], sizes = [16, 16, 4], strides = [1, 1, 1]} : vector<18x18x4xbf16> to vector<16x16x4xbf16>
    %16 = vector.shape_cast %15 : vector<16x16x4xbf16> to vector<256x4xbf16>
    %17 = vector.extract_strided_slice %8 {offsets = [1, 1, 0], sizes = [16, 16, 4], strides = [1, 1, 1]} : vector<18x18x4xbf16> to vector<16x16x4xbf16>
    %18 = vector.shape_cast %17 : vector<16x16x4xbf16> to vector<256x4xbf16>
    %19 = vector.extract_strided_slice %8 {offsets = [1, 2, 0], sizes = [16, 16, 4], strides = [1, 1, 1]} : vector<18x18x4xbf16> to vector<16x16x4xbf16>
    %20 = vector.shape_cast %19 : vector<16x16x4xbf16> to vector<256x4xbf16>
    %21 = vector.extract_strided_slice %8 {offsets = [2, 0, 0], sizes = [16, 16, 4], strides = [1, 1, 1]} : vector<18x18x4xbf16> to vector<16x16x4xbf16>
    %22 = vector.shape_cast %21 : vector<16x16x4xbf16> to vector<256x4xbf16>
    %23 = vector.extract_strided_slice %8 {offsets = [2, 1, 0], sizes = [16, 16, 4], strides = [1, 1, 1]} : vector<18x18x4xbf16> to vector<16x16x4xbf16>
    %24 = vector.shape_cast %23 : vector<16x16x4xbf16> to vector<256x4xbf16>
    %25 = vector.extract_strided_slice %8 {offsets = [2, 2, 0], sizes = [16, 16, 4], strides = [1, 1, 1]} : vector<18x18x4xbf16> to vector<16x16x4xbf16>
    %26 = vector.shape_cast %25 : vector<16x16x4xbf16> to vector<256x4xbf16>
    %27 = tpu.concatenate %10, %12, %14, %16, %18, %20, %22, %24, %26 in 1 : vector<256x4xbf16>, vector<256x4xbf16>, vector<256x4xbf16>, vector<256x4xbf16>, vector<256x4xbf16>, vector<256x4xbf16>, vector<256x4xbf16>, vector<256x4xbf16>, vector<256x4xbf16> -> vector<256x36xbf16>
    %c0_3 = arith.constant 0 : index
    %c0_4 = arith.constant 0 : index
    %28 = vector.load %arg2[%c0_3, %c0_4] : memref<36x4xbf16, #tpu.memory_space<vmem>>, vector<36x4xbf16>
    %cst = arith.constant dense<0.000000e+00> : vector<256x4xf32>
    %29 = tpu.matmul %27, %28, %cst {dimension_numbers = #tpu.dot_dimension_numbers<[1], [0], [0], [1], [0, 0, 1, 1], [], []>} : vector<256x36xbf16>, vector<36x4xbf16>, vector<256x4xf32> -> vector<256x4xf32>
    %cst_5 = arith.constant dense<0.000000e+00> : vector<4xf32>
    %30 = vector.multi_reduction <add>, %29, %cst_5 [0] : vector<256x4xf32> to vector<4xf32>
    %31 = vector.shape_cast %30 : vector<4xf32> to vector<1x4xf32>
    %32 = arith.mulf %29, %29 : vector<256x4xf32>
    %cst_6 = arith.constant dense<0.000000e+00> : vector<4xf32>
    %33 = vector.multi_reduction <add>, %32, %cst_6 [0] : vector<256x4xf32> to vector<4xf32>
    %34 = vector.shape_cast %33 : vector<4xf32> to vector<1x4xf32>
    %cst_7 = arith.constant 3.906250e-03 : f32
    %35 = vector.broadcast %cst_7 : f32 to vector<1x4xf32>
    %36 = arith.mulf %31, %35 : vector<1x4xf32>
    %cst_8 = arith.constant 3.906250e-03 : f32
    %37 = vector.broadcast %cst_8 : f32 to vector<1x4xf32>
    %38 = arith.mulf %34, %37 : vector<1x4xf32>
    %39 = arith.mulf %36, %36 : vector<1x4xf32>
    %40 = arith.subf %38, %39 : vector<1x4xf32>
    %41 = vector.broadcast %36 : vector<1x4xf32> to vector<256x4xf32>
    %42 = arith.subf %29, %41 : vector<256x4xf32>
    %cst_9 = arith.constant 9.99999974E-6 : f32
    %43 = vector.broadcast %cst_9 : f32 to vector<1x4xf32>
    %44 = arith.addf %40, %43 : vector<1x4xf32>
    %45 = math.rsqrt %44 : vector<1x4xf32>
    %46 = vector.broadcast %45 : vector<1x4xf32> to vector<256x4xf32>
    %47 = arith.mulf %42, %46 : vector<256x4xf32>
    %cst_10 = arith.constant 0.000000e+00 : f32
    %48 = vector.broadcast %cst_10 : f32 to vector<256x4xf32>
    %49 = arith.maximumf %47, %48 : vector<256x4xf32>
    %50 = vector.shape_cast %49 : vector<256x4xf32> to vector<16x16x4xf32>
    %51 = arith.truncf %50 : vector<16x16x4xf32> to vector<16x16x4xbf16>
    %52 = vector.extract_strided_slice %51 {offsets = [1, 0, 0], sizes = [1, 16, 4], strides = [1, 1, 1]} : vector<16x16x4xbf16> to vector<1x16x4xbf16>
    %53 = vector.extract_strided_slice %51 {offsets = [14, 0, 0], sizes = [1, 16, 4], strides = [1, 1, 1]} : vector<16x16x4xbf16> to vector<1x16x4xbf16>
    %54 = tpu.concatenate %52, %51, %53 in 0 : vector<1x16x4xbf16>, vector<16x16x4xbf16>, vector<1x16x4xbf16> -> vector<18x16x4xbf16>
    %55 = vector.extract_strided_slice %54 {offsets = [0, 1, 0], sizes = [18, 1, 4], strides = [1, 1, 1]} : vector<18x16x4xbf16> to vector<18x1x4xbf16>
    %56 = vector.extract_strided_slice %54 {offsets = [0, 14, 0], sizes = [18, 1, 4], strides = [1, 1, 1]} : vector<18x16x4xbf16> to vector<18x1x4xbf16>
    %57 = tpu.concatenate %55, %54, %56 in 1 : vector<18x1x4xbf16>, vector<18x16x4xbf16>, vector<18x1x4xbf16> -> vector<18x18x4xbf16>
    %58 = vector.extract_strided_slice %57 {offsets = [0, 0, 0], sizes = [16, 16, 4], strides = [1, 1, 1]} : vector<18x18x4xbf16> to vector<16x16x4xbf16>
    %59 = vector.shape_cast %58 : vector<16x16x4xbf16> to vector<256x4xbf16>
    %60 = vector.extract_strided_slice %57 {offsets = [0, 1, 0], sizes = [16, 16, 4], strides = [1, 1, 1]} : vector<18x18x4xbf16> to vector<16x16x4xbf16>
    %61 = vector.shape_cast %60 : vector<16x16x4xbf16> to vector<256x4xbf16>
    %62 = vector.extract_strided_slice %57 {offsets = [0, 2, 0], sizes = [16, 16, 4], strides = [1, 1, 1]} : vector<18x18x4xbf16> to vector<16x16x4xbf16>
    %63 = vector.shape_cast %62 : vector<16x16x4xbf16> to vector<256x4xbf16>
    %64 = vector.extract_strided_slice %57 {offsets = [1, 0, 0], sizes = [16, 16, 4], strides = [1, 1, 1]} : vector<18x18x4xbf16> to vector<16x16x4xbf16>
    %65 = vector.shape_cast %64 : vector<16x16x4xbf16> to vector<256x4xbf16>
    %66 = vector.extract_strided_slice %57 {offsets = [1, 1, 0], sizes = [16, 16, 4], strides = [1, 1, 1]} : vector<18x18x4xbf16> to vector<16x16x4xbf16>
    %67 = vector.shape_cast %66 : vector<16x16x4xbf16> to vector<256x4xbf16>
    %68 = vector.extract_strided_slice %57 {offsets = [1, 2, 0], sizes = [16, 16, 4], strides = [1, 1, 1]} : vector<18x18x4xbf16> to vector<16x16x4xbf16>
    %69 = vector.shape_cast %68 : vector<16x16x4xbf16> to vector<256x4xbf16>
    %70 = vector.extract_strided_slice %57 {offsets = [2, 0, 0], sizes = [16, 16, 4], strides = [1, 1, 1]} : vector<18x18x4xbf16> to vector<16x16x4xbf16>
    %71 = vector.shape_cast %70 : vector<16x16x4xbf16> to vector<256x4xbf16>
    %72 = vector.extract_strided_slice %57 {offsets = [2, 1, 0], sizes = [16, 16, 4], strides = [1, 1, 1]} : vector<18x18x4xbf16> to vector<16x16x4xbf16>
    %73 = vector.shape_cast %72 : vector<16x16x4xbf16> to vector<256x4xbf16>
    %74 = vector.extract_strided_slice %57 {offsets = [2, 2, 0], sizes = [16, 16, 4], strides = [1, 1, 1]} : vector<18x18x4xbf16> to vector<16x16x4xbf16>
    %75 = vector.shape_cast %74 : vector<16x16x4xbf16> to vector<256x4xbf16>
    %76 = tpu.concatenate %59, %61, %63, %65, %67, %69, %71, %73, %75 in 1 : vector<256x4xbf16>, vector<256x4xbf16>, vector<256x4xbf16>, vector<256x4xbf16>, vector<256x4xbf16>, vector<256x4xbf16>, vector<256x4xbf16>, vector<256x4xbf16>, vector<256x4xbf16> -> vector<256x36xbf16>
    %c0_11 = arith.constant 0 : index
    %c0_12 = arith.constant 0 : index
    %77 = vector.load %arg3[%c0_11, %c0_12] : memref<36x4xbf16, #tpu.memory_space<vmem>>, vector<36x4xbf16>
    %cst_13 = arith.constant dense<0.000000e+00> : vector<256x4xf32>
    %78 = tpu.matmul %76, %77, %cst_13 {dimension_numbers = #tpu.dot_dimension_numbers<[1], [0], [0], [1], [0, 0, 1, 1], [], []>} : vector<256x36xbf16>, vector<36x4xbf16>, vector<256x4xf32> -> vector<256x4xf32>
    %cst_14 = arith.constant dense<0.000000e+00> : vector<4xf32>
    %79 = vector.multi_reduction <add>, %78, %cst_14 [0] : vector<256x4xf32> to vector<4xf32>
    %80 = vector.shape_cast %79 : vector<4xf32> to vector<1x4xf32>
    %81 = arith.mulf %78, %78 : vector<256x4xf32>
    %cst_15 = arith.constant dense<0.000000e+00> : vector<4xf32>
    %82 = vector.multi_reduction <add>, %81, %cst_15 [0] : vector<256x4xf32> to vector<4xf32>
    %83 = vector.shape_cast %82 : vector<4xf32> to vector<1x4xf32>
    %cst_16 = arith.constant 3.906250e-03 : f32
    %84 = vector.broadcast %cst_16 : f32 to vector<1x4xf32>
    %85 = arith.mulf %80, %84 : vector<1x4xf32>
    %cst_17 = arith.constant 3.906250e-03 : f32
    %86 = vector.broadcast %cst_17 : f32 to vector<1x4xf32>
    %87 = arith.mulf %83, %86 : vector<1x4xf32>
    %88 = arith.mulf %85, %85 : vector<1x4xf32>
    %89 = arith.subf %87, %88 : vector<1x4xf32>
    %90 = vector.broadcast %85 : vector<1x4xf32> to vector<256x4xf32>
    %91 = arith.subf %78, %90 : vector<256x4xf32>
    %cst_18 = arith.constant 9.99999974E-6 : f32
    %92 = vector.broadcast %cst_18 : f32 to vector<1x4xf32>
    %93 = arith.addf %89, %92 : vector<1x4xf32>
    %94 = math.rsqrt %93 : vector<1x4xf32>
    %95 = vector.broadcast %94 : vector<1x4xf32> to vector<256x4xf32>
    %96 = arith.mulf %91, %95 : vector<256x4xf32>
    %97 = vector.shape_cast %96 : vector<256x4xf32> to vector<16x16x4xf32>
    %98 = arith.addf %1, %97 : vector<16x16x4xf32>
    %c0_19 = arith.constant 0 : index
    %c0_20 = arith.constant 0 : index
    %c0_21 = arith.constant 0 : index
    %c0_22 = arith.constant 0 : index
    %99 = vector.load %arg4[%c0_19, %c0_20, %c0_21, %c0_22] : memref<1x16x16x4xf32, #tpu.memory_space<vmem>>, vector<1x16x16x4xf32>
    %100 = vector.shape_cast %99 : vector<1x16x16x4xf32> to vector<16x16x4xf32>
    %101 = vector.shape_cast %98 : vector<16x16x4xf32> to vector<1x16x16x4xf32>
    tpu.vector_store %arg4[%c0_19, %c0_20, %c0_21, %c0_22], %101 {strides = array<i32>} : memref<1x16x16x4xf32, #tpu.memory_space<vmem>>, vector<1x16x16x4xf32>,
    return
  }
  func.func @transform_0(%arg0: i32) -> (i32, i32, i32, i32) {
    %c0_i32 = arith.constant 0 : i32
    %c0_i32_0 = arith.constant 0 : i32
    %c0_i32_1 = arith.constant 0 : i32
    %c0_i32_2 = arith.constant 0 : i32
    return %arg0, %c0_i32, %c0_i32_0, %c0_i32_1 : i32, i32, i32, i32
  }
  func.func @transform_1(%arg0: i32) -> (i32, i32) {
    %c0_i32 = arith.constant 0 : i32
    %c0_i32_0 = arith.constant 0 : i32
    %c0_i32_1 = arith.constant 0 : i32
    return %c0_i32, %c0_i32_0 : i32, i32
  }
  func.func @transform_2(%arg0: i32) -> (i32, i32) {
    %c0_i32 = arith.constant 0 : i32
    %c0_i32_0 = arith.constant 0 : i32
    %c0_i32_1 = arith.constant 0 : i32
    return %c0_i32, %c0_i32_0 : i32, i32
  }
  func.func @transform_3(%arg0: i32) -> (i32, i32, i32, i32) {
    %c0_i32 = arith.constant 0 : i32
    %c0_i32_0 = arith.constant 0 : i32
    %c0_i32_1 = arith.constant 0 : i32
    %c0_i32_2 = arith.constant 0 : i32
    return %arg0, %c0_i32, %c0_i32_0, %c0_i32_1 : i32, i32, i32, i32
  }
}

</mosaic_0001>

<bundles_post_ra>
// kernel: resnet_block.1
= control target key start
LH: loop header
LB: loop body
LE: loop exit
PB: predicated region body
PF: predicated region fallthrough
CT: control target
= control target key end

     0   :  { %s3777_s12 = smov 0   ;;  %s6350_s0 = inlined_call_operand.vmem [shape: f32[2,16,16,4], index: 0, kind: input, shape index: {}]   ;;  %s6351_s1 = inlined_call_operand.vmem [shape: bf16[36,4], index: 1, kind: input, shape index: {}]   ;;  %s6352_s2 = inlined_call_operand.vmem [shape: bf16[36,4], index: 2, kind: input, shape index: {}]   ;;  %s6353_s3 = inlined_call_operand.vmem [shape: f32[2,16,16,4], index: 3, kind: output, shape index: {}]  }
   0x1 LB: > { %s3618_s13 = sadd.s32 4294967295, %s3747_s12   ;;  %p3622_p0 = scmp.ge.s32.totalorder %s3747_s12, 1  ;;  %s3747_s12 = sphi %s3777_s12, %s13_s12  }
   0x2   : > { %p137_p1 = scmp.lt.s32.totalorder %s3747_s12, 3 }
   0x4   : > { %p138_p2 = pnand %p3622_p0, %p137_p1 }
   0x6   : > { %141 = sbr.rel (%p138_p2) target bundleno = 1361 (0x551), region = 32 }
   0xb   : > { %p161_p3 = scmp.lt.s32.totalorder %s3618_s13, 1  ;;  %vm636_vm0 = vcmask 1040384   ;;  %vm637_vm1 = vsmask.f32 256  ;;  %s3749_s18 = smov 12   ;;  %vm882_vm3 = vcmask 1046528  }
   0xc   : > { %vm3805_vm2 = vmand %vm636_vm0, %vm637_vm1  ;;  %s3750_s19 = smov 24   ;;  %s3751_s20 = smov 8   ;;  %vm671_vm4 = vsmask.f32 7424  ;;  %vm1501_vm5 = vcmask 1041408   ;;  %vm1191_vm6 = vcmask 31744  }
   0xd   : > { %s6421_s13 = smov (!%p161_p3, %s3618_s13), 1  ;;  %s3752_s21 = smov 20   ;;  %vm1222_vm7 = vcmask 64512   ;;  %vm1253_vm8 = vcmask 97280   ;;  %vm1286_vm9 = vcmask 130048   ;;  %vm1319_vm10 = vcmask 162816  }
   0xe   : > { %s3677_s14 = sshll.u32 %s6421_s13, 8  ;;  %s3753_s22 = smov 32   ;;  %vm1352_vm11 = vcmask 195584   ;;  %vm1384_vm12 = vcmask 228352   ;;  %vm1416_vm13 = vcmask 261120   ;;  %vm1468_vm14 = vcmask 293888  }
   0xf   : > { %s3793_s17 = scalar_lea.vmem %s6350_s0, %s3677_s14  ;;  %s3754_s23 = smov 4  }
  0x10   : > { %v172_v0 = vld [vmem:[%s3793_s17] sm:$0xff]  ;;  %v173_v1 = vld [vmem:[%s3793_s17 + $0x8] sm:$0xff]  ;;  %v174_v2 = vld [vmem:[%s3793_s17 + $0x10] sm:$0xff]  ;;  %s3755_s24 = smov 16   ;;  %s3756_s25 = smov 28  }
  0x11   : > { %v204_v3 = vpack.c.bf16 %v172_v0, %v172_v0  ;;  %v205_v4 = vpack.c.bf16 %v173_v1, %v173_v1  ;;  %v175_v5 = vld [vmem:[%s3793_s17 + $0x18] sm:$0xff]  ;;  %v206_v6 = vpack.c.bf16 %v174_v2, %v174_v2  ;;  %v176_v12 = vld [vmem:[%s3793_s17 + $0x20] sm:$0xff]  ;;  %v177_v13 = vld [vmem:[%s3793_s17 + $0x28] sm:$0xff]  ;;  %s6172_s16 = scalar_lea.vmem %s6353_s3, %s3677_s14 }
  0x12   : > { %v207_v7 = vpack.c.bf16 %v175_v5, %v175_v5  ;;  %v208_v22 = vpack.c.bf16 %v176_v12, %v176_v12  ;;  %v209_v23 = vpack.c.bf16 %v177_v13, %v177_v13  ;;  %v186_v28 = vld [vmem:[%s3793_s17 + $0x70] sm:$0xff]  ;;  %v187_v29 = vld [vmem:[%s3793_s17 + $0x78] sm:$0xff]  ;;  %v188_v54 = vld [vmem:[%s3793_s17 + $0x80] sm:$0xff] }
  0x13   : > { %v253_v8 = vunpack.c.l.b16 %v204_v3  ;;  %v365_v9 = vunpack.c.l.b16 %v205_v4  ;;  %v252_v10 = vunpack.c.l.b16 %v206_v6  ;;  %v218_v38 = vpack.c.bf16 %v186_v28, %v186_v28  ;;  %v189_v55 = vld [vmem:[%s3793_s17 + $0x88] sm:$0xff]  ;;  %v190_v13 = vld [vmem:[%s3793_s17 + $0x90] sm:$0xff] }
  0x14   : > { %v364_v11 = vunpack.c.l.b16 %v207_v7  ;;  %v219_v39 = vpack.c.bf16 %v187_v29, %v187_v29  ;;  %v254_v42 = vunpack.c.l.b16 %v208_v22  ;;  %v366_v43 = vunpack.c.l.b16 %v209_v23 }
  0x15   : > { %v269_v14 = vpack.c.b16 %v253_v8, %v253_v8  ;;  %v381_v15 = vpack.c.b16 %v365_v9, %v253_v8  ;;  %v541_v16 = vpack.c.b16 %v365_v9, %v365_v9  ;;  %v268_v17 = vpack.c.b16 %v252_v10, %v252_v10 }
  0x16   : > { %v380_v18 = vpack.c.b16 %v364_v11, %v252_v10  ;;  %v540_v19 = vpack.c.b16 %v364_v11, %v364_v11  ;;  %v259_v49 = vunpack.c.l.b16 %v218_v38  ;;  %v371_v50 = vunpack.c.l.b16 %v219_v39 }
  0x17   : > { %v404_v20 = vshrl.u32 %v381_v15, 16  ;;  %v407_v21 = vshll.u32 %v381_v15, 16  ;;  %v561_v27 = vshll.u32 %v541_v16, 16  ;;  %v288_v30 = vshrl.u32 %v269_v14, 16  ;;  %v191_v14 = vld [vmem:[%s3793_s17 + $0x98] sm:$0xff] }
  0x18   : > { %v397_v24 = vshrl.u32 %v380_v18, 16  ;;  %v400_v25 = vshll.u32 %v380_v18, 16  ;;  %v557_v26 = vshll.u32 %v540_v19, 16  ;;  %v285_v33 = vshrl.u32 %v268_v17, 16 }
  0x19   : > { %v406_v31 = vrot.slane %v404_v20, 7  ;;  %v563_v37 = vrot.slane %v561_v27, 3  ;;  %v382_v51 = vpack.c.b16 %v366_v43, %v254_v42  ;;  %v387_v59 = vpack.c.b16 %v371_v50, %v259_v49 }
  0x1a   : > { %v399_v34 = vrot.slane %v397_v24, 7  ;;  %v559_v35 = vrot.slane %v557_v26, 3  ;;  %v220_v61 = vpack.c.bf16 %v188_v54, %v188_v54  ;;  %v221_v62 = vpack.c.bf16 %v189_v55, %v189_v55 }
  0x1b   : > { %v409_v36 = vor.u32 %v407_v21, %v406_v31  ;;  %v656_v48 = vsel %vm3805_vm2, %v406_v31, %v563_v37  ;;  %v411_v60 = vshrl.u32 %v382_v51, 16  ;;  %v270_v6 = vpack.c.b16 %v254_v42, %v254_v42 }
  0x1c   : > { %v402_v40 = vor.u32 %v400_v25, %v399_v34  ;;  %v655_v41 = vsel %vm3805_vm2, %v399_v34, %v559_v35  ;;  %v887_v57 = vrot.slane %v656_v48, 1  ;;  %v692_v5 = vshll.u32 %v656_v48, 16 }
  0x1d   : > { %v3813_v44 = vsel %vm3805_vm2, %v288_v30, %v409_v36  ;;  %v884_v45 = vrot.slane %v655_v41, 1  ;;  %v680_v63 = vshll.u32 %v655_v41, 16  ;;  %v446_v7 = vshrl.u32 %v387_v59, 16 }
  0x1e   : > { %1005 = vrot.lane.b32.xlu1 %v3813_v44, %s3749_s18  ;;  %v3819_v46 = vsel %vm3805_vm2, %v285_v33, %v402_v40  ;;  %v687_v53 = vshll.u32 %v3813_v44, 16  ;;  %v886_v56 = vrot.slane %v3813_v44, 1  ;;  %v685_v0 = vshrl.u32 %v3813_v44, 16 }
  0x1f   : > { %v883_v47 = vrot.slane %v3819_v46, 1  ;;  %1101 = vrot.lane.b32.xlu2 %v3819_v46, %s3750_s19  ;;  %v675_v58 = vshll.u32 %v3819_v46, 16  ;;  %v673_v3 = vshrl.u32 %v3819_v46, 16  ;;  %v542_v8 = vpack.c.b16 %v366_v43, %v366_v43 }
  0x20   : > { %v689_v1 = vrot.slane %v687_v53, 1  ;;  %v888_v2 = vsel %vm882_vm3, %v886_v56, %v887_v57  ;;  %v413_v9 = vrot.slane %v411_v60, 7  ;;  %v414_v10 = vshll.u32 %v382_v51, 16 }
  0x21   : > { %v3827_v52 = vsel %vm882_vm3, %v883_v47, %v884_v45  ;;  %v677_v4 = vrot.slane %v675_v58, 1  ;;  %v260_v11 = vunpack.c.l.b16 %v220_v61  ;;  %v372_v12 = vunpack.c.l.b16 %v221_v62 }
  0x22   : > { %975 = vrot.lane.b32.xlu0 %v3827_v52, %s3751_s20  ;;  %v682_v15 = vrot.slane %v680_v63, 1  ;;  %v690_v16 = vor.u32 %v689_v1, %v685_v0  ;;  %v275_v17 = vpack.c.b16 %v259_v49, %v259_v49  ;;  %v694_v19 = vrot.slane %v692_v5, 1  ;;  %v178_v63 = vld [vmem:[%s3793_s17 + $0x30] sm:$0xff]  ;;  %v179_v0 = vld [vmem:[%s3793_s17 + $0x38] sm:$0xff] }
  0x23   : > { %v678_v18 = vor.u32 %v677_v4, %v673_v3  ;;  %v449_v20 = vshll.u32 %v387_v59, 16  ;;  %v547_v21 = vpack.c.b16 %v371_v50, %v371_v50  ;;  %v448_v22 = vrot.slane %v446_v7, 7 }
  0x24   : > { %v565_v23 = vshll.u32 %v542_v8, 16  ;;  %v222_v24 = vpack.c.bf16 %v190_v13, %v190_v13  ;;  %v223_v25 = vpack.c.bf16 %v191_v14, %v191_v14  ;;  %v291_v26 = vshrl.u32 %v270_v6, 16 }
  0x25   : > { %v416_v27 = vor.u32 %v414_v10, %v413_v9  ;;  %v388_v28 = vpack.c.b16 %v372_v12, %v260_v11  ;;  %v683_v29 = vsel %vm671_vm4, %v678_v18, %v682_v15  ;;  %v695_v30 = vsel %vm671_vm4, %v690_v16, %v694_v19 }
  0x26   : > { %1007 = vrot.lane.b32.xlu1 %v3819_v46, %s3749_s18  ;;  %v306_v31 = vshrl.u32 %v275_v17, 16  ;;  %v585_v33 = vshll.u32 %v547_v21, 16  ;;  %v451_v34 = vor.u32 %v449_v20, %v448_v22  ;;  %v567_v35 = vrot.slane %v565_v23, 3 }
  0x27   : > { %1069 = vrot.lane.b32.xlu2 %v888_v2, %s3752_s21  ;;  %v261_v36 = vunpack.c.l.b16 %v222_v24  ;;  %v373_v37 = vunpack.c.l.b16 %v223_v25  ;;  %v3852_v38 = vsel %vm3805_vm2, %v291_v26, %v416_v27  ;;  %v453_v39 = vshrl.u32 %v388_v28, 16 }
  0x28   : > { %v699_v40 = vshll.u32 %v3852_v38, 16  ;;  %v587_v41 = vrot.slane %v585_v33, 3  ;;  %v276_v42 = vpack.c.b16 %v260_v11, %v260_v11  ;;  %v548_v43 = vpack.c.b16 %v372_v12, %v372_v12 }
  0x29   : > { %v3858_v45 = vsel %vm3805_vm2, %v306_v31, %v451_v34  ;;  %v657_v47 = vsel %vm3805_vm2, %v413_v9, %v567_v35  ;;  %v456_v48 = vshll.u32 %v388_v28, 16  ;;  %v389_v49 = vpack.c.b16 %v373_v37, %v261_v36 }
  0x2a   : > { %977 = vrot.lane.b32.xlu0 %v888_v2, %s3751_s20  ;;  %v455_v50 = vrot.slane %v453_v39, 7  ;;  %v697_v51 = vshrl.u32 %v3852_v38, 16  ;;  %v701_v53 = vrot.slane %v699_v40, 1  ;;  %v704_v54 = vshll.u32 %v657_v47, 16 }
  0x2b   : > { %v759_v55 = vshll.u32 %v3858_v45, 16  ;;  %v662_v56 = vsel %vm3805_vm2, %v448_v22, %v587_v41  ;;  %v589_v57 = vshll.u32 %v548_v43, 16  ;;  %v460_v58 = vshrl.u32 %v389_v49, 16 }
  0x2c   : > { %v309_v59 = vshrl.u32 %v276_v42, 16  ;;  %v458_v60 = vor.u32 %v456_v48, %v455_v50  ;;  %v702_v61 = vor.u32 %v701_v53, %v697_v51  ;;  %v706_v62 = vrot.slane %v704_v54, 1 }
  0x2d   : > { %v757_v1 = vshrl.u32 %v3858_v45, 16  ;;  %v761_v2 = vrot.slane %v759_v55, 1  ;;  %v764_v3 = vshll.u32 %v662_v56, 16  ;;  %v277_v4 = vpack.c.b16 %v261_v36, %v261_v36 }
  0x2e   : > { %1161 = vrot.lane.b32.xlu1 %v3827_v52, %s3753_s22  ;;  %v591_v5 = vrot.slane %v589_v57, 3  ;;  %v462_v6 = vrot.slane %v460_v58, 7  ;;  %v463_v7 = vshll.u32 %v389_v49, 16  ;;  %v549_v8 = vpack.c.b16 %v373_v37, %v373_v37 }
  0x2f   : > { %947 = vrot.lane.b32.xlu2 %v695_v30, %s3754_s23  ;;  %v3874_v9 = vsel %vm3805_vm2, %v309_v59, %v458_v60  ;;  %v3877_v10 = vsel %vm671_vm4, %v702_v61, %v706_v62  ;;  %v210_v11 = vpack.c.bf16 %v178_v63, %v178_v63  ;;  %v211_v12 = vpack.c.bf16 %v179_v0, %v179_v0  ;;  %v192_v63 = vld [vmem:[%s3793_s17 + $0xa0] sm:$0xff]  ;;  %v193_v0 = vld [vmem:[%s3793_s17 + $0xa8] sm:$0xff] }
  0x30   : > { %v762_v13 = vor.u32 %v761_v2, %v757_v1  ;;  %v766_v14 = vrot.slane %v764_v3, 1  ;;  %v312_v15 = vshrl.u32 %v277_v4, 16  ;;  %v663_v16 = vsel %vm3805_vm2, %v455_v50, %v591_v5 }
  0x31   : > { %v771_v17 = vshll.u32 %v3874_v9, 16  ;;  %v465_v18 = vor.u32 %v463_v7, %v462_v6  ;;  %v593_v19 = vshll.u32 %v549_v8, 16  ;;  %v904_v20 = vrot.slane %v3858_v45, 1 }
  0x32   : > { %945 = vrot.lane.b32.xlu0 %v683_v29, %s3754_s23  ;;  %v905_v21 = vrot.slane %v662_v56, 1  ;;  %v255_v22 = vunpack.c.l.b16 %v210_v11  ;;  %v367_v23 = vunpack.c.l.b16 %v211_v12  ;;  %v3890_v24 = vsel %vm671_vm4, %v762_v13, %v766_v14 }
  0x33   : > { %v889_v25 = vrot.slane %v3852_v38, 1  ;;  %v890_v26 = vrot.slane %v657_v47, 1  ;;  %v769_v27 = vshrl.u32 %v3874_v9, 16  ;;  %v773_v28 = vrot.slane %v771_v17, 1 }
  0x34   : > { %v3896_v31 = vsel %vm3805_vm2, %v312_v15, %v465_v18  ;;  %v3899_v33 = vsel %vm882_vm3, %v904_v20, %v905_v21  ;;  %v383_v34 = vpack.c.b16 %v367_v23, %v255_v22  ;;  %v907_v41 = vrot.slane %v3874_v9, 1 }
  0x35   : > { %v774_v35 = vor.u32 %v773_v28, %v769_v27  ;;  %v783_v39 = vshll.u32 %v3896_v31, 16  ;;  %v908_v42 = vrot.slane %v663_v16, 1  ;;  %v781_v48 = vshrl.u32 %v3896_v31, 16 }
  0x36   : > { %1037 = vrot.lane.b32.xlu1 %v695_v30, %s3755_s24  ;;  %v595_v30 = vrot.slane %v593_v19, 3  ;;  %v418_v40 = vshrl.u32 %v383_v34, 16  ;;  %v543_v50 = vpack.c.b16 %v367_v23, %v367_v23  ;;  %v271_v51 = vpack.c.b16 %v255_v22, %v255_v22 }
  0x37   : > { %1039 = vrot.lane.b32.xlu2 %v683_v29, %s3755_s24  ;;  %v785_v49 = vrot.slane %v783_v39, 1  ;;  %v421_v54 = vshll.u32 %v383_v34, 16  ;;  %v3919_v55 = vsel %vm882_vm3, %v907_v41, %v908_v42  ;;  %v910_v61 = vrot.slane %v3896_v31, 1 }
  0x38   : > { %v664_v37 = vsel %vm3805_vm2, %v462_v6, %v595_v30  ;;  %v420_v53 = vrot.slane %v418_v40, 7  ;;  %v569_v58 = vshll.u32 %v543_v50, 16  ;;  %v294_v59 = vshrl.u32 %v271_v51, 16  ;;  %v181_v30 = vld [vmem:[%s3793_s17 + $0x48] sm:$0xff] }
  0x39   : > { %v788_v43 = vshll.u32 %v664_v37, 16  ;;  %v786_v56 = vor.u32 %v785_v49, %v781_v48  ;;  %v911_v62 = vrot.slane %v664_v37, 1  ;;  %v224_v5 = vpack.c.bf16 %v192_v63, %v192_v63 }
  0x3a   : > { %1131 = vrot.lane.b32.xlu0 %v683_v29, %s3756_s25  ;;  %v776_v29 = vshll.u32 %v663_v16, 16  ;;  %v423_v60 = vor.u32 %v421_v54, %v420_v53  ;;  %v571_v2 = vrot.slane %v569_v58, 3  ;;  %v225_v6 = vpack.c.bf16 %v193_v0, %v193_v0 }
  0x3b   : > { %v790_v57 = vrot.slane %v788_v43, 1  ;;  %v3938_v4 = vsel %vm882_vm3, %v910_v61, %v911_v62  ;;  %v262_v11 = vunpack.c.l.b16 %v224_v5  ;;  %v213_v39 = vpack.c.bf16 %v181_v30, %v181_v30 }
  0x3c   : > { %v778_v36 = vrot.slane %v776_v29, 1  ;;  %v3935_v3 = vsel %vm3805_vm2, %v294_v59, %v423_v60  ;;  %v658_v8 = vsel %vm3805_vm2, %v420_v53, %v571_v2  ;;  %v374_v12 = vunpack.c.l.b16 %v225_v6  ;;  %v180_v29 = vld [vmem:[%s3793_s17 + $0x40] sm:$0xff] }
  0x3d   : > { %v3931_v1 = vsel %vm671_vm4, %v786_v56, %v790_v57  ;;  %v711_v7 = vshll.u32 %v3935_v3, 16  ;;  %v709_v13 = vshrl.u32 %v3935_v3, 16  ;;  %v716_v15 = vshll.u32 %v658_v8, 16 }
  0x3e   : > { %1103 = vrot.lane.b32.xlu1 %v3852_v38, %s3750_s19  ;;  %v3915_v47 = vsel %vm671_vm4, %v774_v35, %v778_v36  ;;  %v390_v16 = vpack.c.b16 %v374_v12, %v262_v11  ;;  %v892_v20 = vrot.slane %v3935_v3, 1  ;;  %v893_v21 = vrot.slane %v658_v8, 1  ;;  %v195_v8 = vld [vmem:[%s3793_s17 + $0xb8] sm:$0xff] }
  0x3f   : > { %1133 = vrot.lane.b32.xlu2 %v3877_v10, %s3756_s25  ;;  %v713_v14 = vrot.slane %v711_v7, 1  ;;  %v718_v18 = vrot.slane %v716_v15, 1  ;;  %v278_v23 = vpack.c.b16 %v262_v11, %v262_v11  ;;  %v550_v27 = vpack.c.b16 %v374_v12, %v374_v12  ;;  %v194_v7 = vld [vmem:[%s3793_s17 + $0xb0] sm:$0xff] }
  0x40   : > { %v467_v19 = vshrl.u32 %v390_v16, 16  ;;  %v3961_v28 = vsel %vm882_vm3, %v892_v20, %v893_v21  ;;  %v212_v37 = vpack.c.bf16 %v180_v29, %v180_v29  ;;  %v368_v43 = vunpack.c.l.b16 %v213_v39  ;;  %v1452_v11 = vld [vmem:[%s6351_s1 + $0x10] sm:$0x3] }
  0x41   : > { %v714_v17 = vor.u32 %v713_v14, %v709_v13  ;;  %v315_v34 = vshrl.u32 %v278_v23, 16  ;;  %v597_v36 = vshll.u32 %v550_v27, 16  ;;  %v1462_v13 = vunpack.c.l.b16 %v1452_v11 }
  0x42   : > { %1071 = vrot.lane.b32.xlu0 %v3827_v52, %s3752_s21  ;;  %v3904_v52 = vsel %vm882_vm3, %v889_v25, %v890_v26  ;;  %v469_v25 = vrot.slane %v467_v19, 7  ;;  %v470_v26 = vshll.u32 %v390_v16, 16  ;;  %v256_v42 = vunpack.c.l.b16 %v212_v37 }
  0x43   : > { %v3958_v22 = vsel %vm671_vm4, %v714_v17, %v718_v18  ;;  %v599_v40 = vrot.slane %v597_v36, 3  ;;  %v544_v59 = vpack.c.b16 %v368_v43, %v368_v43  ;;  %v226_v14 = vpack.c.bf16 %v194_v7, %v194_v7 }
  0x44   : > { %v472_v35 = vor.u32 %v470_v26, %v469_v25  ;;  %v384_v50 = vpack.c.b16 %v368_v43, %v256_v42  ;;  %v272_v60 = vpack.c.b16 %v256_v42, %v256_v42  ;;  %v227_v16 = vpack.c.bf16 %v195_v8, %v195_v8 }
  0x45   : > { %v665_v49 = vsel %vm3805_vm2, %v469_v25, %v599_v40  ;;  %v573_v2 = vshll.u32 %v544_v59, 16  ;;  %v1465_v18 = vpack.c.b16 %v1462_v13, %v1462_v13  ;;  %v263_v25 = vunpack.c.l.b16 %v226_v14  ;;  %v3679_v40 = vld [vmem:[%s6351_s1] sm:$0xff] }
  0x46   : > { %959 = vrot.lane.b32.xlu1 %v3890_v24, %s3754_s23  ;;  %v3973_v41 = vsel %vm3805_vm2, %v315_v34, %v472_v35  ;;  %v800_v54 = vshll.u32 %v665_v49, 16  ;;  %v425_v56 = vshrl.u32 %v384_v50, 16  ;;  %v428_v62 = vshll.u32 %v384_v50, 16 }
  0x47   : > { %989 = vrot.lane.b32.xlu2 %v3899_v33, %s3751_s20  ;;  %v795_v48 = vshll.u32 %v3973_v41, 16  ;;  %v793_v51 = vshrl.u32 %v3973_v41, 16  ;;  %v297_v5 = vshrl.u32 %v272_v60, 16  ;;  %v575_v12 = vrot.slane %v573_v2, 3  ;;  %v183_v2 = vld [vmem:[%s3793_s17 + $0x58] sm:$0xff] }
  0x48   : > { %v802_v58 = vrot.slane %v800_v54, 1  ;;  %v427_v61 = vrot.slane %v425_v56, 7  ;;  %v913_v20 = vrot.slane %v3973_v41, 1  ;;  %v1503_v23 = vsel %vm1501_vm5, %v1465_v18, 0 }
  0x49   : > { %v797_v53 = vrot.slane %v795_v48, 1  ;;  %1510 = vmatpush.bf16.msra.mxu0 %v1503_v23  ;;  %v375_v30 = vunpack.c.l.b16 %v227_v16  ;;  %3683 = vmatpush.bf16.msra.mxu2 %v1503_v23  ;;  %v279_v50 = vpack.c.b16 %v263_v25, %v263_v25 }
  0x4a   : > { %1163 = vrot.lane.b32.xlu0 %v3904_v52, %s3753_s22  ;;  %v430_v6 = vor.u32 %v428_v62, %v427_v61  ;;  %v659_v21 = vsel %vm3805_vm2, %v427_v61, %v575_v12  ;;  %v182_v62 = vld [vmem:[%s3793_s17 + $0x50] sm:$0xff]  ;;  %v215_v12 = vpack.c.bf16 %v183_v2, %v183_v2 }
  0x4b   : > { %v798_v57 = vor.u32 %v797_v53, %v793_v51  ;;  %v728_v29 = vshll.u32 %v659_v21, 16  ;;  %v391_v37 = vpack.c.b16 %v375_v30, %v263_v25  ;;  %v551_v48 = vpack.c.b16 %v375_v30, %v375_v30 }
  0x4c   : > { %v4007_v15 = vsel %vm3805_vm2, %v297_v5, %v430_v6  ;;  %v318_v60 = vshrl.u32 %v279_v50, 16  ;;  %v214_v7 = vpack.c.bf16 %v182_v62, %v182_v62  ;;  %v369_v18 = vunpack.c.l.b16 %v215_v12 }
  0x4d   : > { %v3994_v0 = vsel %vm671_vm4, %v798_v57, %v802_v58  ;;  %v723_v19 = vshll.u32 %v4007_v15, 16  ;;  %v721_v26 = vshrl.u32 %v4007_v15, 16  ;;  %v730_v36 = vrot.slane %v728_v29, 1 }
  0x4e   : > { %1053 = vrot.lane.b32.xlu1 %v3915_v47, %s3755_s24  ;;  %v474_v43 = vshrl.u32 %v391_v37, 16  ;;  %v477_v53 = vshll.u32 %v391_v37, 16  ;;  %v895_v56 = vrot.slane %v4007_v15, 1  ;;  %v896_v57 = vrot.slane %v659_v21, 1 }
  0x4f   : > { %1085 = vrot.lane.b32.xlu2 %v3919_v55, %s3752_s21  ;;  %v725_v27 = vrot.slane %v723_v19, 1  ;;  %v601_v58 = vshll.u32 %v551_v48, 16  ;;  %v257_v16 = vunpack.c.l.b16 %v214_v7 }
  0x50   : > { %v476_v51 = vrot.slane %v474_v43, 7  ;;  %v4053_v5 = vsel %vm882_vm3, %v895_v56, %v896_v57  ;;  %v545_v43 = vpack.c.b16 %v369_v18, %v369_v18 }
  0x51   : > { %v726_v35 = vor.u32 %v725_v27, %v721_v26  ;;  %v603_v6 = vrot.slane %v601_v58, 3  ;;  %v385_v23 = vpack.c.b16 %v369_v18, %v257_v16  ;;  %v273_v50 = vpack.c.b16 %v257_v16, %v257_v16 }
  0x52   : > { %1021 = vrot.lane.b32.xlu0 %v3874_v9, %s3749_s18  ;;  %v479_v61 = vor.u32 %v477_v53, %v476_v51  ;;  %v577_v62 = vshll.u32 %v545_v43, 16  ;;  %v184_v43 = vld [vmem:[%s3793_s17 + $0x60] sm:$0xff] }
  0x53   : > { %v4037_v42 = vsel %vm671_vm4, %v726_v35, %v730_v36  ;;  %v432_v30 = vshrl.u32 %v385_v23, 16  ;;  %v435_v53 = vshll.u32 %v385_v23, 16 }
  0x54   : > { %v4061_v11 = vsel %vm3805_vm2, %v318_v60, %v479_v61  ;;  %v579_v12 = vrot.slane %v577_v62, 3 }
  0x55   : > { %v807_v14 = vshll.u32 %v4061_v11, 16  ;;  %v805_v19 = vshrl.u32 %v4061_v11, 16  ;;  %v916_v37 = vrot.slane %v4061_v11, 1 }
  0x56   : > { %1147 = vrot.lane.b32.xlu1 %v3931_v1, %s3756_s25 }
  0x57   : > { %1177 = vrot.lane.b32.xlu2 %v3938_v4, %s3753_s22 }
  0x5a   : > { %1117 = vrot.lane.b32.xlu0 %v3896_v31, %s3750_s19 }
  0x5e   : > { %1041 = vrot.lane.b32.xlu1 %v3877_v10, %s3755_s24 }
  0x5f   : > { %1073 = vrot.lane.b32.xlu2 %v3904_v52, %s3752_s21 }
  0x62   : > { %1009 = vrot.lane.b32.xlu0 %v3852_v38, %s3749_s18 }
  0x66   : > { %1135 = vrot.lane.b32.xlu1 %v3958_v22, %s3756_s25 }
  0x67   : > { %1165 = vrot.lane.b32.xlu2 %v3961_v28, %s3753_s22 }
  0x6a   : > { %1105 = vrot.lane.b32.xlu0 %v3935_v3, %s3750_s19 }
  0x6e   : > { %991 = vrot.lane.b32.xlu1 %v3919_v55, %s3751_s20 }
  0x6f   : > { %1023 = vrot.lane.b32.xlu2 %v3896_v31, %s3749_s18 }
  0x72   : > { %961 = vrot.lane.b32.xlu0 %v3915_v47, %s3754_s23 }
  0x76   : > { %1087 = vrot.lane.b32.xlu1 %v3938_v4, %s3752_s21 }
  0x77   : > { %1119 = vrot.lane.b32.xlu2 %v3973_v41, %s3750_s19 }
  0x79   : > { %v3989_v63 = vpop.permute.xlu2 %1101 }
  0x7a   : > { %1055 = vrot.lane.b32.xlu0 %v3931_v1, %s3755_s24 }
  0x7e   : > { %1149 = vrot.lane.b32.xlu1 %v3994_v0, %s3756_s25 }
  0x7f   : > { %979 = vrot.lane.b32.xlu2 %v3904_v52, %s3751_s20  ;;  %v914_v52 = vrot.slane %v665_v49, 1 }
  0x81   : > { %v4009_v17 = vpop.permute.xlu2 %1069  ;;  %v4025_v34 = vsel %vm882_vm3, %v913_v20, %v914_v52  ;;  %v809_v20 = vrot.slane %v807_v14, 1 }
  0x82   : > { %949 = vrot.lane.b32.xlu0 %v3877_v10, %s3754_s23  ;;  %v3680_v10 = vld [vmem:[%s6351_s1 + $0x8] sm:$0xff] }
  0x83   : > { %1511 = vmatpush.bf16.msra.mxu0 %v3680_v10  ;;  %3684 = vmatpush.bf16.msra.mxu2 %v3680_v10  ;;  %v810_v25 = vor.u32 %v809_v20, %v805_v19 }
  0x86   : > { %1011 = vrot.lane.b32.xlu1 %v3935_v3, %s3749_s18 }
  0x87   : > { %1043 = vrot.lane.b32.xlu2 %v3958_v22, %s3755_s24  ;;  %1512 = vmatpush.bf16.msra.mxu0 %v3679_v40 }
  0x88   : > { %3685 = vmatpush.bf16.msra.mxu2 %v3679_v40 }
  0x89   : > { %v4029_v39 = vpop.permute.xlu2 %947 }
  0x8a   : > { %1179 = vrot.lane.b32.xlu0 %v4025_v34, %s3753_s22 }
  0x8e   : > { %1107 = vrot.lane.b32.xlu1 %v4007_v15, %s3750_s19 }
  0x8f   : > { %1137 = vrot.lane.b32.xlu2 %v4037_v42, %s3756_s25 }
  0x90   : > { %v1006_v49 = vpop.permute.xlu1 %1005 }
  0x91   : > { %v4043_v54 = vpop.permute.xlu2 %1039 }
  0x92   : > { %1075 = vrot.lane.b32.xlu0 %v3961_v28, %s3752_s21 }
  0x94   : > { %v976_v59 = vpop.permute.xlu0 %975 }
  0x96   : > { %963 = vrot.lane.b32.xlu1 %v3931_v1, %s3754_s23  ;;  %v666_v1 = vsel %vm3805_vm2, %v476_v51, %v603_v6  ;;  %v434_v51 = vrot.slane %v432_v30, 7  ;;  %v197_v6 = vld [vmem:[%s3793_s17 + $0xc8] sm:$0xff] }
  0x97   : > { %993 = vrot.lane.b32.xlu2 %v3938_v4, %s3751_s20  ;;  %v812_v52 = vshll.u32 %v666_v1, 16  ;;  %v917_v40 = vrot.slane %v666_v1, 1  ;;  %v229_v18 = vpack.c.bf16 %v197_v6, %v197_v6 }
  0x98   : > { %v4057_v8 = vpop.permute.xlu1 %1007  ;;  %v437_v61 = vor.u32 %v435_v53, %v434_v51 }
  0x99   : > { %v4063_v13 = vpop.permute.xlu2 %1133  ;;  %v814_v26 = vrot.slane %v812_v52, 1  ;;  %v660_v52 = vsel %vm3805_vm2, %v434_v51, %v579_v12 }
  0x9a   : > { %1167 = vrot.lane.b32.xlu0 %v4053_v5, %s3753_s22 }
  0x9b   : > { %v4080_v10 = vsel %vm671_vm4, %v810_v25, %v814_v26  ;;  %v376_v25 = vunpack.c.l.b16 %v229_v18  ;;  %v899_v26 = vrot.slane %v660_v52, 1 }
  0x9c   : > { %v978_v4 = vpop.permute.xlu0 %977 }
  0x9d   : > { %v552_v62 = vpack.c.b16 %v376_v25, %v376_v25 }
  0x9e   : > { %1057 = vrot.lane.b32.xlu1 %v3994_v0, %s3755_s24 }
  0x9f   : > { %1089 = vrot.lane.b32.xlu2 %v4025_v34, %s3752_s21 }
  0xa0   : > { %v1162_v21 = vpop.permute.xlu1 %1161 }
  0xa1   : > { %v4075_v27 = vpop.permute.xlu2 %989 }
  0xa2   : > { %1025 = vrot.lane.b32.xlu0 %v3973_v41, %s3749_s18 }
  0xa4   : > { %v946_v29 = vpop.permute.xlu0 %945 }
  0xa5   : > { %v1193_v35 = vsel %vm1191_vm6, %v3819_v46, %v946_v29 }
  0xa6   : > { %v4085_v36 = vsel %vm1222_vm7, %v1193_v35, %v976_v59  ;;  %951 = vrot.lane.b32.xlu1 %v3958_v22, %s3754_s23  ;;  %v4107_v59 = vsel %vm882_vm3, %v916_v37, %v917_v40  ;;  %v740_v35 = vshll.u32 %v660_v52, 16 }
  0xa7   : > { %1151 = vrot.lane.b32.xlu2 %v4080_v10, %s3756_s25  ;;  %v1255_v46 = vsel %vm1253_vm8, %v4085_v36, %v1006_v49  ;;  %v1195_v49 = vsel %vm1191_vm6, %v3813_v44, %v4029_v39 }
  0xa8   : > { %v1038_v48 = vpop.permute.xlu1 %1037  ;;  %v1226_v39 = vsel %vm1222_vm7, %v1195_v49, %v978_v4  ;;  %v742_v53 = vrot.slane %v740_v35, 1  ;;  %v216_v49 = vpack.c.bf16 %v184_v43, %v184_v43 }
  0xa9   : > { %v1288_v56 = vsel %vm1286_vm9, %v1255_v46, %v1038_v48  ;;  %v4095_v57 = vpop.permute.xlu2 %1085  ;;  %v1257_v16 = vsel %vm1253_vm8, %v1226_v39, %v4057_v8  ;;  %v185_v46 = vld [vmem:[%s3793_s17 + $0x68] sm:$0xff] }
  0xaa   : > { %v1321_v22 = vsel %vm1319_vm10, %v1288_v56, %v4009_v17  ;;  %1121 = vrot.lane.b32.xlu0 %v4061_v11, %s3750_s19  ;;  %v300_v17 = vshrl.u32 %v273_v50, 16 }
  0xab   : > { %v1354_v58 = vsel %vm1352_vm11, %v1321_v22, %v3989_v63  ;;  %v196_v63 = vld [vmem:[%s3793_s17 + $0xc0] sm:$0xff] }
  0xac   : > { %v1132_v60 = vpop.permute.xlu0 %1131  ;;  %v4121_v14 = vsel %vm3805_vm2, %v300_v17, %v437_v61  ;;  %v228_v4 = vpack.c.bf16 %v196_v63, %v196_v63 }
  0xad   : > { %v1386_v2 = vsel %vm1384_vm12, %v1354_v58, %v1132_v60  ;;  %v735_v19 = vshll.u32 %v4121_v14, 16  ;;  %v733_v29 = vshrl.u32 %v4121_v14, 16  ;;  %v217_v58 = vpack.c.bf16 %v185_v46, %v185_v46 }
  0xae   : > { %1181 = vrot.lane.b32.xlu1 %v4107_v59, %s3753_s22  ;;  %v1418_v44 = vsel %vm1416_vm13, %v1386_v2, %v1162_v21  ;;  %v1290_v21 = vsel %vm1286_vm9, %v1257_v16, %v4043_v54  ;;  %v264_v8 = vunpack.c.l.b16 %v228_v4  ;;  %v605_v16 = vshll.u32 %v552_v62, 16 }
  0xaf   : > { %3635 = vmatmul.msk.bf16.vlgmr.msra.gmra.mxu0 %vm1468_vm14, %v1418_v44  ;;  %1013 = vrot.lane.b32.xlu2 %v4007_v15, %s3749_s18  ;;  %v737_v30 = vrot.slane %v735_v19, 1  ;;  %v258_v44 = vunpack.c.l.b16 %v216_v49 }
  0xb0   : > { %v1104_v7 = vpop.permute.xlu1 %1103  ;;  %v392_v48 = vpack.c.b16 %v376_v25, %v264_v8  ;;  %v280_v6 = vpack.c.b16 %v264_v8, %v264_v8 }
  0xb1   : > { %v4123_v1 = vpop.permute.xlu2 %1177  ;;  %v738_v51 = vor.u32 %v737_v30, %v733_v29 }
  0xb2   : > { %981 = vrot.lane.b32.xlu0 %v3961_v28, %s3751_s20  ;;  %v898_v28 = vrot.slane %v4121_v14, 1  ;;  %v481_v17 = vshrl.u32 %v392_v48, 16  ;;  %v484_v12 = vshll.u32 %v392_v48, 16 }
  0xb3   : > { %v4158_v61 = vsel %vm671_vm4, %v738_v51, %v742_v53 }
  0xb4   : > { %v1072_v20 = vpop.permute.xlu0 %1071  ;;  %v4149_v50 = vsel %vm882_vm3, %v898_v28, %v899_v26 }
  0xb5   : > { %v1323_v23 = vsel %vm1319_vm10, %v1290_v21, %v1072_v20  ;;  %v321_v20 = vshrl.u32 %v280_v6, 16  ;;  %v607_v21 = vrot.slane %v605_v16, 3 }
  0xb6   : > { %1077 = vrot.lane.b32.xlu1 %v4053_v5, %s3752_s21  ;;  %v1356_v54 = vsel %vm1352_vm11, %v1323_v23, %v1104_v7  ;;  %v483_v7 = vrot.slane %v481_v17, 7 }
  0xb7   : > { %1109 = vrot.lane.b32.xlu2 %v4121_v14, %s3750_s19  ;;  %v1388_v22 = vsel %vm1384_vm12, %v1356_v54, %v4063_v13  ;;  %v370_v13 = vunpack.c.l.b16 %v217_v58  ;;  %v274_v54 = vpack.c.b16 %v258_v44, %v258_v44 }
  0xb8   : > { %v960_v37 = vpop.permute.xlu1 %959  ;;  %v486_v52 = vor.u32 %v484_v12, %v483_v7  ;;  %v667_v26 = vsel %vm3805_vm2, %v483_v7, %v607_v21 }
  0xb9   : > { %v4142_v40 = vpop.permute.xlu2 %1073  ;;  %v1207_v63 = vsel %vm1191_vm6, %v3858_v45, %v960_v37  ;;  %v386_v18 = vpack.c.b16 %v370_v13, %v258_v44  ;;  %v546_v30 = vpack.c.b16 %v370_v13, %v370_v13  ;;  %v303_v58 = vshrl.u32 %v274_v54, 16  ;;  %v198_v44 = vld [vmem:[%s3793_s17 + $0xd0] sm:$0xff]  ;;  %v199_v13 = vld [vmem:[%s3793_s17 + $0xd8] sm:$0xff] }
  0xba   : > { %1045 = vrot.lane.b32.xlu0 %v4037_v42, %s3755_s24  ;;  %v920_v62 = vrot.slane %v667_v26, 1  ;;  %v230_v16 = vpack.c.bf16 %v198_v44, %v198_v44 }
  0xbb   : > { %v439_v28 = vshrl.u32 %v386_v18, 16  ;;  %v442_v46 = vshll.u32 %v386_v18, 16 }
  0xbc   : > { %v1164_v56 = vpop.permute.xlu0 %1163  ;;  %v265_v21 = vunpack.c.l.b16 %v230_v16 }
  0xbd   : > { %v1420_v60 = vsel %vm1416_vm13, %v1388_v22, %v1164_v56  ;;  %v441_v43 = vrot.slane %v439_v28, 7  ;;  %v824_v22 = vshll.u32 %v667_v26, 16 }
  0xbe   : > { %1169 = vrot.lane.b32.xlu1 %v4149_v50, %s3753_s22 }
  0xbf   : > { %3636 = vmatmul.msk.bf16.gmra.mxu0 %vm1468_vm14, %v1420_v60  ;;  %965 = vrot.lane.b32.xlu2 %v3994_v0, %s3754_s23  ;;  %v1238_v0 = vsel %vm1222_vm7, %v1207_v63, %v4075_v27  ;;  %v4182_v27 = vsel %vm3805_vm2, %v321_v20, %v486_v52  ;;  %v444_v60 = vor.u32 %v442_v46, %v441_v43  ;;  %v826_v63 = vrot.slane %v824_v22, 1 }
  0xc0   : > { %v1054_v2 = vpop.permute.xlu1 %1053  ;;  %v819_v29 = vshll.u32 %v4182_v27, 16  ;;  %v817_v51 = vshrl.u32 %v4182_v27, 16  ;;  %v919_v17 = vrot.slane %v4182_v27, 1 }
  0xc1   : > { %v4162_v39 = vpop.permute.xlu2 %1165 }
  0xc2   : > { %1139 = vrot.lane.b32.xlu0 %v4158_v61, %s3756_s25  ;;  %v821_v56 = vrot.slane %v819_v29, 1  ;;  %v4211_v12 = vsel %vm882_vm3, %v919_v17, %v920_v62 }
  0xc4   : > { %v1022_v4 = vpop.permute.xlu0 %1021 }
  0xc5   : > { %v1271_v19 = vsel %vm1253_vm8, %v1238_v0, %v1022_v4  ;;  %v231_v4 = vpack.c.bf16 %v199_v13, %v199_v13 }
  0xc6   : > { %1027 = vrot.lane.b32.xlu1 %v4061_v11, %s3749_s18  ;;  %v1304_v8 = vsel %vm1286_vm9, %v1271_v19, %v1054_v2 }
  0xc7   : > { %1059 = vrot.lane.b32.xlu2 %v4080_v10, %s3755_s24  ;;  %v1337_v37 = vsel %vm1319_vm10, %v1304_v8, %v4095_v57  ;;  %v581_v57 = vshll.u32 %v546_v30, 16 }
  0xc8   : > { %v1148_v23 = vpop.permute.xlu1 %1147 }
  0xc9   : > { %v4176_v25 = vpop.permute.xlu2 %1023  ;;  %v583_v6 = vrot.slane %v581_v57, 3 }
  0xca   : > { %995 = vrot.lane.b32.xlu0 %v4025_v34, %s3751_s20 }
  0xcb   : > { %v661_v52 = vsel %vm3805_vm2, %v441_v43, %v583_v6 }
  0xcc   : > { %v1118_v35 = vpop.permute.xlu0 %1117  ;;  %v752_v26 = vshll.u32 %v661_v52, 16 }
  0xcd   : > { %v1370_v48 = vsel %vm1352_vm11, %v1337_v37, %v1118_v35 }
  0xce   : > { %1123 = vrot.lane.b32.xlu1 %v4182_v27, %s3750_s19  ;;  %v1402_v34 = vsel %vm1384_vm12, %v1370_v48, %v1148_v23  ;;  %v377_v23 = vunpack.c.l.b16 %v231_v4  ;;  %v754_v48 = vrot.slane %v752_v26, 1 }
  0xcf   : > { %v1434_v53 = vsel %vm1416_vm13, %v1402_v34, %v4123_v1  ;;  %953 = vrot.lane.b32.xlu2 %v4037_v42, %s3754_s23  ;;  %v822_v1 = vor.u32 %v821_v56, %v817_v51  ;;  %v4208_v42 = vsel %vm3805_vm2, %v303_v58, %v444_v60 }
  0xd0   : > { %3643 = vmatmul.msk.bf16.vlgmr.msra.gmra.mxu2 %vm1468_vm14, %v1434_v53  ;;  %v1042_v49 = vpop.permute.xlu1 %1041  ;;  %v747_v19 = vshll.u32 %v4208_v42, 16  ;;  %v393_v35 = vpack.c.b16 %v377_v23, %v265_v21  ;;  %v901_v51 = vrot.slane %v4208_v42, 1  ;;  %v902_v53 = vrot.slane %v661_v52, 1 }
  0xd1   : > { %v4200_v2 = vpop.permute.xlu2 %1119  ;;  %v4218_v0 = vsel %vm671_vm4, %v822_v1, %v826_v63  ;;  %v553_v60 = vpack.c.b16 %v377_v23, %v377_v23 }
  0xd2   : > { %1091 = vrot.lane.b32.xlu0 %v4107_v59, %s3752_s21  ;;  %v749_v8 = vrot.slane %v747_v19, 1  ;;  %v491_v58 = vshll.u32 %v393_v35, 16  ;;  %v4251_v17 = vsel %vm882_vm3, %v901_v51, %v902_v53  ;;  %v201_v51 = vld [vmem:[%s3793_s17 + $0xe8] sm:$0xff] }
  0xd3   : > { %v609_v1 = vshll.u32 %v553_v60, 16  ;;  %v233_v60 = vpack.c.bf16 %v201_v51, %v201_v51 }
  0xd4   : > { %v1010_v7 = vpop.permute.xlu0 %1009 }
  0xd5   : > { %v1259_v18 = vsel %vm1253_vm8, %v4085_v36, %v1010_v7  ;;  %v611_v7 = vrot.slane %v609_v1, 3 }
  0xd6   : > { %983 = vrot.lane.b32.xlu1 %v4053_v5, %s3751_s20  ;;  %v1292_v28 = vsel %vm1286_vm9, %v1259_v18, %v1042_v49  ;;  %v745_v5 = vshrl.u32 %v4208_v42, 16 }
  0xd7   : > { %1183 = vrot.lane.b32.xlu2 %v4211_v12, %s3753_s22  ;;  %v1325_v30 = vsel %vm1319_vm10, %v1292_v28, %v4142_v40  ;;  %v488_v40 = vshrl.u32 %v393_v35, 16 }
  0xd8   : > { %v1136_v20 = vpop.permute.xlu1 %1135  ;;  %v750_v46 = vor.u32 %v749_v8, %v745_v5 }
  0xd9   : > { %v4226_v36 = vpop.permute.xlu2 %979  ;;  %v490_v49 = vrot.slane %v488_v40, 7  ;;  %v200_v40 = vld [vmem:[%s3793_s17 + $0xe0] sm:$0xff] }
  0xda   : > { %1153 = vrot.lane.b32.xlu0 %v4218_v0, %s3756_s25  ;;  %v4248_v22 = vsel %vm671_vm4, %v750_v46, %v754_v48 }
  0xdb   : > { %v493_v13 = vor.u32 %v491_v58, %v490_v49  ;;  %v232_v58 = vpack.c.bf16 %v200_v40, %v200_v40 }
  0xdc   : > { %v1106_v29 = vpop.permute.xlu0 %1105 }
  0xdd   : > { %v1358_v37 = vsel %vm1352_vm11, %v1325_v30, %v1106_v29 }
  0xde   : > { %1047 = vrot.lane.b32.xlu1 %v4158_v61, %s3755_s24  ;;  %v1390_v54 = vsel %vm1384_vm12, %v1358_v37, %v1136_v20  ;;  %v668_v20 = vsel %vm3805_vm2, %v490_v49, %v611_v7 }
  0xdf   : > { %v1422_v43 = vsel %vm1416_vm13, %v1390_v54, %v4162_v39  ;;  %1079 = vrot.lane.b32.xlu2 %v4149_v50, %s3752_s21  ;;  %v281_v39 = vpack.c.b16 %v265_v21, %v265_v21  ;;  %v923_v49 = vrot.slane %v668_v20, 1 }
  0xe0   : > { %3637 = vmatmul.msk.bf16.gmra.mxu0 %vm1468_vm14, %v1422_v43  ;;  %v992_v34 = vpop.permute.xlu1 %991 }
  0xe1   : > { %v4243_v56 = vpop.permute.xlu2 %1043  ;;  %v324_v44 = vshrl.u32 %v281_v39, 16 }
  0xe2   : > { %1015 = vrot.lane.b32.xlu0 %v4121_v14, %s3749_s18 }
  0xe3   : > { %v4263_v16 = vsel %vm3805_vm2, %v324_v44, %v493_v13  ;;  %v378_v13 = vunpack.c.l.b16 %v233_v60 }
  0xe4   : > { %v962_v57 = vpop.permute.xlu0 %961  ;;  %v831_v18 = vshll.u32 %v4263_v16, 16  ;;  %v829_v23 = vshrl.u32 %v4263_v16, 16 }
  0xe5   : > { %v1209_v4 = vsel %vm1191_vm6, %v3874_v9, %v962_v57 }
  0xe6   : > { %1141 = vrot.lane.b32.xlu1 %v4248_v22, %s3756_s25  ;;  %v1240_v52 = vsel %vm1222_vm7, %v1209_v4, %v992_v34  ;;  %v833_v28 = vrot.slane %v831_v18, 1 }
  0xe7   : > { %1171 = vrot.lane.b32.xlu2 %v4251_v17, %s3753_s22  ;;  %v1273_v5 = vsel %vm1253_vm8, %v1240_v52, %v4176_v25 }
  0xe8   : > { %v1088_v62 = vpop.permute.xlu1 %1087  ;;  %v834_v29 = vor.u32 %v833_v28, %v829_v23  ;;  %v554_v28 = vpack.c.b16 %v378_v13, %v378_v13 }
  0xe9   : > { %v4257_v63 = vpop.permute.xlu2 %1137 }
  0xea   : > { %1111 = vrot.lane.b32.xlu0 %v4208_v42, %s3750_s19 }
  0xec   : > { %v1056_v6 = vpop.permute.xlu0 %1055 }
  0xed   : > { %v1306_v26 = vsel %vm1286_vm9, %v1273_v5, %v1056_v6 }
  0xee   : > { %997 = vrot.lane.b32.xlu1 %v4107_v59, %s3751_s20  ;;  %v836_v59 = vshll.u32 %v668_v20, 16 }
  0xef   : > { %1029 = vrot.lane.b32.xlu2 %v4182_v27, %s3749_s18 }
  0xf0   : > { %v1150_v19 = vpop.permute.xlu1 %1149  ;;  %v838_v30 = vrot.slane %v836_v59, 1 }
  0xf1   : > { %v4275_v21 = vpop.permute.xlu2 %993 }
  0xf2   : > { %967 = vrot.lane.b32.xlu0 %v4080_v10, %s3754_s23  ;;  %v1339_v10 = vsel %vm1319_vm10, %v1306_v26, %v1088_v62  ;;  %v4295_v54 = vsel %vm671_vm4, %v834_v29, %v838_v30  ;;  %v613_v30 = vshll.u32 %v554_v28, 16 }
  0xf3   : > { %v1372_v25 = vsel %vm1352_vm11, %v1339_v10, %v4200_v2 }
  0xf4   : > { %v950_v8 = vpop.permute.xlu0 %949  ;;  %v1404_v43 = vsel %vm1384_vm12, %v1372_v25, %v1150_v19 }
  0xf5   : > { %v1197_v34 = vsel %vm1191_vm6, %v3852_v38, %v950_v8  ;;  %v922_v38 = vrot.slane %v4263_v16, 1 }
  0xf6   : > { %1093 = vrot.lane.b32.xlu1 %v4211_v12, %s3752_s21  ;;  %v1228_v53 = vsel %vm1222_vm7, %v1197_v34, %v4226_v36 }
  0xf7   : > { %1125 = vrot.lane.b32.xlu2 %v4263_v16, %s3750_s19  ;;  %v4320_v36 = vsel %vm882_vm3, %v922_v38, %v923_v49 }
  0xf8   : > { %v1012_v35 = vpop.permute.xlu1 %1011 }
  0xf9   : > { %v4288_v37 = vpop.permute.xlu2 %1089  ;;  %v1261_v57 = vsel %vm1253_vm8, %v1228_v53, %v1012_v35 }
  0xfa   : > { %1061 = vrot.lane.b32.xlu0 %v4218_v0, %s3755_s24 }
  0xfc   : > { %v1180_v46 = vpop.permute.xlu0 %1179 }
  0xfd   : > { %v1436_v48 = vsel %vm1416_vm13, %v1404_v43, %v1180_v46  ;;  %v615_v46 = vrot.slane %v613_v30, 3 }
  0xfe   : > { %3644 = vmatmul.msk.bf16.gmra.mxu2 %vm1468_vm14, %v1436_v48  ;;  %1155 = vrot.lane.b32.xlu1 %v4295_v54, %s3756_s25 }
  0xff   : > { %985 = vrot.lane.b32.xlu2 %v4149_v50, %s3751_s20  ;;  %v1294_v50 = vsel %vm1286_vm9, %v1261_v57, %v4243_v56 }
 0x100   : > { %v1108_v2 = vpop.permute.xlu1 %1107 }
 0x101   : > { %v1152_v39 = vpop.permute.xlu2 %1151 }
 0x102   : > { %955 = vrot.lane.b32.xlu0 %v4158_v61, %s3754_s23  ;;  %v266_v61 = vunpack.c.l.b16 %v232_v58 }
 0x104   : > { %v1076_v62 = vpop.permute.xlu0 %1075  ;;  %v394_v56 = vpack.c.b16 %v378_v13, %v266_v61 }
 0x105   : > { %v1327_v44 = vsel %vm1319_vm10, %v1294_v50, %v1076_v62 }
 0x106   : > { %1017 = vrot.lane.b32.xlu1 %v4208_v42, %s3749_s18  ;;  %v1360_v6 = vsel %vm1352_vm11, %v1327_v44, %v1108_v2  ;;  %v495_v20 = vshrl.u32 %v394_v56, 16  ;;  %v498_v8 = vshll.u32 %v394_v56, 16 }
 0x107   : > { %1049 = vrot.lane.b32.xlu2 %v4248_v22, %s3755_s24  ;;  %v1392_v18 = vsel %vm1384_vm12, %v1360_v6, %v4257_v63  ;;  %v282_v63 = vpack.c.b16 %v266_v61, %v266_v61  ;;  %v202_v61 = vld [vmem:[%s3793_s17 + $0xf0] sm:$0xff] }
 0x108   : > { %v964_v1 = vpop.permute.xlu1 %963  ;;  %v497_v5 = vrot.slane %v495_v20, 7 }
 0x109   : > { %v4325_v7 = vpop.permute.xlu2 %1013  ;;  %v1211_v59 = vsel %vm1191_vm6, %v3896_v31, %v964_v1  ;;  %v327_v35 = vshrl.u32 %v282_v63, 16 }
 0x10a   : > { %1185 = vrot.lane.b32.xlu0 %v4320_v36, %s3753_s22  ;;  %v1242_v29 = vsel %vm1222_vm7, %v1211_v59, %v4275_v21  ;;  %v500_v25 = vor.u32 %v498_v8, %v497_v5  ;;  %v669_v40 = vsel %vm3805_vm2, %v497_v5, %v615_v46 }
 0x10b   : > { %v848_v57 = vshll.u32 %v669_v40, 16  ;;  %v926_v1 = vrot.slane %v669_v40, 1 }
 0x10c   : > { %v1168_v4 = vpop.permute.xlu0 %1167  ;;  %v4357_v21 = vsel %vm3805_vm2, %v327_v35, %v500_v25 }
 0x10d   : > { %v1424_v19 = vsel %vm1416_vm13, %v1392_v18, %v1168_v4  ;;  %v843_v2 = vshll.u32 %v4357_v21, 16  ;;  %v841_v51 = vshrl.u32 %v4357_v21, 16  ;;  %v850_v58 = vrot.slane %v848_v57, 1 }
 0x10e   : > { %3638 = vmatmul.msk.bf16.gmra.mxu0 %vm1468_vm14, %v1424_v19  ;;  %1113 = vrot.lane.b32.xlu1 %v3858_v45, %s3750_s19  ;;  %v925_v13 = vrot.slane %v4357_v21, 1  ;;  %v234_v18 = vpack.c.bf16 %v202_v61, %v202_v61 }
 0x10f   : > { %1143 = vrot.lane.b32.xlu2 %v3890_v24, %s3756_s25  ;;  %v845_v53 = vrot.slane %v843_v2, 1 }
 0x110   : > { %v1058_v52 = vpop.permute.xlu1 %1057  ;;  %v267_v59 = vunpack.c.l.b16 %v234_v18 }
 0x111   : > { %v4337_v23 = vpop.permute.xlu2 %1109  ;;  %v846_v49 = vor.u32 %v845_v53, %v841_v51 }
 0x112   : > { %1081 = vrot.lane.b32.xlu0 %v4251_v17, %s3752_s21 }
 0x113   : > { %v4378_v44 = vsel %vm671_vm4, %v846_v49, %v850_v58 }
 0x114   : > { %v1026_v26 = vpop.permute.xlu0 %1025 }
 0x115   : > { %v1275_v10 = vsel %vm1253_vm8, %v1242_v29, %v1026_v26 }
 0x116   : > { %969 = vrot.lane.b32.xlu1 %v4218_v0, %s3754_s23  ;;  %v1308_v43 = vsel %vm1286_vm9, %v1275_v10, %v1058_v52 }
 0x117   : > { %999 = vrot.lane.b32.xlu2 %v4211_v12, %s3751_s20  ;;  %v1341_v0 = vsel %vm1319_vm10, %v1308_v43, %v4288_v37 }
 0x118   : > { %v952_v31 = vpop.permute.xlu1 %951 }
 0x119   : > { %v4351_v48 = vpop.permute.xlu2 %965  ;;  %v1199_v56 = vsel %vm1191_vm6, %v3935_v3, %v952_v31 }
 0x11a   : > { %1173 = vrot.lane.b32.xlu0 %v3899_v33, %s3753_s22 }
 0x11c   : > { %v1122_v34 = vpop.permute.xlu0 %1121 }
 0x11d   : > { %v1374_v12 = vsel %vm1352_vm11, %v1341_v0, %v1122_v34 }
 0x11e   : > { %1063 = vrot.lane.b32.xlu1 %v4295_v54, %s3755_s24  ;;  %v1406_v38 = vsel %vm1384_vm12, %v1374_v12, %v1152_v39  ;;  %v203_v39 = vld [vmem:[%s3793_s17 + $0xf8] sm:$0xff] }
 0x11f   : > { %1095 = vrot.lane.b32.xlu2 %v4320_v36, %s3752_s21  ;;  %v235_v19 = vpack.c.bf16 %v203_v39, %v203_v39 }
 0x120   : > { %v1182_v37 = vpop.permute.xlu1 %1181 }
 0x121   : > { %v1438_v60 = vsel %vm1416_vm13, %v1406_v38, %v1182_v37  ;;  %v4372_v62 = vpop.permute.xlu2 %1059  ;;  %v379_v63 = vunpack.c.l.b16 %v235_v19 }
 0x122   : > { %1031 = vrot.lane.b32.xlu0 %v4263_v16, %s3749_s18  ;;  %3645 = vmatmul.msk.bf16.gmra.mxu2 %vm1468_vm14, %v1438_v60 }
 0x123   : > { %v395_v29 = vpack.c.b16 %v379_v63, %v267_v59  ;;  %v555_v34 = vpack.c.b16 %v379_v63, %v379_v63 }
 0x124   : > { %v982_v50 = vpop.permute.xlu0 %981 }
 0x125   : > { %v1230_v20 = vsel %vm1222_vm7, %v1199_v56, %v982_v50  ;;  %v502_v35 = vshrl.u32 %v395_v29, 16  ;;  %v505_v46 = vshll.u32 %v395_v29, 16  ;;  %v617_v12 = vshll.u32 %v555_v34, 16 }
 0x126   : > { %957 = vrot.lane.b32.xlu1 %v4248_v22, %s3754_s23  ;;  %v4395_v22 = vsel %vm882_vm3, %v925_v13, %v926_v1  ;;  %v1263_v28 = vsel %vm1253_vm8, %v1230_v20, %v4325_v7 }
 0x127   : > { %1157 = vrot.lane.b32.xlu2 %v4378_v44, %s3756_s25  ;;  %v504_v43 = vrot.slane %v502_v35, 7  ;;  %v619_v51 = vrot.slane %v617_v12, 3 }
 0x128   : > { %v1078_v6 = vpop.permute.xlu1 %1077 }
 0x129   : > { %v4389_v4 = vpop.permute.xlu2 %953  ;;  %v507_v2 = vor.u32 %v505_v46, %v504_v43 }
 0x12a   : > { %1127 = vrot.lane.b32.xlu0 %v4357_v21, %s3750_s19 }
 0x12c   : > { %v1046_v52 = vpop.permute.xlu0 %1045 }
 0x12d   : > { %v1296_v3 = vsel %vm1286_vm9, %v1263_v28, %v1046_v52 }
 0x12e   : > { %1187 = vrot.lane.b32.xlu1 %v4395_v22, %s3753_s22  ;;  %v1329_v8 = vsel %vm1319_vm10, %v1296_v3, %v1078_v6 }
 0x12f   : > { %1019 = vrot.lane.b32.xlu2 %v3858_v45, %s3749_s18  ;;  %v1362_v7 = vsel %vm1352_vm11, %v1329_v8, %v4337_v23 }
 0x130   : > { %v1170_v5 = vpop.permute.xlu1 %1169 }
 0x131   : > { %v1184_v26 = vpop.permute.xlu2 %1183 }
 0x132   : > { %987 = vrot.lane.b32.xlu0 %v4251_v17, %s3751_s20  ;;  %v283_v17 = vpack.c.b16 %v267_v59, %v267_v59 }
 0x134   : > { %v1140_v30 = vpop.permute.xlu0 %1139  ;;  %v330_v0 = vshrl.u32 %v283_v17, 16 }
 0x135   : > { %v1394_v10 = vsel %vm1384_vm12, %v1362_v7, %v1140_v30 }
 0x136   : > { %v1426_v25 = vsel %vm1416_vm13, %v1394_v10, %v1170_v5  ;;  %1083 = vrot.lane.b32.xlu1 %v3899_v33, %s3752_s21  ;;  %v1213_v33 = vsel %vm1191_vm6, %v3973_v41, %v4351_v48  ;;  %v654_v40 = vsel %vm3805_vm2, %v330_v0, %v507_v2 }
 0x137   : > { %3639 = vmatmul.msk.bf16.gmra.mxu0 %vm1468_vm14, %v1426_v25  ;;  %1115 = vrot.lane.b32.xlu2 %v3874_v9, %s3750_s19  ;;  %v931_v57 = vshll.u32 %v654_v40, 16  ;;  %v929_v41 = vshrl.u32 %v654_v40, 16  ;;  %v942_v18 = vrot.slane %v654_v40, 1 }
 0x138   : > { %v1028_v45 = vpop.permute.xlu1 %1027 }
 0x139   : > { %v1080_v31 = vpop.permute.xlu2 %1079  ;;  %v933_v48 = vrot.slane %v931_v57, 1 }
 0x13a   : > { %1051 = vrot.lane.b32.xlu0 %v3890_v24, %s3755_s24 }
 0x13b   : > { %v934_v50 = vor.u32 %v933_v48, %v929_v41 }
 0x13c   : > { %v996_v23 = vpop.permute.xlu0 %995 }
 0x13d   : > { %v1244_v53 = vsel %vm1222_vm7, %v1213_v33, %v996_v23 }
 0x13e   : > { %1175 = vrot.lane.b32.xlu1 %v3919_v55, %s3753_s22  ;;  %v1277_v37 = vsel %vm1253_vm8, %v1244_v53, %v1028_v45 }
 0x13f   : > { %971 = vrot.lane.b32.xlu2 %v4295_v54, %s3754_s23  ;;  %v670_v54 = vsel %vm3805_vm2, %v504_v43, %v619_v51  ;;  %v1310_v49 = vsel %vm1286_vm9, %v1277_v37, %v4372_v62 }
 0x140   : > { %v1124_v9 = vpop.permute.xlu1 %1123  ;;  %v936_v38 = vshll.u32 %v670_v54, 16  ;;  %v943_v19 = vrot.slane %v670_v54, 1 }
 0x141   : > { %v1172_v24 = vpop.permute.xlu2 %1171 }
 0x142   : > { %1145 = vrot.lane.b32.xlu0 %v3915_v47, %s3756_s25  ;;  %v938_v61 = vrot.slane %v936_v38, 1  ;;  %v944_v63 = vsel %vm882_vm3, %v942_v18, %v943_v19 }
 0x144   : > { %v1092_v55 = vpop.permute.xlu0 %1091  ;;  %v939_v62 = vsel %vm671_vm4, %v934_v50, %v938_v61 }
 0x145   : > { %v1343_v58 = vsel %vm1319_vm10, %v1310_v49, %v1092_v55 }
 0x146   : > { %1033 = vrot.lane.b32.xlu1 %v4357_v21, %s3749_s18  ;;  %v1376_v13 = vsel %vm1352_vm11, %v1343_v58, %v1124_v9 }
 0x147   : > { %1065 = vrot.lane.b32.xlu2 %v4378_v44, %s3755_s24 }
 0x148   : > { %v984_v47 = vpop.permute.xlu1 %983 }
 0x149   : > { %v1030_v60 = vpop.permute.xlu2 %1029 }
 0x14a   : > { %1001 = vrot.lane.b32.xlu0 %v4320_v36, %s3751_s20  ;;  %v1201_v36 = vsel %vm1191_vm6, %v4007_v15, %v4389_v4 }
 0x14b   : > { %v1232_v28 = vsel %vm1222_vm7, %v1201_v36, %v984_v47 }
 0x14c   : > { %v1154_v39 = vpop.permute.xlu0 %1153 }
 0x14d   : > { %v1408_v1 = vsel %vm1384_vm12, %v1376_v13, %v1154_v39 }
 0x14e   : > { %v1440_v6 = vsel %vm1416_vm13, %v1408_v1, %v1184_v26  ;;  %1129 = vrot.lane.b32.xlu1 %v654_v40, %s3750_s19 }
 0x14f   : > { %3646 = vmatmul.msk.bf16.gmra.mxu2 %vm1468_vm14, %v1440_v6  ;;  %1159 = vrot.lane.b32.xlu2 %v939_v62, %s3756_s25 }
 0x150   : > { %v1048_v56 = vpop.permute.xlu1 %1047 }
 0x151   : > { %v1126_v52 = vpop.permute.xlu2 %1125 }
 0x152   : > { %1097 = vrot.lane.b32.xlu0 %v4395_v22, %s3752_s21 }
 0x154   : > { %v1016_v20 = vpop.permute.xlu0 %1015 }
 0x155   : > { %v1265_v59 = vsel %vm1253_vm8, %v1232_v28, %v1016_v20 }
 0x156   : > { %973 = vrot.lane.b32.xlu1 %v4378_v44, %s3754_s23  ;;  %v1298_v4 = vsel %vm1286_vm9, %v1265_v59, %v1048_v56 }
 0x157   : > { %1003 = vrot.lane.b32.xlu2 %v4395_v22, %s3751_s20  ;;  %v1331_v5 = vsel %vm1319_vm10, %v1298_v4, %v1080_v31 }
 0x158   : > { %v1142_v15 = vpop.permute.xlu1 %1141 }
 0x159   : > { %v986_v44 = vpop.permute.xlu2 %985 }
 0x15a   : > { %1189 = vrot.lane.b32.xlu0 %v944_v63, %s3753_s22 }
 0x15c   : > { %v1112_v3 = vpop.permute.xlu0 %1111 }
 0x15d   : > { %v1364_v8 = vsel %vm1352_vm11, %v1331_v5, %v1112_v3 }
 0x15e   : > { %v1396_v26 = vsel %vm1384_vm12, %v1364_v8, %v1142_v15  ;;  %1067 = vrot.lane.b32.xlu1 %v939_v62, %s3755_s24 }
 0x15f   : > { %v1428_v29 = vsel %vm1416_vm13, %v1396_v26, %v1172_v24  ;;  %1099 = vrot.lane.b32.xlu2 %v944_v63, %s3752_s21 }
 0x160   : > { %3640 = vmatmul.msk.bf16.gmra.mxu0 %vm1468_vm14, %v1428_v29  ;;  %v998_v22 = vpop.permute.xlu1 %997 }
 0x161   : > { %v1050_v10 = vpop.permute.xlu2 %1049 }
 0x162   : > { %1035 = vrot.lane.b32.xlu0 %v654_v40, %s3749_s18 }
 0x164   : > { %v968_v30 = vpop.permute.xlu0 %967 }
 0x165   : > { %v1215_v25 = vsel %vm1191_vm6, %v4061_v11, %v968_v30 }
 0x166   : > { %v1246_v17 = vsel %vm1222_vm7, %v1215_v25, %v998_v22 }
 0x167   : > { %v1279_v43 = vsel %vm1253_vm8, %v1246_v17, %v1030_v60 }
 0x168   : > { %v1094_v7 = vpop.permute.xlu1 %1093 }
 0x169   : > { %v1144_v31 = vpop.permute.xlu2 %1143 }
 0x16c   : > { %v1062_v35 = vpop.permute.xlu0 %1061 }
 0x16d   : > { %v1312_v34 = vsel %vm1286_vm9, %v1279_v43, %v1062_v35 }
 0x16e   : > { %v1345_v23 = vsel %vm1319_vm10, %v1312_v34, %v1094_v7 }
 0x16f   : > { %v1378_v12 = vsel %vm1352_vm11, %v1345_v23, %v1126_v52 }
 0x170   : > { %v1156_v45 = vpop.permute.xlu1 %1155 }
 0x171   : > { %v1000_v2 = vpop.permute.xlu2 %999  ;;  %v1410_v9 = vsel %vm1384_vm12, %v1378_v12, %v1156_v45 }
 0x174   : > { %v956_v46 = vpop.permute.xlu0 %955 }
 0x175   : > { %v1203_v40 = vsel %vm1191_vm6, %v4121_v14, %v956_v46 }
 0x176   : > { %v1234_v24 = vsel %vm1222_vm7, %v1203_v40, %v986_v44  ;;  %v4510_v44 = vpop.f32.mrf.mxu0 }
 0x178   : > { %v1018_v0 = vpop.permute.xlu1 %1017 }
 0x179   : > { %v1267_v53 = vsel %vm1253_vm8, %v1234_v24, %v1018_v0  ;;  %v1096_v55 = vpop.permute.xlu2 %1095 }
 0x17a   : > { %v1300_v37 = vsel %vm1286_vm9, %v1267_v53, %v1050_v10 }
 0x17c   : > { %v1186_v33 = vpop.permute.xlu0 %1185 }
 0x17d   : > { %v1442_v11 = vsel %vm1416_vm13, %v1410_v9, %v1186_v33 }
 0x17e   : > { %3647 = vmatmul.msk.bf16.gmra.mxu2 %vm1468_vm14, %v1442_v11  ;;  %v4516_v25 = vpop.f32.mrf.mxu0 }
 0x180   : > { %v1114_v51 = vpop.permute.xlu1 %1113 }
 0x181   : > { %v4491_v47 = vpop.permute.xlu2 %1157 }
 0x184   : > { %v1082_v57 = vpop.permute.xlu0 %1081 }
 0x185   : > { %v1333_v54 = vsel %vm1319_vm10, %v1300_v37, %v1082_v57 }
 0x186   : > { %v1366_v48 = vsel %vm1352_vm11, %v1333_v54, %v1114_v51 }
 0x187   : > { %v1398_v38 = vsel %vm1384_vm12, %v1366_v48, %v1144_v31 }
 0x188   : > { %v970_v41 = vpop.permute.xlu1 %969 }
 0x189   : > { %v1217_v60 = vsel %vm1191_vm6, %v4182_v27, %v970_v41  ;;  %v1020_v1 = vpop.permute.xlu2 %1019 }
 0x18a   : > { %v1248_v61 = vsel %vm1222_vm7, %v1217_v60, %v1000_v2  ;;  %v4524_v2 = vpop.f32.mrf.mxu0  ;;  %v4547_v60 = vpop.f32.mrf.mxu2 }
 0x18c   : > { %v1174_v49 = vpop.permute.xlu0 %1173 }
 0x18d   : > { %v1430_v14 = vsel %vm1416_vm13, %v1398_v38, %v1174_v49 }
 0x18e   : > { %3641 = vmatmul.msk.bf16.gmra.mxu0 %vm1468_vm14, %v1430_v14 }
 0x190   : > { %v1064_v58 = vpop.permute.xlu1 %1063 }
 0x191   : > { %v1116_v20 = vpop.permute.xlu2 %1115 }
 0x192   : > { %v4532_v24 = vpop.f32.mrf.mxu0 }
 0x194   : > { %v1032_v50 = vpop.permute.xlu0 %1031 }
 0x195   : > { %v1281_v39 = vsel %vm1253_vm8, %v1248_v61, %v1032_v50  ;;  %v4551_v61 = vpop.f32.mrf.mxu2 }
 0x196   : > { %v1314_v6 = vsel %vm1286_vm9, %v1281_v39, %v1064_v58 }
 0x197   : > { %v1347_v62 = vsel %vm1319_vm10, %v1314_v6, %v1096_v55 }
 0x198   : > { %v958_v13 = vpop.permute.xlu1 %957 }
 0x199   : > { %v1205_v59 = vsel %vm1191_vm6, %v4208_v42, %v958_v13  ;;  %v972_v4 = vpop.permute.xlu2 %971 }
 0x19a   : > { %v1219_v45 = vsel %vm1191_vm6, %v4263_v16, %v972_v4  ;;  %v4539_v49 = vpop.f32.mrf.mxu0  ;;  %v1666_v4 = vmul.f32 %v4532_v24, %v4532_v24 }
 0x19c   : > { %v1128_v56 = vpop.permute.xlu0 %1127 }
 0x19d   : > { %v1380_v36 = vsel %vm1352_vm11, %v1347_v62, %v1128_v56  ;;  %v4555_v13 = vpop.f32.mrf.mxu2 }
 0x19e   : > { %v1412_v18 = vsel %vm1384_vm12, %v1380_v36, %v4491_v47 }
 0x1a0   : > { %v1188_v19 = vpop.permute.xlu1 %1187 }
 0x1a1   : > { %v1444_v27 = vsel %vm1416_vm13, %v1412_v18, %v1188_v19  ;;  %v1066_v7 = vpop.permute.xlu2 %1065 }
 0x1a2   : > { %3648 = vmatmul.msk.bf16.gmra.mxu2 %vm1468_vm14, %v1444_v27  ;;  %v4545_v58 = vpop.f32.mrf.mxu0  ;;  %v1664_v27 = vmul.f32 %v4516_v25, %v4516_v25 }
 0x1a4   : > { %v988_v52 = vpop.permute.xlu0 %987 }
 0x1a5   : > { %v1236_v63 = vsel %vm1222_vm7, %v1205_v59, %v988_v52  ;;  %v4559_v6 = vpop.f32.mrf.mxu2  ;;  %v1595_v52 = vsel %vm1191_vm6, %v4516_v25, 0.0  ;;  %v1594_v59 = vsel %vm1191_vm6, %v4510_v44, 0.0 }
 0x1a6   : > { %v1269_v3 = vsel %vm1253_vm8, %v1236_v63, %v1020_v1  ;;  %v1696_v63 = vsel %vm1191_vm6, %v1664_v27, 0.0 }
 0x1a8   : > { %v1084_v28 = vpop.permute.xlu1 %1083 }
 0x1a9   : > { %v1160_v43 = vpop.permute.xlu2 %1159 }
 0x1aa   : > { %v4549_v50 = vpop.f32.mrf.mxu0 }
 0x1ac   : > { %v1052_v15 = vpop.permute.xlu0 %1051 }
 0x1ad   : > { %v1302_v5 = vsel %vm1286_vm9, %v1269_v3, %v1052_v15  ;;  %v4563_v62 = vpop.f32.mrf.mxu2  ;;  %v1597_v15 = vsel %vm1191_vm6, %v4524_v2, 0.0  ;;  %v1596_v3 = vadd.f32 %v1595_v52, %v1594_v59 }
 0x1ae   : > { %v1335_v26 = vsel %vm1319_vm10, %v1302_v5, %v1084_v28  ;;  %v1665_v28 = vmul.f32 %v4524_v2, %v4524_v2 }
 0x1af   : > { %v1368_v29 = vsel %vm1352_vm11, %v1335_v26, %v1116_v20  ;;  %v1663_v20 = vmul.f32 %v4510_v44, %v4510_v44 }
 0x1b0   : > { %v1176_v8 = vpop.permute.xlu1 %1175  ;;  %v1698_v26 = vsel %vm1191_vm6, %v1665_v28, 0.0 }
 0x1b1   : > { %v1004_v33 = vpop.permute.xlu2 %1003 }
 0x1b2   : > { %v4553_v39 = vpop.f32.mrf.mxu0 }
 0x1b4   : > { %v1146_v22 = vpop.permute.xlu0 %1145 }
 0x1b5   : > { %v1400_v30 = vsel %vm1384_vm12, %v1368_v29, %v1146_v22  ;;  %v4567_v36 = vpop.f32.mrf.mxu2  ;;  %v1599_v29 = vsel %vm1191_vm6, %v4532_v24, 0.0  ;;  %v1667_v22 = vmul.f32 %v4539_v49, %v4539_v49 }
 0x1b6   : > { %v1432_v42 = vsel %vm1416_vm13, %v1400_v30, %v1176_v8  ;;  %v1695_v8 = vsel %vm1191_vm6, %v1663_v20, 0.0 }
 0x1b7   : > { %3642 = vmatmul.msk.bf16.gmra.mxu0 %vm1468_vm14, %v1432_v42  ;;  %v1697_v30 = vadd.f32 %v1696_v63, %v1695_v8  ;;  %v1598_v42 = vadd.f32 %v1597_v15, %v1596_v3 }
 0x1b8   : > { %v1034_v10 = vpop.permute.xlu1 %1033 }
 0x1b9   : > { %v1100_v37 = vpop.permute.xlu2 %1099 }
 0x1ba   : > { %v4557_v1 = vpop.f32.mrf.mxu0 }
 0x1bc   : > { %v1002_v35 = vpop.permute.xlu0 %1001 }
 0x1bd   : > { %v1250_v31 = vsel %vm1222_vm7, %v1219_v45, %v1002_v35  ;;  %v1668_v35 = vmul.f32 %v4545_v58, %v4545_v58 }
 0x1be   : > { %v1283_v46 = vsel %vm1253_vm8, %v1250_v31, %v1034_v10  ;;  %v1601_v10 = vsel %vm1191_vm6, %v4539_v49, 0.0  ;;  %v1699_v31 = vadd.f32 %v1698_v26, %v1697_v30 }
 0x1bf   : > { %v1316_v23 = vsel %vm1286_vm9, %v1283_v46, %v1066_v7  ;;  %v1700_v7 = vsel %vm1191_vm6, %v1666_v4, 0.0  ;;  %v1603_v46 = vsel %vm1191_vm6, %v4545_v58, 0.0 }
 0x1c0   : > { %v1130_v17 = vpop.permute.xlu1 %1129 }
 0x1c4   : > { %v1098_v34 = vpop.permute.xlu0 %1097 }
 0x1c5   : > { %v1349_v0 = vsel %vm1319_vm10, %v1316_v23, %v1098_v34  ;;  %v1669_v34 = vmul.f32 %v4549_v50, %v4549_v50  ;;  %v1701_v23 = vadd.f32 %v1700_v7, %v1699_v31 }
 0x1c6   : > { %v1382_v12 = vsel %vm1352_vm11, %v1349_v0, %v1130_v17  ;;  %v1600_v17 = vadd.f32 %v1599_v29, %v1598_v42 }
 0x1c7   : > { %v1414_v11 = vsel %vm1384_vm12, %v1382_v12, %v1160_v43  ;;  %v1702_v43 = vsel %vm1191_vm6, %v1667_v22, 0.0  ;;  %v1704_v12 = vsel %vm1191_vm6, %v1668_v35, 0.0 }
 0x1c8   : > { %v974_v9 = vpop.permute.xlu1 %973  ;;  %v1602_v0 = vadd.f32 %v1601_v10, %v1600_v17 }
 0x1c9   : > { %v1221_v51 = vsel %vm1191_vm6, %v4357_v21, %v974_v9  ;;  %v1605_v9 = vsel %vm1191_vm6, %v4549_v50, 0.0 }
 0x1ca   : > { %v1252_v57 = vsel %vm1222_vm7, %v1221_v51, %v1004_v33  ;;  %v1670_v33 = vmul.f32 %v4553_v39, %v4553_v39  ;;  %v1607_v51 = vsel %vm1191_vm6, %v4553_v39, 0.0 }
 0x1cc   : > { %v1190_v16 = vpop.permute.xlu0 %1189 }
 0x1cd   : > { %v1446_v40 = vsel %vm1416_vm13, %v1414_v11, %v1190_v16  ;;  %v1703_v11 = vadd.f32 %v1702_v43, %v1701_v23  ;;  %v1604_v16 = vadd.f32 %v1603_v46, %v1602_v0 }
 0x1ce   : > { %3649 = vmatmul.msk.bf16.gmra.mxu2 %vm1468_vm14, %v1446_v40  ;;  %v1706_v40 = vsel %vm1191_vm6, %v1669_v34, 0.0 }
 0x1d0   : > { %v1068_v53 = vpop.permute.xlu1 %1067 }
 0x1d4   : > { %v1036_v55 = vpop.permute.xlu0 %1035 }
 0x1d5   : > { %v1285_v54 = vsel %vm1253_vm8, %v1252_v57, %v1036_v55  ;;  %v1705_v57 = vadd.f32 %v1704_v12, %v1703_v11  ;;  %v1606_v55 = vadd.f32 %v1605_v9, %v1604_v16 }
 0x1d6   : > { %v1318_v41 = vsel %vm1286_vm9, %v1285_v54, %v1068_v53  ;;  %v1671_v53 = vmul.f32 %v4557_v1, %v4557_v1  ;;  %v1708_v54 = vsel %vm1191_vm6, %v1670_v33, 0.0 }
 0x1d7   : > { %v1351_v48 = vsel %vm1319_vm10, %v1318_v41, %v1100_v37  ;;  %v1609_v41 = vsel %vm1191_vm6, %v4557_v1, 0.0 }
 0x1d8   : > { %v1383_v38 = vsel %vm1352_vm11, %v1351_v48, %v1128_v56  ;;  %v1710_v27 = vsel %vm1191_vm6, %v1671_v53, 0.0 }
 0x1d9   : > { %v1415_v21 = vsel %vm1384_vm12, %v1383_v38, %v4491_v47  ;;  %v4561_v47 = vpop.f32.mrf.mxu0 }
 0x1da   : > { %v1447_v14 = vsel %vm1416_vm13, %v1415_v21, %v1188_v19  ;;  %v4571_v19 = vpop.f32.mrf.mxu2  ;;  %v1672_v48 = vmul.f32 %v4561_v47, %v4561_v47  ;;  %v1707_v21 = vadd.f32 %v1706_v40, %v1705_v57  ;;  %v1611_v20 = vsel %vm1191_vm6, %v4561_v47, 0.0 }
 0x1dc   : > { %v1709_v28 = vadd.f32 %v1708_v54, %v1707_v21  ;;  %v1712_v63 = vsel %vm1191_vm6, %v1672_v48, 0.0  ;;  %v1679_v54 = vmul.f32 %v4547_v60, %v4547_v60 }
 0x1de   : > { %3650 = vmatmul.msk.bf16.gmra.mxu2 %vm1468_vm14, %v1447_v14  ;;  %v1608_v14 = vadd.f32 %v1607_v51, %v1606_v55  ;;  %v1711_v3 = vadd.f32 %v1710_v27, %v1709_v28  ;;  %v1625_v27 = vsel %vm1191_vm6, %v4547_v60, 0.0 }
 0x1e0   : > { %v1610_v59 = vadd.f32 %v1609_v41, %v1608_v14  ;;  %v1713_v30 = vadd.f32 %v1712_v63, %v1711_v3  ;;  %v1681_v3 = vmul.f32 %v4555_v13, %v4555_v13 }
 0x1e1   : > { %v4565_v56 = vpop.f32.mrf.mxu0 }
 0x1e2   : > { %v4601_v45 = vpop.f32.mrf.mxu2  ;;  %v1673_v52 = vmul.f32 %v4565_v56, %v4565_v56  ;;  %v1613_v15 = vsel %vm1191_vm6, %v4565_v56, 0.0  ;;  %v1612_v8 = vadd.f32 %v1611_v20, %v1610_v59  ;;  %v1680_v20 = vmul.f32 %v4551_v61, %v4551_v61 }
 0x1e4   : > { %v1714_v26 = vsel %vm1191_vm6, %v1673_v52, 0.0  ;;  %v1614_v42 = vadd.f32 %v1613_v15, %v1612_v8  ;;  %v1726_v15 = vsel %vm1191_vm6, %v1679_v54, 0.0 }
 0x1e5   : > { %v1715_v17 = vadd.f32 %v1714_v26, %v1713_v30  ;;  %v1682_v30 = vmul.f32 %v4559_v6, %v4559_v6 }
 0x1e9   : > { %v4569_v18 = vpop.f32.mrf.mxu0 }
 0x1ea   : > { %v1674_v4 = vmul.f32 %v4569_v18, %v4569_v18  ;;  %v1615_v29 = vsel %vm1191_vm6, %v4569_v18, 0.0 }
 0x1eb   : > { %v1616_v43 = vadd.f32 %v1615_v29, %v1614_v42  ;;  %v1728_v29 = vsel %vm1191_vm6, %v1680_v20, 0.0  ;;  %v1639_v20 = vsel %vm1191_vm6, %v4601_v45, 0.0 }
 0x1ec   : > { %v1716_v10 = vsel %vm1191_vm6, %v1674_v4, 0.0  ;;  %v1627_v4 = vsel %vm1191_vm6, %v4551_v61, 0.0 }
 0x1ed   : > { %v1717_v12 = vadd.f32 %v1716_v10, %v1715_v17  ;;  %v1683_v17 = vmul.f32 %v4563_v62, %v4563_v62 }
 0x201   : > { %v4625_v38 = vpop.f32.mrf.mxu2 }
 0x209   : > { %v4649_v46 = vpop.f32.mrf.mxu2 }
 0x20b   : > { %v4588_v5 = vpop.f32.mrf.mxu0 }
 0x20c   : > { %v1675_v22 = vmul.f32 %v4588_v5, %v4588_v5  ;;  %v1617_v35 = vsel %vm1191_vm6, %v4588_v5, 0.0 }
 0x20d   : > { %v1618_v9 = vadd.f32 %v1617_v35, %v1616_v43  ;;  %v1730_v35 = vsel %vm1191_vm6, %v1681_v3, 0.0 }
 0x20e   : > { %v1718_v34 = vsel %vm1191_vm6, %v1675_v22, 0.0  ;;  %v1629_v22 = vsel %vm1191_vm6, %v4555_v13, 0.0 }
 0x20f   : > { %v1719_v16 = vadd.f32 %v1718_v34, %v1717_v12  ;;  %v1684_v12 = vmul.f32 %v4567_v36, %v4567_v36 }
 0x211   : > { %v1736_v54 = vsel %vm1191_vm6, %v1684_v12, 0.0 }
 0x213   : > { %v4618_v37 = vpop.f32.mrf.mxu0 }
 0x214   : > { %v1676_v31 = vmul.f32 %v4618_v37, %v4618_v37  ;;  %v1619_v23 = vsel %vm1191_vm6, %v4618_v37, 0.0 }
 0x215   : > { %v1620_v40 = vadd.f32 %v1619_v23, %v1618_v9  ;;  %v1732_v23 = vsel %vm1191_vm6, %v1682_v30, 0.0 }
 0x216   : > { %v1720_v33 = vsel %vm1191_vm6, %v1676_v31, 0.0  ;;  %v1631_v31 = vsel %vm1191_vm6, %v4559_v6, 0.0 }
 0x217   : > { %v1721_v53 = vadd.f32 %v1720_v33, %v1719_v16  ;;  %v1635_v16 = vsel %vm1191_vm6, %v4567_v36, 0.0 }
 0x225   : > { %v4672_v52 = vpop.f32.mrf.mxu2 }
 0x234   : > { %v4642_v7 = vpop.f32.mrf.mxu0 }
 0x235   : > { %v1677_v0 = vmul.f32 %v4642_v7, %v4642_v7  ;;  %v1621_v11 = vsel %vm1191_vm6, %v4642_v7, 0.0 }
 0x236   : > { %v1622_v57 = vadd.f32 %v1621_v11, %v1620_v40  ;;  %v1734_v11 = vsel %vm1191_vm6, %v1683_v17, 0.0  ;;  %v1685_v40 = vmul.f32 %v4571_v19, %v4571_v19 }
 0x237   : > { %v1722_v51 = vsel %vm1191_vm6, %v1677_v0, 0.0  ;;  %v1633_v0 = vsel %vm1191_vm6, %v4563_v62, 0.0 }
 0x238   : > { %v1723_v21 = vadd.f32 %v1722_v51, %v1721_v53  ;;  %v4700_v51 = vpop.f32.mrf.mxu2 }
 0x239   : > { %v1690_v12 = vmul.f32 %v4700_v51, %v4700_v51 }
 0x23c   : > { %v4660_v55 = vpop.f32.mrf.mxu0 }
 0x23d   : > { %v1623_v41 = vsel %vm1191_vm6, %v4660_v55, 0.0  ;;  %v1678_v48 = vmul.f32 %v4660_v55, %v4660_v55 }
 0x23e   : > { %v1624_v14 = vadd.f32 %v1623_v41, %v1622_v57  ;;  %v1637_v41 = vsel %vm1191_vm6, %v4571_v19, 0.0 }
 0x23f   : > { %v1724_v28 = vsel %vm1191_vm6, %v1678_v48, 0.0  ;;  %v1686_v48 = vmul.f32 %v4601_v45, %v4601_v45 }
 0x240   : > { %v1626_v59 = vadd.f32 %v1625_v27, %v1624_v14  ;;  %v1725_v63 = vadd.f32 %v1724_v28, %v1723_v21  ;;  %v1738_v27 = vsel %vm1191_vm6, %v1685_v40, 0.0 }
 0x242   : > { %v1628_v8 = vadd.f32 %v1627_v4, %v1626_v59  ;;  %v1727_v26 = vadd.f32 %v1726_v15, %v1725_v63  ;;  %v1740_v63 = vsel %vm1191_vm6, %v1686_v48, 0.0  ;;  %v1687_v15 = vmul.f32 %v4625_v38, %v4625_v38 }
 0x244   : > { %v1630_v42 = vadd.f32 %v1629_v22, %v1628_v8  ;;  %v1729_v10 = vadd.f32 %v1728_v29, %v1727_v26  ;;  %v1641_v8 = vsel %vm1191_vm6, %v4625_v38, 0.0  ;;  %v1742_v29 = vsel %vm1191_vm6, %v1687_v15, 0.0 }
 0x245   : > { %v1688_v22 = vmul.f32 %v4649_v46, %v4649_v46 }
 0x246   : > { %v1632_v43 = vadd.f32 %v1631_v31, %v1630_v42  ;;  %v1731_v34 = vadd.f32 %v1730_v35, %v1729_v10  ;;  %v1643_v42 = vsel %vm1191_vm6, %v4649_v46, 0.0  ;;  %v1689_v31 = vmul.f32 %v4672_v52, %v4672_v52 }
 0x247   : > { %v1744_v35 = vsel %vm1191_vm6, %v1688_v22, 0.0 }
 0x248   : > { %v1634_v9 = vadd.f32 %v1633_v0, %v1632_v43  ;;  %v1733_v33 = vadd.f32 %v1732_v23, %v1731_v34  ;;  %v1645_v34 = vsel %vm1191_vm6, %v4672_v52, 0.0  ;;  %v1746_v0 = vsel %vm1191_vm6, %v1689_v31, 0.0 }
 0x24a   : > { %v1636_v53 = vadd.f32 %v1635_v16, %v1634_v9  ;;  %v1735_v57 = vadd.f32 %v1734_v11, %v1733_v33  ;;  %v1647_v33 = vsel %vm1191_vm6, %v4700_v51, 0.0  ;;  %v1748_v16 = vsel %vm1191_vm6, %v1690_v12, 0.0 }
 0x24c   : > { %v1737_v21 = vadd.f32 %v1736_v54, %v1735_v57  ;;  %v1638_v14 = vadd.f32 %v1637_v41, %v1636_v53 }
 0x24e   : > { %v1739_v28 = vadd.f32 %v1738_v27, %v1737_v21  ;;  %v1640_v59 = vadd.f32 %v1639_v20, %v1638_v14 }
 0x250   : > { %v1741_v3 = vadd.f32 %v1740_v63, %v1739_v28  ;;  %v1642_v26 = vadd.f32 %v1641_v8, %v1640_v59 }
 0x251   : > { %v4713_v4 = vpop.f32.mrf.mxu2 }
 0x252   : > { %v1743_v30 = vadd.f32 %v1742_v29, %v1741_v3  ;;  %v1644_v10 = vadd.f32 %v1643_v42, %v1642_v26  ;;  %v1691_v40 = vmul.f32 %v4713_v4, %v4713_v4  ;;  %v1649_v54 = vsel %vm1191_vm6, %v4713_v4, 0.0 }
 0x254   : > { %v1745_v17 = vadd.f32 %v1744_v35, %v1743_v30  ;;  %v1646_v23 = vadd.f32 %v1645_v34, %v1644_v10  ;;  %v1750_v21 = vsel %vm1191_vm6, %v1691_v40, 0.0 }
 0x256   : > { %v1747_v9 = vadd.f32 %v1746_v0, %v1745_v17  ;;  %v1648_v11 = vadd.f32 %v1647_v33, %v1646_v23 }
 0x258   : > { %v1749_v53 = vadd.f32 %v1748_v16, %v1747_v9  ;;  %v1650_v48 = vadd.f32 %v1649_v54, %v1648_v11 }
 0x259   : > { %v4725_v43 = vpop.f32.mrf.mxu2 }
 0x25a   : > { %v1692_v41 = vmul.f32 %v4725_v43, %v4725_v43  ;;  %v1651_v14 = vsel %vm1191_vm6, %v4725_v43, 0.0  ;;  %v1751_v20 = vadd.f32 %v1750_v21, %v1749_v53 }
 0x25b   : > { %v1652_v63 = vadd.f32 %v1651_v14, %v1650_v48 }
 0x25c   : > { %v1752_v28 = vsel %vm1191_vm6, %v1692_v41, 0.0 }
 0x25d   : > { %v1753_v3 = vadd.f32 %v1752_v28, %v1751_v20 }
 0x261   : > { %v1589_v57 = vpop.f32.mrf.mxu2 }
 0x262   : > { %v1693_v27 = vmul.f32 %v1589_v57, %v1589_v57  ;;  %v1653_v59 = vsel %vm1191_vm6, %v1589_v57, 0.0 }
 0x263   : > { %v1654_v8 = vadd.f32 %v1653_v59, %v1652_v63 }
 0x264   : > { %v1754_v15 = vsel %vm1191_vm6, %v1693_v27, 0.0 }
 0x265   : > { %v1755_v30 = vadd.f32 %v1754_v15, %v1753_v3 }
 0x269   : > { %v1591_v26 = vpop.f32.mrf.mxu2 }
 0x26a   : > { %v1655_v29 = vsel %vm1191_vm6, %v1591_v26, 0.0  ;;  %v1694_v22 = vmul.f32 %v1591_v26, %v1591_v26 }
 0x26b   : > { %v1656_v42 = vadd.f32 %v1655_v29, %v1654_v8 }
 0x26c   : > { %v1756_v10 = vsel %vm1191_vm6, %v1694_v22, 0.0 }
 0x26d   : > { %v1657_v35 = vrot.slane %v1656_v42, 4  ;;  %v1757_v31 = vadd.f32 %v1756_v10, %v1755_v30 }
 0x26f   : > { %v1658_v17 = vadd.f32 %v1657_v35, %v1656_v42  ;;  %v1758_v34 = vrot.slane %v1757_v31, 4 }
 0x271   : > { %v1659_v23 = vrot.slane %v1658_v17, 2  ;;  %v1759_v0 = vadd.f32 %v1758_v34, %v1757_v31 }
 0x273   : > { %v1660_v12 = vadd.f32 %v1659_v23, %v1658_v17  ;;  %v1760_v9 = vrot.slane %v1759_v0, 2 }
 0x275   : > { %v1661_v33 = vrot.slane %v1660_v12, 1  ;;  %v1761_v11 = vadd.f32 %v1760_v9, %v1759_v0 }
 0x277   : > { %v1662_v16 = vadd.f32 %v1661_v33, %v1660_v12  ;;  %v1762_v40 = vrot.slane %v1761_v11, 1 }
 0x279   : > { %v1763_v53 = vadd.f32 %v1762_v40, %v1761_v11  ;;  %v4749_v54 = vmul.f32 0.00390625, %v1662_v16 }
 0x27b   : > { %v1765_v41 = vmul.f32 0.00390625, %v1763_v53  ;;  %v1766_v48 = vmul.f32 %v4749_v54, %v4749_v54  ;;  %v1798_v21 = vsub.f32 %v1589_v57, %v4749_v54  ;;  %v1799_v14 = vsub.f32 %v1591_v26, %v4749_v54 }
 0x27c   : > { %v1796_v28 = vsub.f32 %v4713_v4, %v4749_v54  ;;  %v1797_v59 = vsub.f32 %v4725_v43, %v4749_v54  ;;  %v1784_v57 = vsub.f32 %v4547_v60, %v4749_v54  ;;  %v1785_v26 = vsub.f32 %v4551_v61, %v4749_v54 }
 0x27d   : > { %v1767_v27 = vsub.f32 %v1765_v41, %v1766_v48  ;;  %v1778_v60 = vsub.f32 %v4565_v56, %v4749_v54  ;;  %v1779_v61 = vsub.f32 %v4569_v18, %v4749_v54  ;;  %v1780_v12 = vsub.f32 %v4588_v5, %v4749_v54 }
 0x27e   : > { %v1781_v9 = vsub.f32 %v4618_v37, %v4749_v54  ;;  %v1782_v53 = vsub.f32 %v4642_v7, %v4749_v54  ;;  %v1783_v41 = vsub.f32 %v4660_v55, %v4749_v54  ;;  %v1772_v43 = vsub.f32 %v4539_v49, %v4749_v54 }
 0x27f   : > { %v1800_v20 = vadd.f32 1e-05, %v1767_v27 }
 0x281   : > { %3705 = vrsqrt.f32 %v1800_v20  ;;  %vm1807_vm0 = vweird.f32 %v1800_v20 }
 0x287   : > { %v3706_v63 = vpop.eup %3705 }
 0x288   : > { %v1802_v15 = vmul.f32 %v3706_v63, %v1800_v20  ;;  %vm1808_vm15 = vweird.f32 %v3706_v63 }
 0x289   : > { %vm1809_vm1 = vmor %vm1807_vm0, %vm1808_vm15 }
 0x28a   : > { %v1803_v3 = vmul.f32 %v3706_v63, %v1802_v15  ;;  %v1771_v15 = vsub.f32 %v4532_v24, %v4749_v54  ;;  %v1795_v24 = vsub.f32 %v4700_v51, %v4749_v54 }
 0x28c   : > { %v1804_v8 = vmul.f32 0.5, %v1803_v3  ;;  %v1790_v3 = vsub.f32 %v4571_v19, %v4749_v54 }
 0x28e   : > { %v1805_v29 = vsub.f32 1.5, %v1804_v8  ;;  %v1791_v8 = vsub.f32 %v4601_v45, %v4749_v54 }
 0x290   : > { %v1806_v22 = vmul.f32 %v3706_v63, %v1805_v29  ;;  %v1792_v29 = vsub.f32 %v4625_v38, %v4749_v54 }
 0x292   : > { %v4763_v30 = vsel %vm1809_vm1, %v3706_v63, %v1806_v22  ;;  %v1770_v63 = vsub.f32 %v4524_v2, %v4749_v54  ;;  %v1794_v2 = vsub.f32 %v4672_v52, %v4749_v54 }
 0x293   : > { %v1841_v42 = vmul.f32 %v4763_v30, %v1798_v21  ;;  %v1842_v10 = vmul.f32 %v4763_v30, %v1799_v14  ;;  %v1827_v35 = vmul.f32 %v4763_v30, %v1784_v57  ;;  %v1828_v31 = vmul.f32 %v4763_v30, %v1785_v26 }
 0x294   : > { %v4782_v56 = vmul.f32 %v4763_v30, %v1778_v60  ;;  %v4785_v18 = vmul.f32 %v4763_v30, %v1779_v61  ;;  %v4794_v14 = vmul.f32 %v4763_v30, %v1780_v12  ;;  %v4797_v7 = vmul.f32 %v4763_v30, %v1781_v9 }
 0x295   : > { %v1873_v17 = vmax.f32 %v1841_v42, 0.0  ;;  %v1874_v34 = vmax.f32 %v1842_v10, 0.0  ;;  %v1859_v23 = vmax.f32 %v1827_v35, 0.0  ;;  %v1860_v0 = vmax.f32 %v1828_v31, 0.0 }
 0x296   : > { %v4800_v55 = vmul.f32 %v4763_v30, %v1782_v53  ;;  %v4803_v27 = vmul.f32 %v4763_v30, %v1783_v41  ;;  %v1793_v57 = vsub.f32 %v4649_v46, %v4749_v54  ;;  %v1813_v26 = vmul.f32 %v4763_v30, %v1770_v63 }
 0x297   : > { %v1905_v33 = vpack.c.bf16 %v1873_v17, %v1873_v17  ;;  %v1906_v11 = vpack.c.bf16 %v1874_v34, %v1874_v34  ;;  %v1891_v16 = vpack.c.bf16 %v1859_v23, %v1859_v23  ;;  %v1892_v40 = vpack.c.bf16 %v1860_v0, %v1860_v0 }
 0x298   : > { %v1814_v45 = vmul.f32 %v4763_v30, %v1771_v15  ;;  %v4829_v10 = vmul.f32 %v4763_v30, %v1790_v3  ;;  %v4832_v35 = vmul.f32 %v4763_v30, %v1791_v8  ;;  %v4835_v46 = vmul.f32 %v4763_v30, %v1792_v29 }
 0x299   : > { %v4787_v5 = vunpack.c.l.b16 %v1905_v33  ;;  %v4789_v48 = vunpack.c.l.b16 %v1906_v11  ;;  %v1931_v37 = vunpack.c.l.b16 %v1891_v16  ;;  %v4791_v21 = vunpack.c.l.b16 %v1892_v40 }
 0x29a   : > { %v4840_v51 = vmul.f32 %v4763_v30, %v1793_v57  ;;  %v4843_v31 = vmul.f32 %v4763_v30, %v1794_v2  ;;  %v4846_v17 = vmul.f32 %v4763_v30, %v1795_v24  ;;  %v1768_v34 = vsub.f32 %v4510_v44, %v4749_v54 }
 0x29b   : > { %6375 = vst [vmem:[#allocation2_spill] sm:$0xff] %v4787_v5  ;;  %v4807_v20 = vpack.c.b16 %v4789_v48, %v4787_v5  ;;  %v2059_v22 = vpack.c.b16 %v4791_v21, %v1931_v37  ;;  %v1947_v19 = vpack.c.b16 %v1931_v37, %v1931_v37  ;;  %v1769_v23 = vsub.f32 %v4516_v25, %v4749_v54 }
 0x29c   : > { %v4856_v0 = vmul.f32 %v4763_v30, %v1796_v28  ;;  %v4862_v60 = vmul.f32 %v4763_v30, %v1797_v59  ;;  %v1845_v9 = vmax.f32 %v1813_v26, 0.0  ;;  %v1846_v44 = vmax.f32 %v1814_v45, 0.0 }
 0x29d   : > { %v2124_v42 = vshrl.u32 %v2059_v22, 16  ;;  %v2127_v38 = vshll.u32 %v2059_v22, 16  ;;  %v1980_v61 = vshrl.u32 %v1947_v19, 16  ;;  %v1811_v33 = vmul.f32 %v4763_v30, %v1768_v34 }
 0x29e   : > { %v1812_v4 = vmul.f32 %v4763_v30, %v1769_v23  ;;  %v1877_v28 = vpack.c.bf16 %v1845_v9, %v1845_v9  ;;  %v1878_v11 = vpack.c.bf16 %v1846_v44, %v1846_v44  ;;  %v1773_v40 = vsub.f32 %v4545_v58, %v4749_v54 }
 0x29f   : > { %v4837_v52 = vrot.slane %v2124_v42, 7  ;;  %v1774_v53 = vsub.f32 %v4549_v50, %v4749_v54  ;;  %v1786_v41 = vsub.f32 %v4555_v13, %v4749_v54  ;;  %v1787_v37 = vsub.f32 %v4559_v6, %v4749_v54 }
 0x2a0   : > { %v1923_v59 = vunpack.c.l.b16 %v1877_v28  ;;  %v4875_v16 = vunpack.c.l.b16 %v1878_v11  ;;  %v1775_v63 = vsub.f32 %v4553_v39, %v4749_v54  ;;  %v1843_v15 = vmax.f32 %v1811_v33, 0.0 }
 0x2a1   : > { %v2129_v12 = vor.u32 %v2127_v38, %v4837_v52  ;;  %v1844_v3 = vmax.f32 %v1812_v4, 0.0  ;;  %v1776_v8 = vsub.f32 %v4557_v1, %v4749_v54  ;;  %v1777_v58 = vsub.f32 %v4561_v47, %v4749_v54 }
 0x2a2   : > { %v2051_v49 = vpack.c.b16 %v4875_v16, %v1923_v59  ;;  %v1829_v50 = vmul.f32 %v4763_v30, %v1786_v41  ;;  %v1830_v13 = vmul.f32 %v4763_v30, %v1787_v37  ;;  %v1788_v6 = vsub.f32 %v4563_v62, %v4749_v54 }
 0x2a3   : > { %v4868_v25 = vsel %vm3805_vm2, %v1980_v61, %v2129_v12  ;;  %v1789_v39 = vsub.f32 %v4567_v36, %v4749_v54  ;;  %v1939_v29 = vpack.c.b16 %v1923_v59, %v1923_v59  ;;  %v1815_v57 = vmul.f32 %v4763_v30, %v1772_v43 }
 0x2a4   : > { %2687 = vrot.lane.b32.xlu0 %v4868_v25, %s3749_s18  ;;  %v2068_v22 = vshrl.u32 %v2051_v49, 16  ;;  %v1816_v2 = vmul.f32 %v4763_v30, %v1773_v40  ;;  %v4901_v1 = vmul.f32 %v4763_v30, %v1774_v53  ;;  %v4904_v47 = vmul.f32 %v4763_v30, %v1775_v63 }
 0x2a5   : > { %v2071_v26 = vshll.u32 %v2051_v49, 16  ;;  %v1875_v19 = vpack.c.bf16 %v1843_v15, %v1843_v15  ;;  %v1876_v62 = vpack.c.bf16 %v1844_v3, %v1844_v3  ;;  %v4909_v42 = vmul.f32 %v4763_v30, %v1776_v8 }
 0x2a6   : > { %v4906_v24 = vrot.slane %v2068_v22, 7  ;;  %v4912_v36 = vmul.f32 %v4763_v30, %v1777_v58  ;;  %v1861_v54 = vmax.f32 %v1829_v50, 0.0  ;;  %v1862_v45 = vmax.f32 %v1830_v13, 0.0 }
 0x2a7   : > { %v1956_v38 = vshrl.u32 %v1939_v29, 16  ;;  %v1924_v23 = vunpack.c.l.b16 %v1875_v19  ;;  %v4915_v61 = vunpack.c.l.b16 %v1876_v62  ;;  %v4918_v12 = vmul.f32 %v4763_v30, %v1788_v6 }
 0x2a8   : > { %v2073_v34 = vor.u32 %v2071_v26, %v4906_v24  ;;  %v4921_v9 = vmul.f32 %v4763_v30, %v1789_v39  ;;  %v1847_v44 = vmax.f32 %v1815_v57, 0.0  ;;  %v1848_v33 = vmax.f32 %v1816_v2, 0.0 }
 0x2a9   : > { %v1849_v28 = vmax.f32 %v4901_v1, 0.0  ;;  %v1850_v11 = vmax.f32 %v4904_v47, 0.0  ;;  %v2052_v43 = vpack.c.b16 %v4915_v61, %v1924_v23  ;;  %v1851_v59 = vmax.f32 %v4909_v42, 0.0 }
 0x2aa   : > { %v4925_v4 = vsel %vm3805_vm2, %v1956_v38, %v2073_v34  ;;  %v1852_v30 = vmax.f32 %v4912_v36, 0.0  ;;  %v1853_v40 = vmax.f32 %v4782_v56, 0.0  ;;  %v1854_v53 = vmax.f32 %v4785_v18, 0.0 }
 0x2ab   : > { %2673 = vrot.lane.b32.xlu1 %v4925_v4, %s3749_s18  ;;  %v1940_v41 = vpack.c.b16 %v1924_v23, %v1924_v23  ;;  %v2075_v37 = vshrl.u32 %v2052_v43, 16  ;;  %v1893_v63 = vpack.c.bf16 %v1861_v54, %v1861_v54  ;;  %v1894_v49 = vpack.c.bf16 %v1862_v45, %v1862_v45 }
 0x2ac   : > { %v1855_v15 = vmax.f32 %v4794_v14, 0.0  ;;  %v1856_v3 = vmax.f32 %v4797_v7, 0.0  ;;  %v1857_v8 = vmax.f32 %v4800_v55, 0.0  ;;  %v1858_v58 = vmax.f32 %v4803_v27, 0.0 }
 0x2ad   : > { %v1865_v50 = vmax.f32 %v4829_v10, 0.0  ;;  %v1866_v13 = vmax.f32 %v4832_v35, 0.0  ;;  %v4942_v6 = vrot.slane %v2075_v37, 7  ;;  %v2078_v56 = vshll.u32 %v2052_v43, 16 }
 0x2ae   : > { %v1867_v18 = vmax.f32 %v4835_v46, 0.0  ;;  %v1868_v39 = vmax.f32 %v4840_v51, 0.0  ;;  %v1869_v29 = vmax.f32 %v4843_v31, 0.0  ;;  %v1870_v14 = vmax.f32 %v4846_v17, 0.0 }
 0x2af   : > { %v1959_v7 = vshrl.u32 %v1940_v41, 16  ;;  %v2080_v55 = vor.u32 %v2078_v56, %v4942_v6  ;;  %v1932_v22 = vunpack.c.l.b16 %v1893_v63  ;;  %v4949_v27 = vunpack.c.l.b16 %v1894_v49 }
 0x2b0   : > { %v1871_v10 = vmax.f32 %v4856_v0, 0.0  ;;  %v1872_v35 = vmax.f32 %v4862_v60, 0.0  ;;  %v1879_v57 = vpack.c.bf16 %v1847_v44, %v1847_v44  ;;  %v1880_v2 = vpack.c.bf16 %v1848_v33, %v1848_v33 }
 0x2b1   : > { %v4955_v46 = vsel %vm3805_vm2, %v1959_v7, %v2080_v55  ;;  %v1885_v51 = vpack.c.bf16 %v1853_v40, %v1853_v40  ;;  %v1886_v31 = vpack.c.bf16 %v1854_v53, %v1854_v53  ;;  %v2060_v17 = vpack.c.b16 %v4949_v27, %v1932_v22 }
 0x2b2   : > { %2671 = vrot.lane.b32.xlu2 %v4955_v46, %s3749_s18  ;;  %v1887_v26 = vpack.c.bf16 %v1855_v15, %v1855_v15  ;;  %v1888_v19 = vpack.c.bf16 %v1856_v3, %v1856_v3  ;;  %v1889_v62 = vpack.c.bf16 %v1857_v8, %v1857_v8  ;;  %v1890_v54 = vpack.c.bf16 %v1858_v58, %v1858_v58 }
 0x2b3   : > { %v1897_v0 = vpack.c.bf16 %v1865_v50, %v1865_v50  ;;  %v1898_v45 = vpack.c.bf16 %v1866_v13, %v1866_v13  ;;  %v1948_v60 = vpack.c.b16 %v1932_v22, %v1932_v22  ;;  %v2131_v38 = vshrl.u32 %v2060_v17, 16 }
 0x2b4   : > { %v1899_v34 = vpack.c.bf16 %v1867_v18, %v1867_v18  ;;  %v1901_v23 = vpack.c.bf16 %v1869_v29, %v1869_v29  ;;  %v1925_v44 = vunpack.c.l.b16 %v1879_v57  ;;  %v4960_v33 = vunpack.c.l.b16 %v1880_v2 }
 0x2b5   : > { %v1900_v43 = vpack.c.bf16 %v1868_v39, %v1868_v39  ;;  %v1902_v40 = vpack.c.bf16 %v1870_v14, %v1870_v14  ;;  %v4962_v53 = vrot.slane %v2131_v38, 7  ;;  %v2134_v41 = vshll.u32 %v2060_v17, 16 }
 0x2b6   : > { %v1903_v37 = vpack.c.bf16 %v1871_v10, %v1871_v10  ;;  %v1904_v63 = vpack.c.bf16 %v1872_v35, %v1872_v35  ;;  %v4964_v49 = vunpack.c.l.b16 %v1885_v51  ;;  %v4966_v15 = vunpack.c.l.b16 %v1887_v26 }
 0x2b7   : > { %v1983_v3 = vshrl.u32 %v1948_v60, 16  ;;  %v2136_v8 = vor.u32 %v2134_v41, %v4962_v53  ;;  %v4969_v58 = vunpack.c.l.b16 %v1889_v62  ;;  %v4971_v50 = vunpack.c.l.b16 %v1897_v0 }
 0x2b8   : > { %v4973_v13 = vunpack.c.l.b16 %v1899_v34  ;;  %v4975_v56 = vunpack.c.l.b16 %v1901_v23  ;;  %v4977_v18 = vunpack.c.l.b16 %v1886_v31  ;;  %v2053_v39 = vpack.c.b16 %v4960_v33, %v1925_v44 }
 0x2b9   : > { %v4982_v29 = vsel %vm3805_vm2, %v1983_v3, %v2136_v8  ;;  %v4984_v14 = vunpack.c.l.b16 %v1888_v19  ;;  %v4986_v7 = vunpack.c.l.b16 %v1890_v54  ;;  %v1941_v55 = vpack.c.b16 %v1925_v44, %v1925_v44 }
 0x2ba   : > { %6376 = vst [vmem:[#allocation3_spill] sm:$0xff] %v4982_v29  ;;  %2783 = vrot.lane.b32.xlu0 %v4982_v29, %s3750_s19  ;;  %v4990_v22 = vunpack.c.l.b16 %v1898_v45  ;;  %v4992_v10 = vunpack.c.l.b16 %v1900_v43  ;;  %v4994_v35 = vunpack.c.l.b16 %v1902_v40  ;;  %v2082_v57 = vshrl.u32 %v2053_v39, 16  ;;  %2767 = vrot.lane.b32.xlu2 %v4925_v4, %s3750_s19 }
 0x2bb   : > { %v1863_v2 = vmax.f32 %v4918_v12, 0.0  ;;  %v1864_v51 = vmax.f32 %v4921_v9, 0.0  ;;  %v5000_v31 = vunpack.c.l.b16 %v1903_v37  ;;  %v5002_v17 = vunpack.c.l.b16 %v1904_v63 }
 0x2bc   : > { %v1881_v26 = vpack.c.bf16 %v1849_v28, %v1849_v28  ;;  %v1882_v19 = vpack.c.bf16 %v1850_v11, %v1850_v11  ;;  %v5010_v62 = vrot.slane %v2082_v57, 7  ;;  %v2085_v54 = vshll.u32 %v2053_v39, 16 }
 0x2bd   : > { %v1962_v0 = vshrl.u32 %v1941_v55, 16  ;;  %v5014_v12 = vpack.c.b16 %v4977_v18, %v4964_v49  ;;  %v5018_v9 = vpack.c.b16 %v4984_v14, %v4966_v15  ;;  %v5022_v1 = vpack.c.b16 %v4986_v7, %v4969_v58 }
 0x2be   : > { %6377 = vst [vmem:[#allocation4_spill] sm:$0xff] %v5010_v62  ;;  %v2087_v47 = vor.u32 %v2085_v54, %v5010_v62  ;;  %v5027_v28 = vpack.c.b16 %v4990_v22, %v4971_v50  ;;  %v5031_v11 = vpack.c.b16 %v4992_v10, %v4973_v13  ;;  %v5035_v45 = vpack.c.b16 %v4994_v35, %v4975_v56 }
 0x2bf   : > { %v2219_v60 = vpack.c.b16 %v4791_v21, %v4791_v21  ;;  %v1895_v38 = vpack.c.bf16 %v1863_v2, %v1863_v2  ;;  %v1896_v34 = vpack.c.bf16 %v1864_v51, %v1864_v51  ;;  %v5041_v23 = vpack.c.b16 %v5002_v17, %v5000_v31 }
 0x2c0   : > { %v1883_v44 = vpack.c.bf16 %v1851_v59, %v1851_v59  ;;  %v5048_v43 = vsel %vm3805_vm2, %v1962_v0, %v2087_v47  ;;  %v1884_v21 = vpack.c.bf16 %v1852_v30, %v1852_v30  ;;  %v1926_v40 = vunpack.c.l.b16 %v1881_v26 }
 0x2c1   : > { %6378 = vst [vmem:[#allocation5_spill] sm:$0xff] %v5048_v43  ;;  %2769 = vrot.lane.b32.xlu1 %v5048_v43, %s3750_s19  ;;  %v5055_v41 = vunpack.c.l.b16 %v1882_v19  ;;  %v5061_v42 = vshll.u32 %v2219_v60, 16  ;;  %v1933_v59 = vunpack.c.l.b16 %v1895_v38  ;;  %v5063_v37 = vunpack.c.l.b16 %v1896_v34 }
 0x2c2   : > { %2675 = vrot.lane.b32.xlu0 %v5048_v43, %s3749_s18  ;;  %2689 = vrot.lane.b32.xlu2 %v4982_v29, %s3749_s18  ;;  %v5065_v63 = vunpack.c.l.b16 %v1883_v44  ;;  %v5067_v3 = vunpack.c.l.b16 %v1884_v21  ;;  %v2220_v55 = vpack.c.b16 %v4949_v27, %v4949_v27  ;;  %v1942_v57 = vpack.c.b16 %v1926_v40, %v1926_v40 }
 0x2c3   : > { %6379 = vst [vmem:[#allocation6_spill] sm:$0xff] %v5055_v41  ;;  %v2054_v36 = vpack.c.b16 %v5055_v41, %v1926_v40  ;;  %v2061_v39 = vpack.c.b16 %v5063_v37, %v1933_v59  ;;  %v1944_v51 = vpack.c.b16 %v4964_v49, %v4964_v49  ;;  %v1945_v26 = vpack.c.b16 %v4966_v15, %v4966_v15 }
 0x2c4   : > { %6380 = vst [vmem:[#allocation7_spill] sm:$0xff] %v5067_v3  ;;  %v1946_v19 = vpack.c.b16 %v4969_v58, %v4969_v58  ;;  %v1949_v54 = vpack.c.b16 %v1933_v59, %v1933_v59  ;;  %v1950_v0 = vpack.c.b16 %v4971_v50, %v4971_v50  ;;  %v1953_v27 = vpack.c.b16 %v5000_v31, %v5000_v31 }
 0x2c5   : > { %v2055_v47 = vpack.c.b16 %v5067_v3, %v5065_v63  ;;  %v2089_v60 = vshrl.u32 %v2054_v36, 16  ;;  %v2110_v38 = vshrl.u32 %v5018_v9, 16  ;;  %v2216_v49 = vpack.c.b16 %v4977_v18, %v4977_v18 }
 0x2c6   : > { %v2117_v15 = vshrl.u32 %v5022_v1, 16  ;;  %v2138_v34 = vshrl.u32 %v2061_v39, 16  ;;  %v2166_v58 = vshrl.u32 %v5041_v23, 16  ;;  %v2218_v50 = vpack.c.b16 %v4986_v7, %v4986_v7 }
 0x2c7   : > { %v2222_v31 = vpack.c.b16 %v4990_v22, %v4990_v22  ;;  %v2264_v44 = vshll.u32 %v2220_v55, 16  ;;  %v1965_v21 = vshrl.u32 %v1942_v57, 16  ;;  %v1971_v40 = vshrl.u32 %v1944_v51, 16 }
 0x2c8   : > { %v1974_v59 = vshrl.u32 %v1945_v26, 16  ;;  %v1977_v8 = vshrl.u32 %v1946_v19, 16  ;;  %v1986_v2 = vshrl.u32 %v1949_v54, 16  ;;  %v2103_v30 = vshrl.u32 %v5014_v12, 16 }
 0x2c9   : > { %v2145_v18 = vshrl.u32 %v5027_v28, 16  ;;  %v5101_v3 = vrot.slane %v2089_v60, 7  ;;  %v5103_v41 = vrot.slane %v2110_v38, 7  ;;  %v1998_v29 = vshrl.u32 %v1953_v27, 16 }
 0x2ca   : > { %v2119_v43 = vrot.slane %v2117_v15, 7  ;;  %v5105_v7 = vrot.slane %v2138_v34, 7  ;;  %v5107_v5 = vrot.slane %v2166_v58, 7  ;;  %v2092_v22 = vshll.u32 %v2054_v36, 16 }
 0x2cb   : > { %v2096_v55 = vshrl.u32 %v2055_v47, 16  ;;  %v2113_v57 = vshll.u32 %v5018_v9, 16  ;;  %v2256_v51 = vshll.u32 %v2218_v50, 16  ;;  %v2106_v26 = vshll.u32 %v5014_v12, 16 }
 0x2cc   : > { %v2120_v19 = vshll.u32 %v5022_v1, 16  ;;  %v2141_v54 = vshll.u32 %v2061_v39, 16  ;;  %v2169_v60 = vshll.u32 %v5041_v23, 16  ;;  %v2105_v38 = vrot.slane %v2103_v30, 7 }
 0x2cd   : > { %v2147_v62 = vrot.slane %v2145_v18, 7  ;;  %v2094_v27 = vor.u32 %v2092_v22, %v5101_v3  ;;  %v2115_v15 = vor.u32 %v2113_v57, %v5103_v41  ;;  %v2148_v34 = vshll.u32 %v5027_v28, 16 }
 0x2ce   : > { %v2122_v36 = vor.u32 %v2120_v19, %v2119_v43  ;;  %v2171_v58 = vor.u32 %v2169_v60, %v5107_v5  ;;  %v2143_v9 = vor.u32 %v2141_v54, %v5105_v7  ;;  %v5118_v50 = vrot.slane %v2096_v55, 7 }
 0x2cf   : > { %v2258_v12 = vrot.slane %v2256_v51, 3  ;;  %v5122_v1 = vsel %vm3805_vm2, %v1965_v21, %v2094_v27  ;;  %v5126_v23 = vsel %vm3805_vm2, %v1974_v59, %v2115_v15  ;;  %v1989_v30 = vshrl.u32 %v1950_v0, 16 }
 0x2d0   : > { %6381 = vst [vmem:[#allocation8_spill] sm:$0xff] %v5122_v1  ;;  %v2099_v39 = vshll.u32 %v2055_v47, 16  ;;  %2677 = vrot.lane.b32.xlu1 %v5122_v1, %s3749_s18  ;;  %v5132_v28 = vsel %vm3805_vm2, %v1998_v29, %v2171_v58  ;;  %2771 = vrot.lane.b32.xlu0 %v5122_v1, %s3750_s19  ;;  %v5138_v21 = vsel %vm3805_vm2, %v1986_v2, %v2143_v9  ;;  %v2266_v18 = vrot.slane %v2264_v44, 3 }
 0x2d1   : > { %6382 = vst [vmem:[#allocation9_spill] sm:$0xff] %v5138_v21  ;;  %v2272_v22 = vshll.u32 %v2222_v31, 16  ;;  %2785 = vrot.lane.b32.xlu2 %v5138_v21, %s3750_s19  ;;  %v2150_v0 = vor.u32 %v2148_v34, %v2147_v62  ;;  %v2108_v47 = vor.u32 %v2106_v26, %v2105_v38  ;;  %v6383_v59 = vpack.c.b16 %v4875_v16, %v4875_v16 }
 0x2d2   : > { %v2248_v29 = vshll.u32 %v2216_v49, 16  ;;  %v5147_v57 = vsel %vm3805_vm2, %v1977_v8, %v2122_v36  ;;  %v2101_v51 = vor.u32 %v2099_v39, %v5118_v50  ;;  %v5160_v44 = vsel %vm3805_vm2, %v2119_v43, %v2258_v12 }
 0x2d3   : > { %v2228_v55 = vshll.u32 %v6383_v59, 16  ;;  %v5152_v2 = vsel %vm3805_vm2, %v1989_v30, %v2150_v0  ;;  %v5156_v31 = vsel %vm3805_vm2, %v1971_v40, %v2108_v47  ;;  %v6386_v16 = vpack.c.b16 %v5065_v63, %v5065_v63 }
 0x2d4   : > { %6384 = vst [vmem:[#allocation10_spill] sm:$0xff] %v5152_v2  ;;  %v2274_v8 = vrot.slane %v2272_v22, 3  ;;  %v6387_v26 = vrot.slane %v5061_v42, 3  ;;  %v5175_v40 = vsel %vm3805_vm2, %v4962_v53, %v2266_v18  ;;  %v2212_v43 = vpack.c.b16 %v4915_v61, %v4915_v61 }
 0x2d5   : > { %6385 = vst [vmem:[#allocation11_spill] sm:$0xff] %v5156_v31  ;;  %v1968_v49 = vshrl.u32 %v6386_v16, 16  ;;  %v2230_v54 = vrot.slane %v2228_v55, 3  ;;  %v2250_v60 = vrot.slane %v2248_v29, 3  ;;  %v2549_v42 = vrot.slane %v4925_v4, 1 }
 0x2d6   : > { %v5170_v19 = vsel %vm3805_vm2, %v4837_v52, %v6387_v26  ;;  %v5191_v52 = vsel %vm3805_vm2, %v2147_v62, %v2274_v8  ;;  %v2232_v61 = vshll.u32 %v2212_v43, 16  ;;  %v2570_v58 = vrot.slane %v5147_v57, 1 }
 0x2d7   : > { %v5181_v63 = vsel %vm3805_vm2, %v1968_v49, %v2101_v51  ;;  %v5196_v53 = vsel %vm3805_vm2, %v4906_v24, %v2230_v54  ;;  %v5201_v27 = vsel %vm3805_vm2, %v2105_v38, %v2250_v60  ;;  %v2223_v24 = vpack.c.b16 %v4992_v10, %v4992_v10 }
 0x2d8   : > { %6388 = vst [vmem:[#allocation12_spill] sm:$0xff] %v5181_v63  ;;  %2773 = vrot.lane.b32.xlu1 %v5181_v63, %s3750_s19  ;;  %2691 = vrot.lane.b32.xlu0 %v5138_v21, %s3749_s18  ;;  %v2550_v15 = vrot.slane %v5196_v53, 1  ;;  %v2234_v34 = vrot.slane %v2232_v61, 3  ;;  %v2552_v38 = vrot.slane %v4955_v46, 1  ;;  %v2217_v9 = vpack.c.b16 %v4984_v14, %v4984_v14 }
 0x2d9   : > { %2679 = vrot.lane.b32.xlu2 %v5181_v63, %s3749_s18  ;;  %v2152_v12 = vshrl.u32 %v5031_v11, 16  ;;  %v2213_v39 = vpack.c.b16 %v4960_v33, %v4960_v33  ;;  %v2276_v10 = vshll.u32 %v2223_v24, 16  ;;  %v2571_v18 = vrot.slane %v5160_v44, 1 }
 0x2da   : > { %v2551_v36 = vsel %vm882_vm3, %v2549_v42, %v2550_v15  ;;  %v5215_v62 = vsel %vm3805_vm2, %v4942_v6, %v2234_v34  ;;  %v2224_v22 = vpack.c.b16 %v4994_v35, %v4994_v35  ;;  %v1951_v14 = vpack.c.b16 %v4973_v13, %v4973_v13 }
 0x2db   : > { %v2553_v30 = vrot.slane %v5215_v62, 1  ;;  %v5231_v0 = vsel %vm882_vm3, %v2570_v58, %v2571_v18  ;;  %v2252_v47 = vshll.u32 %v2217_v9, 16  ;;  %v2154_v33 = vrot.slane %v2152_v12, 7  ;;  %v6392_v18 = vld [vmem:[#allocation5_spill] sm:$0xff] }
 0x2dc   : > { %v2225_v59 = vpack.c.b16 %v5002_v17, %v5002_v17  ;;  %v2236_v55 = vshll.u32 %v2213_v39, 16  ;;  %v2278_v35 = vrot.slane %v2276_v10, 3  ;;  %v2155_v29 = vshll.u32 %v5031_v11, 16 }
 0x2dd   : > { %v2554_v6 = vsel %vm882_vm3, %v2552_v38, %v2553_v30  ;;  %v2226_v51 = vpack.c.b16 %v4789_v48, %v4789_v48  ;;  %v2159_v16 = vshrl.u32 %v5035_v45, 16  ;;  %v2280_v49 = vshll.u32 %v2224_v22, 16  ;;  %v6390_v30 = vld [vmem:[#allocation4_spill] sm:$0xff] }
 0x2de   : > { %v2573_v13 = vrot.slane %v4868_v25, 1  ;;  %v2221_v8 = vpack.c.b16 %v5063_v37, %v5063_v37  ;;  %v1992_v26 = vshrl.u32 %v1951_v14, 16  ;;  %v2254_v43 = vrot.slane %v2252_v47, 3  ;;  %v6393_v14 = vld [vmem:[#allocation3_spill] sm:$0xff] }
 0x2df   : > { %v2157_v54 = vor.u32 %v2155_v29, %v2154_v33  ;;  %v2284_v60 = vshll.u32 %v2225_v59, 16  ;;  %v2238_v17 = vrot.slane %v2236_v55, 3  ;;  %v2574_v61 = vrot.slane %v5170_v19, 1  ;;  %v6394_v55 = vld [vmem:[#allocation6_spill] sm:$0xff] }
 0x2e0   : > { %2641 = vrot.lane.b32.xlu1 %v2551_v36, %s3751_s20  ;;  %2787 = vrot.lane.b32.xlu0 %v5152_v2, %s3750_s19  ;;  %v5250_v11 = vsel %vm3805_vm2, %v2154_v33, %v2278_v35  ;;  %v1952_v42 = vpack.c.b16 %v4975_v56, %v4975_v56  ;;  %v2161_v15 = vrot.slane %v2159_v16, 7  ;;  %v2282_v37 = vrot.slane %v2280_v49, 3 }
 0x2e1   : > { %2775 = vrot.lane.b32.xlu2 %v5156_v31, %s3750_s19  ;;  %v5254_v48 = vsel %vm3805_vm2, %v1992_v26, %v2157_v54  ;;  %v5260_v34 = vsel %vm882_vm3, %v2573_v13, %v2574_v61  ;;  %v2173_v24 = vshrl.u32 %v4807_v20, 16  ;;  %v2288_v38 = vshll.u32 %v2226_v51, 16 }
 0x2e2   : > { %6389 = vst [vmem:[#allocation13_spill] sm:$0xff] %v5260_v34  ;;  %v5269_v58 = vsel %vm3805_vm2, %v5103_v41, %v2254_v43  ;;  %v2162_v56 = vshll.u32 %v5035_v45, 16  ;;  %v2268_v9 = vshll.u32 %v2221_v8, 16  ;;  %v2286_v12 = vrot.slane %v2284_v60, 3 }
 0x2e3   : > { %v5275_v39 = vsel %vm3805_vm2, %v6390_v30, %v2238_v17  ;;  %v1995_v22 = vshrl.u32 %v1952_v42, 16  ;;  %v2576_v47 = vrot.slane %v6393_v14, 1  ;;  %v5283_v41 = vsel %vm3805_vm2, %v2161_v15, %v2282_v37 }
 0x2e4   : > { %v2164_v33 = vor.u32 %v2162_v56, %v2161_v15  ;;  %v2175_v45 = vrot.slane %v2173_v24, 7  ;;  %v2290_v59 = vrot.slane %v2288_v38, 3  ;;  %v2214_v35 = vpack.c.b16 %v6394_v55, %v6394_v55 }
 0x2e5   : > { %v2556_v29 = vrot.slane %v5275_v39, 1  ;;  %v2270_v51 = vrot.slane %v2268_v9, 3  ;;  %v2577_v16 = vrot.slane %v5175_v40, 1  ;;  %v5296_v13 = vsel %vm3805_vm2, %v5107_v5, %v2286_v12  ;;  %v6396_v9 = vld [vmem:[#allocation7_spill] sm:$0xff] }
 0x2e6   : > { %v5291_v49 = vsel %vm3805_vm2, %v1995_v22, %v2164_v33  ;;  %v2176_v8 = vshll.u32 %v4807_v20, 16  ;;  %v2240_v17 = vshll.u32 %v2214_v35, 16  ;;  %v2338_v20 = vsel %vm3805_vm2, %v2175_v45, %v2290_v59 }
 0x2e7   : > { %v2578_v43 = vsel %vm882_vm3, %v2576_v47, %v2577_v16  ;;  %v5308_v5 = vsel %vm3805_vm2, %v5105_v7, %v2270_v51  ;;  %v2579_v61 = vrot.slane %v5138_v21, 1  ;;  %v2602_v37 = vshll.u32 %v2338_v20, 16 }
 0x2e8   : > { %2735 = vrot.lane.b32.xlu1 %v2554_v6, %s3752_s21  ;;  %2643 = vrot.lane.b32.xlu0 %v2554_v6, %s3751_s20  ;;  %v2555_v6 = vrot.slane %v6392_v18, 1  ;;  %v2178_v60 = vor.u32 %v2176_v8, %v2175_v45  ;;  %v2580_v38 = vrot.slane %v5308_v5, 1  ;;  %v2609_v56 = vrot.slane %v2338_v20, 1 }
 0x2e9   : > { %2655 = vrot.lane.b32.xlu2 %v5231_v0, %s3751_s20  ;;  %v2215_v7 = vpack.c.b16 %v6396_v9, %v6396_v9  ;;  %v2242_v12 = vrot.slane %v2240_v17, 3  ;;  %v2604_v47 = vrot.slane %v2602_v37, 1  ;;  %v2582_v55 = vrot.slane %v5152_v2, 1 }
 0x2ea   : > { %v2557_v26 = vsel %vm882_vm3, %v2555_v6, %v2556_v29  ;;  %v2558_v35 = vrot.slane %v5122_v1, 1  ;;  %v2583_v29 = vrot.slane %v5191_v52, 1  ;;  %v2564_v32 = vrot.slane %v5156_v31, 1 }
 0x2eb   : > { %v2244_v33 = vshll.u32 %v2215_v7, 16  ;;  %v5336_v45 = vsel %vm3805_vm2, %v5101_v3, %v2242_v12  ;;  %v2565_v37 = vrot.slane %v5201_v27, 1  ;;  %v2431_v7 = vshll.u32 %v5160_v44, 16 }
 0x2ec   : > { %v2559_v51 = vrot.slane %v5336_v45, 1  ;;  %v5346_v8 = vsel %vm882_vm3, %v2582_v55, %v2583_v29  ;;  %v2424_v12 = vshrl.u32 %v5147_v57, 16 }
 0x2ed   : > { %v2246_v16 = vrot.slane %v2244_v33, 3  ;;  %v2354_v33 = vshll.u32 %v4955_v46, 16  ;;  %v2433_v55 = vrot.slane %v2431_v7, 1  ;;  %v2448_v7 = vshrl.u32 %v6393_v14, 16 }
 0x2ef   : > { %v5356_v3 = vsel %vm3805_vm2, %v5118_v50, %v2246_v16  ;;  %v2426_v50 = vshll.u32 %v5147_v57, 16  ;;  %v2443_v16 = vshll.u32 %v5170_v19, 16 }
 0x2f0   : > { %2827 = vrot.lane.b32.xlu1 %v2551_v36, %s3753_s22  ;;  %2737 = vrot.lane.b32.xlu0 %v2551_v36, %s3752_s21  ;;  %v6391_v36 = vld [vmem:[#allocation2_spill] sm:$0xff]  ;;  %v2562_v17 = vrot.slane %v5356_v3, 1 }
 0x2f1   : > { %2751 = vrot.lane.b32.xlu2 %v5260_v34, %s3752_s21  ;;  %v1954_v10 = vpack.c.b16 %v6391_v36, %v6391_v36 }
 0x2f3   : > { %v2001_v54 = vshrl.u32 %v1954_v10, 16  ;;  %v5324_v10 = vsel %vm882_vm3, %v2579_v61, %v2580_v38  ;;  %v2428_v38 = vrot.slane %v2426_v50, 1  ;;  %v2450_v50 = vshll.u32 %v6393_v14, 16 }
 0x2f5   : > { %v5315_v42 = vsel %vm3805_vm2, %v2001_v54, %v2178_v60  ;;  %v2560_v54 = vsel %vm882_vm3, %v2558_v35, %v2559_v51  ;;  %v2561_v60 = vrot.slane %v5181_v63, 1  ;;  %v2356_v51 = vrot.slane %v2354_v33, 1 }
 0x2f6   : > { %6395 = vst [vmem:[#allocation4_spill] sm:$0xff] %v5315_v42  ;;  %v2597_v15 = vshll.u32 %v5315_v42, 16  ;;  %v2608_v24 = vrot.slane %v5315_v42, 1  ;;  %v2595_v30 = vshrl.u32 %v5315_v42, 16  ;;  %v2452_v19 = vrot.slane %v2450_v50, 1 }
 0x2f7   : > { %v5363_v61 = vsel %vm882_vm3, %v2561_v60, %v2562_v17  ;;  %v2352_v17 = vshrl.u32 %v4955_v46, 16 }
 0x2f8   : > { %2657 = vrot.lane.b32.xlu1 %v5260_v34, %s3751_s20  ;;  %2829 = vrot.lane.b32.xlu0 %v2557_v26, %s3753_s22  ;;  %v2599_v36 = vrot.slane %v2597_v15, 1  ;;  %v5327_v6 = vsel %vm882_vm3, %v2608_v24, %v2609_v56  ;;  %v2342_v15 = vshll.u32 %v4925_v4, 16  ;;  %v5375_v24 = vsel %vm882_vm3, %v2564_v32, %v2565_v37 }
 0x2f9   : > { %2843 = vrot.lane.b32.xlu2 %v2578_v43, %s3753_s22  ;;  %6397 = vst [vmem:[#allocation2_spill] sm:$0xff] %v5327_v6  ;;  %v2414_v34 = vshll.u32 %v5126_v23, 16 }
 0x2fa   : > { %v2600_v22 = vor.u32 %v2599_v36, %v2595_v30  ;;  %v2344_v9 = vrot.slane %v2342_v15, 1  ;;  %v2340_v30 = vshrl.u32 %v4925_v4, 16  ;;  %v2429_v36 = vor.u32 %v2428_v38, %v2424_v12 }
 0x2fb   : > { %v2357_v15 = vor.u32 %v2356_v51, %v2352_v17  ;;  %v2445_v38 = vrot.slane %v2443_v16, 1  ;;  %v2455_v12 = vshll.u32 %v5175_v40, 16  ;;  %v2364_v40 = vshrl.u32 %v6392_v18, 16 }
 0x2fc   : > { %v5339_v59 = vsel %vm671_vm4, %v2600_v22, %v2604_v47  ;;  %v2345_v22 = vor.u32 %v2344_v9, %v2340_v30  ;;  %v2438_v47 = vshll.u32 %v4868_v25, 16  ;;  %v5390_v29 = vsel %vm671_vm4, %v2429_v36, %v2433_v55 }
 0x2fd   : > { %6398 = vst [vmem:[#allocation5_spill] sm:$0xff] %v5339_v59  ;;  %v2453_v30 = vor.u32 %v2452_v19, %v2448_v7  ;;  %v2371_v51 = vshll.u32 %v5275_v39, 16  ;;  %v2376_v39 = vshrl.u32 %v5122_v1, 16  ;;  %v2390_v7 = vshll.u32 %v5181_v63, 16 }
 0x2fe   : > { %v2440_v44 = vrot.slane %v2438_v47, 1  ;;  %v2457_v47 = vrot.slane %v2455_v12, 1 }
 0x2ff   : > { %v2373_v17 = vrot.slane %v2371_v51, 1 }
 0x300   : > { %2753 = vrot.lane.b32.xlu1 %v2578_v43, %s3752_s21  ;;  %2845 = vrot.lane.b32.xlu0 %v5324_v10, %s3753_s22 }
 0x301   : > { %2739 = vrot.lane.b32.xlu2 %v2557_v26, %s3752_s21 }
 0x308   : > { %2847 = vrot.lane.b32.xlu1 %v5346_v8, %s3753_s22  ;;  %2741 = vrot.lane.b32.xlu0 %v2560_v54, %s3752_s21 }
 0x309   : > { %2831 = vrot.lane.b32.xlu2 %v2560_v54, %s3753_s22 }
 0x30c   : > { %v5360_v20 = vpop.permute.xlu2 %2671 }
 0x310   : > { %2743 = vrot.lane.b32.xlu1 %v5363_v61, %s3752_s21  ;;  %2833 = vrot.lane.b32.xlu0 %v5363_v61, %s3753_s22 }
 0x311   : > { %2645 = vrot.lane.b32.xlu2 %v2557_v26, %s3751_s20  ;;  %v2347_v26 = vshll.u32 %v5196_v53, 16 }
 0x313   : > { %v2349_v35 = vrot.slane %v2347_v26, 1 }
 0x314   : > { %v5377_v56 = vpop.permute.xlu2 %2767 }
 0x315   : > { %v2350_v53 = vsel %vm671_vm4, %v2345_v22, %v2349_v35  ;;  %v2366_v22 = vshll.u32 %v6392_v18, 16  ;;  %v2458_v35 = vsel %vm671_vm4, %v2453_v30, %v2457_v47  ;;  %v2392_v47 = vrot.slane %v2390_v7, 1 }
 0x316   : > { %v5405_v37 = vpop.permute.xlu0 %2687 }
 0x318   : > { %2835 = vrot.lane.b32.xlu1 %v5375_v24, %s3753_s22  ;;  %2647 = vrot.lane.b32.xlu0 %v2560_v54, %s3751_s20  ;;  %v2436_v54 = vshrl.u32 %v4868_v25, 16 }
 0x319   : > { %2659 = vrot.lane.b32.xlu2 %v2578_v43, %s3751_s20  ;;  %v2359_v43 = vshll.u32 %v5215_v62, 16 }
 0x31a   : > { %v2441_v32 = vor.u32 %v2440_v44, %v2436_v54  ;;  %v2368_v44 = vrot.slane %v2366_v22, 1  ;;  %v2378_v54 = vshll.u32 %v5122_v1, 16 }
 0x31b   : > { %v2361_v9 = vrot.slane %v2359_v43, 1 }
 0x31c   : > { %v5401_v60 = vpop.permute.xlu2 %2689  ;;  %v5408_v62 = vsel %vm671_vm4, %v2441_v32, %v2445_v38  ;;  %v2369_v43 = vor.u32 %v2368_v44, %v2364_v40  ;;  %v2380_v50 = vrot.slane %v2378_v54, 1  ;;  %v2467_v44 = vshll.u32 %v5308_v5, 16 }
 0x31d   : > { %6399 = vst [vmem:[#allocation3_spill] sm:$0xff] %v5408_v62  ;;  %v2362_v26 = vsel %vm671_vm4, %v2357_v15, %v2361_v9  ;;  %v5420_v33 = vpop.permute.xlu1 %2673  ;;  %v2395_v54 = vshll.u32 %v5356_v3, 16 }
 0x31e   : > { %v2374_v32 = vsel %vm671_vm4, %v2369_v43, %v2373_v17  ;;  %v2381_v9 = vor.u32 %v2380_v50, %v2376_v39  ;;  %v2388_v43 = vshrl.u32 %v5181_v63, 16 }
 0x320   : > { %2625 = vrot.lane.b32.xlu1 %v5390_v29, %s3754_s23  ;;  %2611 = vrot.lane.b32.xlu0 %v2350_v53, %s3754_s23  ;;  %v2393_v39 = vor.u32 %v2392_v47, %v2388_v43  ;;  %v2472_v47 = vshrl.u32 %v5152_v2, 16  ;;  %v2402_v43 = vshll.u32 %v5156_v31, 16 }
 0x321   : > { %2755 = vrot.lane.b32.xlu2 %v5324_v10, %s3752_s21 }
 0x328   : > { %2719 = vrot.lane.b32.xlu1 %v5408_v62, %s3755_s24  ;;  %2703 = vrot.lane.b32.xlu0 %v2362_v26, %s3755_s24 }
 0x329   : > { %2613 = vrot.lane.b32.xlu2 %v2362_v26, %s3754_s23  ;;  %v2462_v26 = vshll.u32 %v5138_v21, 16 }
 0x32b   : > { %v5417_v36 = vpop.permute.xlu2 %2785  ;;  %v2464_v22 = vrot.slane %v2462_v26, 1  ;;  %v2397_v26 = vrot.slane %v2395_v54, 1 }
 0x32c   : > { %v5422_v55 = vpop.permute.xlu0 %2783 }
 0x32d   : > { %v2398_v7 = vsel %vm671_vm4, %v2393_v39, %v2397_v26  ;;  %v2404_v39 = vrot.slane %v2402_v43, 1 }
 0x330   : > { %2813 = vrot.lane.b32.xlu1 %v2458_v35, %s3756_s25  ;;  %2797 = vrot.lane.b32.xlu0 %v2350_v53, %s3756_s25 }
 0x331   : > { %2705 = vrot.lane.b32.xlu2 %v2350_v53, %s3755_s24  ;;  %v2383_v53 = vshll.u32 %v5336_v45, 16  ;;  %v2460_v45 = vshrl.u32 %v5138_v21, 16  ;;  %v2416_v21 = vrot.slane %v2414_v34, 1  ;;  %v3681_v34 = vld [vmem:[%s6352_s2] sm:$0xff] }
 0x333   : > { %v5430_v16 = vpop.permute.xlu2 %2679  ;;  %v5435_v15 = vpop.permute.xlu1 %2769  ;;  %v2385_v12 = vrot.slane %v2383_v53, 1  ;;  %v2465_v17 = vor.u32 %v2464_v22, %v2460_v45  ;;  %v2474_v53 = vshll.u32 %v5152_v2, 16  ;;  %v2479_v45 = vshll.u32 %v5191_v52, 16 }
 0x334   : > { %6400 = vst [vmem:[#allocation6_spill] sm:$0xff] %v5430_v16  ;;  %v5439_v38 = vpop.permute.xlu0 %2675  ;;  %v2407_v52 = vshll.u32 %v5201_v27, 16 }
 0x335   : > { %v2386_v30 = vsel %vm671_vm4, %v2381_v9, %v2385_v12  ;;  %v2469_v9 = vrot.slane %v2467_v44, 1  ;;  %v2476_v12 = vrot.slane %v2474_v53, 1  ;;  %v2400_v53 = vshrl.u32 %v5156_v31, 16 }
 0x337   : > { %v2470_v5 = vsel %vm671_vm4, %v2465_v17, %v2469_v9  ;;  %v2477_v54 = vor.u32 %v2476_v12, %v2472_v47  ;;  %v2481_v17 = vrot.slane %v2479_v45, 1  ;;  %v2405_v47 = vor.u32 %v2404_v39, %v2400_v53 }
 0x338   : > { %2707 = vrot.lane.b32.xlu1 %v2374_v32, %s3755_s24  ;;  %2627 = vrot.lane.b32.xlu0 %v5408_v62, %s3754_s23  ;;  %v2568_v62 = vrot.slane %v5269_v58, 1 }
 0x339   : > { %2799 = vrot.lane.b32.xlu2 %v2374_v32, %s3756_s25 }
 0x33b   : > { %v5444_v19 = vpop.permute.xlu2 %2775 }
 0x33c   : > { %6401 = vst [vmem:[#allocation7_spill] sm:$0xff] %v5444_v19  ;;  %v2567_v19 = vrot.slane %v5126_v23, 1 }
 0x33e   : > { %v5575_v16 = vsel %vm882_vm3, %v2567_v19, %v2568_v62 }
 0x340   : > { %2801 = vrot.lane.b32.xlu1 %v2386_v30, %s3756_s25  ;;  %2721 = vrot.lane.b32.xlu0 %v2458_v35, %s3755_s24 }
 0x341   : > { %2709 = vrot.lane.b32.xlu2 %v2386_v30, %s3755_s24 }
 0x342   : > { %v5454_v40 = vpop.permute.xlu1 %2677  ;;  %v5456_v51 = vpop.permute.xlu0 %2771 }
 0x343   : > { %v5460_v50 = vpop.permute.xlu2 %2655 }
 0x348   : > { %2815 = vrot.lane.b32.xlu1 %v2470_v5, %s3756_s25  ;;  %2615 = vrot.lane.b32.xlu0 %v2374_v32, %s3754_s23  ;;  %v5479_v32 = vsel %vm671_vm4, %v2477_v54, %v2481_v17 }
 0x349   : > { %2803 = vrot.lane.b32.xlu2 %v2398_v7, %s3756_s25 }
 0x34a   : > { %v5468_v3 = vpop.permute.xlu1 %2773  ;;  %v5470_v22 = vpop.permute.xlu0 %2691 }
 0x34b   : > { %v5474_v44 = vpop.permute.xlu2 %2751 }
 0x350   : > { %2629 = vrot.lane.b32.xlu1 %v2458_v35, %s3754_s23  ;;  %2711 = vrot.lane.b32.xlu0 %v2398_v7, %s3755_s24  ;;  %v2409_v35 = vrot.slane %v2407_v52, 1 }
 0x351   : > { %2817 = vrot.lane.b32.xlu2 %v5479_v32, %s3756_s25 }
 0x352   : > { %v5486_v9 = vpop.permute.xlu1 %2641  ;;  %v5488_v26 = vpop.permute.xlu0 %2787  ;;  %v5493_v45 = vsel %vm671_vm4, %v2405_v47, %v2409_v35 }
 0x353   : > { %6402 = vst [vmem:[#allocation14_spill] sm:$0xff] %v5488_v26  ;;  %v5490_v12 = vpop.permute.xlu2 %2843 }
 0x358   : > { %2723 = vrot.lane.b32.xlu1 %v2470_v5, %s3755_s24  ;;  %2805 = vrot.lane.b32.xlu0 %v5493_v45, %s3756_s25 }
 0x359   : > { %2631 = vrot.lane.b32.xlu2 %v2470_v5, %s3754_s23  ;;  %v2486_v5 = vshll.u32 %v5254_v48, 16 }
 0x35a   : > { %v5499_v43 = vpop.permute.xlu1 %2735  ;;  %v5501_v27 = vpop.permute.xlu0 %2643 }
 0x35b   : > { %v5503_v54 = vpop.permute.xlu2 %2739  ;;  %v2488_v52 = vrot.slane %v2486_v5, 1  ;;  %v2585_v5 = vrot.slane %v5254_v48, 1 }
 0x360   : > { %2617 = vrot.lane.b32.xlu1 %v2386_v30, %s3754_s23  ;;  %2661 = vrot.lane.b32.xlu0 %v5324_v10, %s3751_s20  ;;  %v2484_v10 = vshrl.u32 %v5254_v48, 16  ;;  %v2491_v30 = vshll.u32 %v5250_v11, 16 }
 0x361   : > { %2725 = vrot.lane.b32.xlu2 %v5479_v32, %s3755_s24 }
 0x362   : > { %v5510_v17 = vpop.permute.xlu1 %2827  ;;  %v5512_v39 = vpop.permute.xlu0 %2737  ;;  %v2489_v42 = vor.u32 %v2488_v52, %v2484_v10  ;;  %v2493_v63 = vrot.slane %v2491_v30, 1 }
 0x363   : > { %v5514_v53 = vpop.permute.xlu2 %2831 }
 0x364   : > { %v5533_v59 = vsel %vm671_vm4, %v2489_v42, %v2493_v63 }
 0x368   : > { %2693 = vrot.lane.b32.xlu1 %v5152_v2, %s3749_s18  ;;  %2757 = vrot.lane.b32.xlu0 %v5346_v8, %s3752_s21  ;;  %v2586_v2 = vrot.slane %v5250_v11, 1 }
 0x369   : > { %2619 = vrot.lane.b32.xlu2 %v2398_v7, %s3754_s23 }
 0x36a   : > { %v5524_v47 = vpop.permute.xlu1 %2657  ;;  %v5526_v35 = vpop.permute.xlu0 %2829  ;;  %v5538_v7 = vsel %vm882_vm3, %v2585_v5, %v2586_v2  ;;  %v3110_v2 = vld [vmem:[%s6352_s2 + $0x10] sm:$0x3] }
 0x36b   : > { %v5528_v6 = vpop.permute.xlu2 %2645  ;;  %v3120_v63 = vunpack.c.l.b16 %v3110_v2  ;;  %v3682_v2 = vld [vmem:[%s6352_s2 + $0x8] sm:$0xff] }
 0x370   : > { %2789 = vrot.lane.b32.xlu1 %v5254_v48, %s3750_s19  ;;  %2819 = vrot.lane.b32.xlu0 %v5533_v59, %s3756_s25 }
 0x371   : > { %2849 = vrot.lane.b32.xlu2 %v5538_v7, %s3753_s22 }
 0x372   : > { %v5544_v52 = vpop.permute.xlu1 %2753  ;;  %v5546_v10 = vpop.permute.xlu0 %2845 }
 0x373   : > { %v5548_v11 = vpop.permute.xlu2 %2659 }
 0x378   : > { %2649 = vrot.lane.b32.xlu1 %v5363_v61, %s3751_s20  ;;  %2681 = vrot.lane.b32.xlu0 %v5156_v31, %s3749_s18  ;;  %v3123_v61 = vpack.c.b16 %v3120_v63, %v3120_v63  ;;  %v2412_v63 = vshrl.u32 %v5126_v23, 16 }
 0x379   : > { %2745 = vrot.lane.b32.xlu2 %v5375_v24, %s3752_s21 }
 0x37a   : > { %v5559_v42 = vpop.permute.xlu1 %2847  ;;  %v5561_v30 = vpop.permute.xlu0 %2741  ;;  %v3159_v31 = vsel %vm1501_vm5, %v3123_v61, 0  ;;  %v2419_v61 = vshll.u32 %v5269_v58, 16  ;;  %v2417_v62 = vor.u32 %v2416_v21, %v2412_v63 }
 0x37b   : > { %6403 = vst [vmem:[#allocation15_spill] sm:$0xff] %v5559_v42  ;;  %v5563_v5 = vpop.permute.xlu2 %2755  ;;  %3686 = vmatpush.bf16.msra.mxu3 %v3159_v31  ;;  %3166 = vmatpush.bf16.msra.mxu1 %v3159_v31 }
 0x37c   : > { %v2421_v42 = vrot.slane %v2419_v61, 1 }
 0x37e   : > { %v5593_v58 = vsel %vm671_vm4, %v2417_v62, %v2421_v42 }
 0x37f   : > { %3687 = vmatpush.bf16.msra.mxu3 %v3682_v2  ;;  %3167 = vmatpush.bf16.msra.mxu1 %v3682_v2 }
 0x380   : > { %2713 = vrot.lane.b32.xlu1 %v5493_v45, %s3755_s24  ;;  %2777 = vrot.lane.b32.xlu0 %v5126_v23, %s3750_s19 }
 0x381   : > { %2837 = vrot.lane.b32.xlu2 %v5575_v16, %s3753_s22 }
 0x382   : > { %v5583_v1 = vpop.permute.xlu1 %2743  ;;  %v5585_v31 = vpop.permute.xlu0 %2833 }
 0x383   : > { %6404 = vst [vmem:[#allocation16_spill] sm:$0xff] %v5583_v1  ;;  %v2614_v19 = vpop.permute.xlu2 %2613  ;;  %3688 = vmatpush.bf16.msra.mxu3 %v3681_v34  ;;  %3168 = vmatpush.bf16.msra.mxu1 %v3681_v34 }
 0x384   : > { %v2860_v26 = vsel %vm1191_vm6, %v4955_v46, %v2614_v19 }
 0x385   : > { %v2890_v1 = vsel %vm1222_vm7, %v2860_v26, %v5501_v27 }
 0x386   : > { %v2920_v42 = vsel %vm1253_vm8, %v2890_v1, %v5420_v33  ;;  %v2498_v1 = vshll.u32 %v5291_v49, 16 }
 0x388   : > { %2807 = vrot.lane.b32.xlu1 %v5593_v58, %s3756_s25  ;;  %2633 = vrot.lane.b32.xlu0 %v5479_v32, %s3754_s23  ;;  %v2500_v19 = vrot.slane %v2498_v1, 1 }
 0x389   : > { %2695 = vrot.lane.b32.xlu2 %v5254_v48, %s3749_s18 }
 0x38a   : > { %v5603_v21 = vpop.permute.xlu1 %2835  ;;  %v5605_v46 = vpop.permute.xlu0 %2647 }
 0x38b   : > { %v2706_v2 = vpop.permute.xlu2 %2705 }
 0x38c   : > { %v2952_v63 = vsel %vm1286_vm9, %v2920_v42, %v2706_v2  ;;  %v2503_v2 = vshll.u32 %v5283_v41, 16 }
 0x38d   : > { %v2984_v61 = vsel %vm1319_vm10, %v2952_v63, %v5512_v39 }
 0x390   : > { %2663 = vrot.lane.b32.xlu1 %v5346_v8, %s3751_s20  ;;  %2727 = vrot.lane.b32.xlu0 %v5533_v59, %s3755_s24  ;;  %v3016_v8 = vsel %vm1352_vm11, %v2984_v61, %v5435_v15 }
 0x391   : > { %2791 = vrot.lane.b32.xlu2 %v5291_v49, %s3750_s19 }
 0x392   : > { %v2626_v32 = vpop.permute.xlu1 %2625  ;;  %v2612_v26 = vpop.permute.xlu0 %2611 }
 0x393   : > { %v2800_v27 = vpop.permute.xlu2 %2799  ;;  %v2858_v33 = vsel %vm1191_vm6, %v4925_v4, %v2612_v26  ;;  %v2872_v39 = vsel %vm1191_vm6, %v5147_v57, %v2626_v32  ;;  %v2496_v4 = vshrl.u32 %v5291_v49, 16 }
 0x394   : > { %v2888_v34 = vsel %vm1222_vm7, %v2858_v33, %v5486_v9  ;;  %v3047_v62 = vsel %vm1384_vm12, %v3016_v8, %v2800_v27  ;;  %v2902_v42 = vsel %vm1222_vm7, %v2872_v39, %v5460_v50  ;;  %v2588_v27 = vrot.slane %v5291_v49, 1 }
 0x395   : > { %v2918_v9 = vsel %vm1253_vm8, %v2888_v34, %v5360_v20  ;;  %v3078_v50 = vsel %vm1416_vm13, %v3047_v62, %v5526_v35  ;;  %v2934_v61 = vsel %vm1253_vm8, %v2902_v42, %v5405_v37  ;;  %v2501_v32 = vor.u32 %v2500_v19, %v2496_v4 }
 0x396   : > { %v2505_v20 = vrot.slane %v2503_v2, 1  ;;  %v2589_v33 = vrot.slane %v5283_v41, 1 }
 0x398   : > { %2759 = vrot.lane.b32.xlu1 %v5538_v7, %s3752_s21  ;;  %2621 = vrot.lane.b32.xlu0 %v5493_v45, %s3754_s23  ;;  %v5655_v37 = vsel %vm671_vm4, %v2501_v32, %v2505_v20  ;;  %v5658_v39 = vsel %vm882_vm3, %v2588_v27, %v2589_v33  ;;  %v2508_v33 = vshrl.u32 %v5132_v28, 16 }
 0x399   : > { %2651 = vrot.lane.b32.xlu2 %v5375_v24, %s3751_s20 }
 0x39a   : > { %v2720_v15 = vpop.permute.xlu1 %2719  ;;  %v2704_v63 = vpop.permute.xlu0 %2703 }
 0x39b   : > { %v5644_v45 = vpop.permute.xlu2 %2709  ;;  %v2950_v26 = vsel %vm1286_vm9, %v2918_v9, %v2704_v63  ;;  %v2966_v24 = vsel %vm1286_vm9, %v2934_v61, %v2720_v15 }
 0x39c   : > { %v2982_v1 = vsel %vm1319_vm10, %v2950_v26, %v5499_v43  ;;  %v2998_v35 = vsel %vm1319_vm10, %v2966_v24, %v5474_v44 }
 0x39d   : > { %v3030_v41 = vsel %vm1352_vm11, %v2998_v35, %v5422_v55  ;;  %v3014_v44 = vsel %vm1352_vm11, %v2982_v1, %v5377_v56  ;;  %v2510_v1 = vshll.u32 %v5132_v28, 16 }
 0x3a0   : > { %2821 = vrot.lane.b32.xlu1 %v5655_v37, %s3756_s25  ;;  %2851 = vrot.lane.b32.xlu0 %v5658_v39, %s3753_s22 }
 0x3a1   : > { %2715 = vrot.lane.b32.xlu2 %v5593_v58, %s3755_s24 }
 0x3a2   : > { %v2814_v43 = vpop.permute.xlu1 %2813  ;;  %v2798_v8 = vpop.permute.xlu0 %2797 }
 0x3a3   : > { %v3061_v62 = vsel %vm1384_vm12, %v3030_v41, %v2814_v43  ;;  %v2804_v19 = vpop.permute.xlu2 %2803  ;;  %v3045_v42 = vsel %vm1384_vm12, %v3014_v44, %v2798_v8 }
 0x3a4   : > { %v3092_v4 = vsel %vm1416_vm13, %v3061_v62, %v5490_v12  ;;  %v3076_v2 = vsel %vm1416_vm13, %v3045_v42, %v5510_v17  ;;  %v2922_v12 = vsel %vm1253_vm8, %v2888_v34, %v5439_v38 }
 0x3a5   : > { %3667 = vmatmul.msk.bf16.vlgmr.msra.gmra.mxu3 %vm1468_vm14, %v3092_v4  ;;  %3659 = vmatmul.msk.bf16.vlgmr.msra.gmra.mxu1 %vm1468_vm14, %v3076_v2 }
 0x3a8   : > { %2683 = vrot.lane.b32.xlu1 %v5126_v23, %s3749_s18  ;;  %2747 = vrot.lane.b32.xlu0 %v5575_v16, %s3752_s21 }
 0x3a9   : > { %2809 = vrot.lane.b32.xlu2 %v5390_v29, %s3756_s25 }
 0x3aa   : > { %v2708_v56 = vpop.permute.xlu1 %2707  ;;  %v2628_v55 = vpop.permute.xlu0 %2627 }
 0x3ab   : > { %v5686_v15 = vpop.permute.xlu2 %2817  ;;  %v2954_v17 = vsel %vm1286_vm9, %v2922_v12, %v2708_v56  ;;  %v2874_v9 = vsel %vm1191_vm6, %v4868_v25, %v2628_v55  ;;  %v2591_v55 = vrot.slane %v5132_v28, 1 }
 0x3ac   : > { %v2986_v63 = vsel %vm1319_vm10, %v2954_v17, %v5503_v54  ;;  %v2904_v61 = vsel %vm1222_vm7, %v2874_v9, %v5524_v47  ;;  %v6405_v17 = vld [vmem:[#allocation14_spill] sm:$0xff]  ;;  %v6406_v9 = vld [vmem:[#allocation15_spill] sm:$0xff] }
 0x3ad   : > { %v3018_v38 = vsel %vm1352_vm11, %v2986_v63, %v5456_v51  ;;  %v2936_v32 = vsel %vm1253_vm8, %v2904_v61, %v5401_v60  ;;  %v2512_v51 = vrot.slane %v2510_v1, 1  ;;  %v6407_v61 = vld [vmem:[#allocation8_spill] sm:$0xff] }
 0x3af   : > { %v2513_v43 = vor.u32 %v2512_v51, %v2508_v33  ;;  %v6413_v33 = vld [vmem:[#allocation13_spill] sm:$0xff] }
 0x3b0   : > { %2779 = vrot.lane.b32.xlu1 %v5147_v57, %s3750_s19  ;;  %2839 = vrot.lane.b32.xlu0 %v5231_v0, %s3753_s22 }
 0x3b1   : > { %2665 = vrot.lane.b32.xlu2 %v5538_v7, %s3751_s20 }
 0x3b2   : > { %v2802_v34 = vpop.permute.xlu1 %2801  ;;  %v2722_v54 = vpop.permute.xlu0 %2721 }
 0x3b3   : > { %v3049_v26 = vsel %vm1384_vm12, %v3018_v38, %v2802_v34  ;;  %v5706_v47 = vpop.permute.xlu2 %2631  ;;  %v2968_v27 = vsel %vm1286_vm9, %v2936_v32, %v2722_v54  ;;  %v6408_v32 = vld [vmem:[#allocation6_spill] sm:$0xff] }
 0x3b4   : > { %v3000_v24 = vsel %vm1319_vm10, %v2968_v27, %v5544_v52  ;;  %v3080_v7 = vsel %vm1416_vm13, %v3049_v26, %v5514_v53  ;;  %v2515_v53 = vshll.u32 %v5296_v13, 16  ;;  %v6409_v26 = vld [vmem:[#allocation9_spill] sm:$0xff] }
 0x3b5   : > { %3660 = vmatmul.msk.bf16.gmra.mxu1 %vm1468_vm14, %v3078_v50  ;;  %v3032_v60 = vsel %vm1352_vm11, %v3000_v24, %v5417_v36 }
 0x3b6   : > { %v2517_v62 = vrot.slane %v2515_v53, 1 }
 0x3b8   : > { %2635 = vrot.lane.b32.xlu1 %v5533_v59, %s3754_s23  ;;  %2697 = vrot.lane.b32.xlu0 %v5291_v49, %s3749_s18 }
 0x3b9   : > { %2761 = vrot.lane.b32.xlu2 %v5658_v39, %s3752_s21 }
 0x3ba   : > { %v2816_v52 = vpop.permute.xlu1 %2815  ;;  %v2616_v20 = vpop.permute.xlu0 %2615 }
 0x3bb   : > { %v3063_v50 = vsel %vm1384_vm12, %v3032_v60, %v2816_v52  ;;  %v2726_v35 = vpop.permute.xlu2 %2725  ;;  %v2862_v59 = vsel %vm1191_vm6, %v6392_v18, %v2616_v20  ;;  %v5742_v18 = vsel %vm671_vm4, %v2513_v43, %v2517_v62  ;;  %v6412_v52 = vld [vmem:[#allocation7_spill] sm:$0xff] }
 0x3bc   : > { %v3094_v41 = vsel %vm1416_vm13, %v3063_v50, %v5546_v10  ;;  %v2892_v36 = vsel %vm1222_vm7, %v2862_v59, %v5528_v6 }
 0x3bd   : > { %3668 = vmatmul.msk.bf16.gmra.mxu3 %vm1468_vm14, %v3094_v41  ;;  %v2924_v44 = vsel %vm1253_vm8, %v2892_v36, %v5454_v40 }
 0x3be   : > { %v2956_v8 = vsel %vm1286_vm9, %v2924_v44, %v5644_v45 }
 0x3bf   : > { %v2988_v42 = vsel %vm1319_vm10, %v2956_v8, %v5561_v30 }
 0x3c0   : > { %2729 = vrot.lane.b32.xlu1 %v5655_v37, %s3755_s24  ;;  %2793 = vrot.lane.b32.xlu0 %v5132_v28, %s3750_s19  ;;  %v3020_v6 = vsel %vm1352_vm11, %v2988_v42, %v5468_v3  ;;  %v6415_v42 = vld [vmem:[#allocation12_spill] sm:$0xff] }
 0x3c1   : > { %2823 = vrot.lane.b32.xlu2 %v5742_v18, %s3756_s25  ;;  %v3051_v40 = vsel %vm1384_vm12, %v3020_v6, %v2804_v19 }
 0x3c2   : > { %v2630_v10 = vpop.permute.xlu1 %2629  ;;  %v2712_v45 = vpop.permute.xlu0 %2711  ;;  %v3082_v30 = vsel %vm1416_vm13, %v3051_v40, %v5585_v31  ;;  %v6416_v40 = vld [vmem:[#allocation4_spill] sm:$0xff] }
 0x3c3   : > { %v5753_v4 = vpop.permute.xlu2 %2619  ;;  %v2876_v2 = vsel %vm1191_vm6, %v6393_v14, %v2630_v10 }
 0x3c4   : > { %v2906_v3 = vsel %vm1222_vm7, %v2876_v2, %v5548_v11 }
 0x3c5   : > { %3661 = vmatmul.msk.bf16.gmra.mxu1 %vm1468_vm14, %v3080_v7  ;;  %v2938_v31 = vsel %vm1253_vm8, %v2906_v3, %v5470_v22  ;;  %v6411_v7 = vld [vmem:[#allocation16_spill] sm:$0xff] }
 0x3c8   : > { %2623 = vrot.lane.b32.xlu1 %v5593_v58, %s3754_s23  ;;  %2653 = vrot.lane.b32.xlu0 %v5575_v16, %s3751_s20  ;;  %v2592_v58 = vrot.slane %v5296_v13, 1 }
 0x3c9   : > { %2685 = vrot.lane.b32.xlu2 %v5147_v57, %s3749_s18 }
 0x3ca   : > { %v2724_v19 = vpop.permute.xlu1 %2723  ;;  %v2806_v56 = vpop.permute.xlu0 %2805  ;;  %v2593_v22 = vsel %vm882_vm3, %v2591_v55, %v2592_v58 }
 0x3cb   : > { %v2970_v14 = vsel %vm1286_vm9, %v2938_v31, %v2724_v19  ;;  %v2850_v12 = vpop.permute.xlu2 %2849 }
 0x3cc   : > { %v3002_v11 = vsel %vm1319_vm10, %v2970_v14, %v5563_v5 }
 0x3cd   : > { %v3034_v16 = vsel %vm1352_vm11, %v3002_v11, %v6405_v17 }
 0x3ce   : > { %v3065_v57 = vsel %vm1384_vm12, %v3034_v16, %v5686_v15  ;;  %v6418_v16 = vld [vmem:[#allocation10_spill] sm:$0xff] }
 0x3cf   : > { %v3096_v63 = vsel %vm1416_vm13, %v3065_v57, %v6406_v9 }
 0x3d0   : > { %2853 = vrot.lane.b32.xlu1 %v2593_v22, %s3753_s22  ;;  %3669 = vmatmul.msk.bf16.gmra.mxu3 %vm1468_vm14, %v3096_v63 }
 0x3d1   : > { %2781 = vrot.lane.b32.xlu2 %v4868_v25, %s3750_s19  ;;  %2717 = vrot.lane.b32.xlu0 %v5390_v29, %s3755_s24  ;;  %v2878_v25 = vsel %vm1191_vm6, %v6409_v26, %v5706_v47 }
 0x3d2   : > { %v2618_v13 = vpop.permute.xlu1 %2617  ;;  %v2662_v5 = vpop.permute.xlu0 %2661 }
 0x3d3   : > { %v2864_v15 = vsel %vm1191_vm6, %v6407_v61, %v2618_v13  ;;  %v2746_v38 = vpop.permute.xlu2 %2745  ;;  %v2908_v27 = vsel %vm1222_vm7, %v2878_v25, %v2662_v5  ;;  %v6419_v25 = vld [vmem:[#allocation11_spill] sm:$0xff] }
 0x3d4   : > { %v2894_v34 = vsel %vm1222_vm7, %v2864_v15, %v5605_v46  ;;  %v6410_v46 = vld [vmem:[#allocation3_spill] sm:$0xff] }
 0x3d5   : > { %v2926_v54 = vsel %vm1253_vm8, %v2894_v34, %v6408_v32  ;;  %3662 = vmatmul.msk.bf16.gmra.mxu1 %vm1468_vm14, %v3082_v30  ;;  %v6417_v30 = vld [vmem:[#allocation2_spill] sm:$0xff] }
 0x3d6   : > { %v2958_v29 = vsel %vm1286_vm9, %v2926_v54, %v2712_v45 }
 0x3d7   : > { %v2990_v60 = vsel %vm1319_vm10, %v2958_v29, %v6411_v7 }
 0x3d8   : > { %2749 = vrot.lane.b32.xlu1 %v5231_v0, %s3752_s21  ;;  %v3022_v20 = vsel %vm1352_vm11, %v2990_v60, %v6412_v52 }
 0x3d9   : > { %2637 = vrot.lane.b32.xlu2 %v5655_v37, %s3754_s23  ;;  %2811 = vrot.lane.b32.xlu0 %v6410_v46, %s3756_s25  ;;  %v3053_v53 = vsel %vm1384_vm12, %v3022_v20, %v2806_v56 }
 0x3da   : > { %v2694_v24 = vpop.permute.xlu1 %2693  ;;  %v2758_v1 = vpop.permute.xlu0 %2757 }
 0x3db   : > { %v2940_v47 = vsel %vm1253_vm8, %v2908_v27, %v2694_v24  ;;  %v2838_v51 = vpop.permute.xlu2 %2837 }
 0x3dc   : > { %v2972_v0 = vsel %vm1286_vm9, %v2940_v47, %v2726_v35  ;;  %v3084_v35 = vsel %vm1416_vm13, %v3053_v53, %v5603_v21  ;;  %v2866_v21 = vsel %vm1191_vm6, %v6415_v42, %v5753_v4 }
 0x3dd   : > { %v3004_v37 = vsel %vm1319_vm10, %v2972_v0, %v2758_v1 }
 0x3e0   : > { %2841 = vrot.lane.b32.xlu1 %v6413_v33, %s3753_s22 }
 0x3e1   : > { %2731 = vrot.lane.b32.xlu2 %v5742_v18, %s3755_s24  ;;  %2667 = vrot.lane.b32.xlu0 %v5658_v39, %s3751_s20  ;;  %v6414_v39 = vld [vmem:[#allocation5_spill] sm:$0xff] }
 0x3e2   : > { %v2790_v50 = vpop.permute.xlu1 %2789  ;;  %v2820_v59 = vpop.permute.xlu0 %2819 }
 0x3e3   : > { %v3036_v41 = vsel %vm1352_vm11, %v3004_v37, %v2790_v50  ;;  %v2696_v44 = vpop.permute.xlu2 %2695 }
 0x3e4   : > { %v3067_v36 = vsel %vm1384_vm12, %v3036_v41, %v2820_v59 }
 0x3e5   : > { %3663 = vmatmul.msk.bf16.gmra.mxu1 %vm1468_vm14, %v3084_v35  ;;  %v3098_v43 = vsel %vm1416_vm13, %v3067_v36, %v2850_v12 }
 0x3e6   : > { %3670 = vmatmul.msk.bf16.gmra.mxu3 %vm1468_vm14, %v3098_v43 }
 0x3e8   : > { %2699 = vrot.lane.b32.xlu1 %v5132_v28, %s3749_s18 }
 0x3e9   : > { %2825 = vrot.lane.b32.xlu2 %v6414_v39, %s3756_s25  ;;  %2763 = vrot.lane.b32.xlu0 %v2593_v22, %s3752_s21 }
 0x3ea   : > { %v2650_v8 = vpop.permute.xlu1 %2649  ;;  %v2682_v62 = vpop.permute.xlu0 %2681 }
 0x3eb   : > { %v2896_v6 = vsel %vm1222_vm7, %v2866_v21, %v2650_v8  ;;  %v2792_v10 = vpop.permute.xlu2 %2791 }
 0x3ec   : > { %v2928_v45 = vsel %vm1253_vm8, %v2896_v6, %v2682_v62 }
 0x3f0   : > { %2795 = vrot.lane.b32.xlu1 %v6416_v40, %s3750_s19 }
 0x3f1   : > { %2669 = vrot.lane.b32.xlu2 %v2593_v22, %s3751_s20  ;;  %2855 = vrot.lane.b32.xlu0 %v6417_v30, %s3753_s22 }
 0x3f2   : > { %v2714_v2 = vpop.permute.xlu1 %2713  ;;  %v2778_v3 = vpop.permute.xlu0 %2777 }
 0x3f3   : > { %v2960_v31 = vsel %vm1286_vm9, %v2928_v45, %v2714_v2  ;;  %v2652_v55 = vpop.permute.xlu2 %2651 }
 0x3f4   : > { %v2992_v19 = vsel %vm1319_vm10, %v2960_v31, %v2746_v38 }
 0x3f5   : > { %v3024_v4 = vsel %vm1352_vm11, %v2992_v19, %v2778_v3 }
 0x3f8   : > { %2639 = vrot.lane.b32.xlu1 %v5742_v18, %s3754_s23 }
 0x3f9   : > { %2765 = vrot.lane.b32.xlu2 %v6417_v30, %s3752_s21  ;;  %2701 = vrot.lane.b32.xlu0 %v6416_v40, %s3749_s18 }
 0x3fa   : > { %v2808_v56 = vpop.permute.xlu1 %2807  ;;  %v2634_v14 = vpop.permute.xlu0 %2633 }
 0x3fb   : > { %v3055_v12 = vsel %vm1384_vm12, %v3024_v4, %v2808_v56  ;;  %v2716_v17 = vpop.permute.xlu2 %2715  ;;  %v2880_v57 = vsel %vm1191_vm6, %v6418_v16, %v2634_v14 }
 0x3fc   : > { %v3086_v11 = vsel %vm1416_vm13, %v3055_v12, %v2838_v51 }
 0x3fd   : > { %3664 = vmatmul.msk.bf16.gmra.mxu1 %vm1468_vm14, %v3086_v11 }
 0x400   : > { %2733 = vrot.lane.b32.xlu1 %v6414_v39, %s3755_s24 }
 0x402   : > { %v2664_v18 = vpop.permute.xlu1 %2663  ;;  %v2728_v58 = vpop.permute.xlu0 %2727 }
 0x403   : > { %v2910_v22 = vsel %vm1222_vm7, %v2880_v57, %v2664_v18  ;;  %v2810_v61 = vpop.permute.xlu2 %2809 }
 0x404   : > { %v2942_v13 = vsel %vm1253_vm8, %v2910_v22, %v2696_v44 }
 0x405   : > { %v2974_v5 = vsel %vm1286_vm9, %v2942_v13, %v2728_v58 }
 0x40a   : > { %v2760_v9 = vpop.permute.xlu1 %2759  ;;  %v2622_v63 = vpop.permute.xlu0 %2621 }
 0x40b   : > { %v3006_v15 = vsel %vm1319_vm10, %v2974_v5, %v2760_v9  ;;  %v2868_v29 = vsel %vm1191_vm6, %v6419_v25, %v2622_v63  ;;  %v2666_v27 = vpop.permute.xlu2 %2665 }
 0x40c   : > { %v3038_v34 = vsel %vm1352_vm11, %v3006_v15, %v2792_v10  ;;  %v2898_v1 = vsel %vm1222_vm7, %v2868_v29, %v2652_v55 }
 0x412   : > { %v2822_v38 = vpop.permute.xlu1 %2821  ;;  %v2852_v32 = vpop.permute.xlu0 %2851 }
 0x413   : > { %v3069_v54 = vsel %vm1384_vm12, %v3038_v34, %v2822_v38  ;;  %v2762_v52 = vpop.permute.xlu2 %2761 }
 0x414   : > { %v3100_v26 = vsel %vm1416_vm13, %v3069_v54, %v2852_v32 }
 0x415   : > { %3671 = vmatmul.msk.bf16.gmra.mxu3 %vm1468_vm14, %v3100_v26 }
 0x41a   : > { %v2684_v46 = vpop.permute.xlu1 %2683  ;;  %v2748_v24 = vpop.permute.xlu0 %2747 }
 0x41b   : > { %v2930_v7 = vsel %vm1253_vm8, %v2898_v1, %v2684_v46  ;;  %v5874_v59 = vpop.permute.xlu2 %2823 }
 0x41c   : > { %v2962_v60 = vsel %vm1286_vm9, %v2930_v7, %v2716_v17 }
 0x41d   : > { %v2994_v47 = vsel %vm1319_vm10, %v2962_v60, %v2748_v24 }
 0x422   : > { %v2780_v51 = vpop.permute.xlu1 %2779  ;;  %v2840_v0 = vpop.permute.xlu0 %2839 }
 0x423   : > { %v3026_v20 = vsel %vm1352_vm11, %v2994_v47, %v2780_v51  ;;  %v2686_v43 = vpop.permute.xlu2 %2685  ;;  %v5891_v19 = vpop.f32.mrf.mxu1 }
 0x424   : > { %v3057_v33 = vsel %vm1384_vm12, %v3026_v20, %v2810_v61 }
 0x425   : > { %v3088_v37 = vsel %vm1416_vm13, %v3057_v33, %v2840_v0 }
 0x426   : > { %3665 = vmatmul.msk.bf16.gmra.mxu1 %vm1468_vm14, %v3088_v37 }
 0x42a   : > { %v2636_v53 = vpop.permute.xlu1 %2635  ;;  %v2698_v50 = vpop.permute.xlu0 %2697 }
 0x42b   : > { %v2882_v35 = vsel %vm1191_vm6, %v5254_v48, %v2636_v53  ;;  %v2782_v40 = vpop.permute.xlu2 %2781  ;;  %v5897_v58 = vpop.f32.mrf.mxu1 }
 0x42c   : > { %v2912_v44 = vsel %vm1222_vm7, %v2882_v35, %v2666_v27  ;;  %v5928_v53 = vpop.f32.mrf.mxu3 }
 0x42d   : > { %v2944_v39 = vsel %vm1253_vm8, %v2912_v44, %v2698_v50 }
 0x432   : > { %v2730_v41 = vpop.permute.xlu1 %2729  ;;  %v2794_v36 = vpop.permute.xlu0 %2793 }
 0x433   : > { %v2976_v62 = vsel %vm1286_vm9, %v2944_v39, %v2730_v41  ;;  %v2638_v14 = vpop.permute.xlu2 %2637  ;;  %v5905_v61 = vpop.f32.mrf.mxu1 }
 0x434   : > { %v3008_v21 = vsel %vm1319_vm10, %v2976_v62, %v2762_v52  ;;  %v2884_v22 = vsel %vm1191_vm6, %v5291_v49, %v2638_v14  ;;  %v5932_v41 = vpop.f32.mrf.mxu3 }
 0x435   : > { %v3040_v6 = vsel %vm1352_vm11, %v3008_v21, %v2794_v36 }
 0x436   : > { %v3071_v45 = vsel %vm1384_vm12, %v3040_v6, %v5874_v59 }
 0x43a   : > { %v2624_v8 = vpop.permute.xlu1 %2623  ;;  %v2654_v42 = vpop.permute.xlu0 %2653 }
 0x43b   : > { %v2870_v2 = vsel %vm1191_vm6, %v5126_v23, %v2624_v8  ;;  %v2732_v57 = vpop.permute.xlu2 %2731  ;;  %v5913_v29 = vpop.f32.mrf.mxu1 }
 0x43c   : > { %v2900_v3 = vsel %vm1222_vm7, %v2870_v2, %v2654_v42  ;;  %v3250_v2 = vsel %vm1191_vm6, %v5891_v19, 0.0 }
 0x43d   : > { %v2932_v31 = vsel %vm1253_vm8, %v2900_v3, %v2686_v43 }
 0x440   : > { %v5936_v43 = vpop.f32.mrf.mxu3 }
 0x442   : > { %v2854_v10 = vpop.permute.xlu1 %2853 }
 0x443   : > { %v3102_v48 = vsel %vm1416_vm13, %v3071_v45, %v2854_v10  ;;  %v2718_v30 = vpop.permute.xlu0 %2717  ;;  %v2826_v15 = vpop.permute.xlu2 %2825  ;;  %v3251_v45 = vsel %vm1191_vm6, %v5897_v58, 0.0 }
 0x444   : > { %3672 = vmatmul.msk.bf16.gmra.mxu3 %vm1468_vm14, %v3102_v48  ;;  %v2964_v4 = vsel %vm1286_vm9, %v2932_v31, %v2718_v30  ;;  %v5919_v47 = vpop.f32.mrf.mxu1  ;;  %v3321_v48 = vmul.f32 %v5905_v61, %v5905_v61  ;;  %v3253_v31 = vsel %vm1191_vm6, %v5905_v61, 0.0 }
 0x44a   : > { %v2750_v56 = vpop.permute.xlu1 %2749 }
 0x44b   : > { %v2812_v55 = vpop.permute.xlu0 %2811  ;;  %v2996_v12 = vsel %vm1319_vm10, %v2964_v4, %v2750_v56  ;;  %v2670_v27 = vpop.permute.xlu2 %2669  ;;  %v3322_v4 = vmul.f32 %v5913_v29, %v5913_v29  ;;  %v3252_v56 = vadd.f32 %v3251_v45, %v3250_v2 }
 0x44c   : > { %v3028_v11 = vsel %vm1352_vm11, %v2996_v12, %v2782_v40  ;;  %v5930_v50 = vpop.f32.mrf.mxu1  ;;  %v3320_v40 = vmul.f32 %v5897_v58, %v5897_v58  ;;  %v3354_v12 = vsel %vm1191_vm6, %v3321_v48, 0.0 }
 0x44d   : > { %v3059_v18 = vsel %vm1384_vm12, %v3028_v11, %v2812_v55  ;;  %v3255_v11 = vsel %vm1191_vm6, %v5913_v29, 0.0 }
 0x44e   : > { %v3352_v3 = vsel %vm1191_vm6, %v3320_v40, 0.0 }
 0x452   : > { %v2842_v23 = vpop.permute.xlu1 %2841 }
 0x453   : > { %v3090_v17 = vsel %vm1416_vm13, %v3059_v18, %v2842_v23  ;;  %v2668_v16 = vpop.permute.xlu0 %2667  ;;  %v2766_v52 = vpop.permute.xlu2 %2765  ;;  %v3323_v18 = vmul.f32 %v5919_v47, %v5919_v47 }
 0x454   : > { %3666 = vmatmul.msk.bf16.gmra.mxu1 %vm1468_vm14, %v3090_v17  ;;  %v2914_v9 = vsel %vm1222_vm7, %v2884_v22, %v2668_v16  ;;  %v5934_v35 = vpop.f32.mrf.mxu1  ;;  %v3254_v17 = vadd.f32 %v3253_v31, %v3252_v56  ;;  %v3356_v16 = vsel %vm1191_vm6, %v3322_v4, 0.0  ;;  %v3324_v22 = vmul.f32 %v5930_v50, %v5930_v50 }
 0x45a   : > { %v2700_v63 = vpop.permute.xlu1 %2699 }
 0x45b   : > { %v2946_v13 = vsel %vm1253_vm8, %v2914_v9, %v2700_v63  ;;  %v2764_v5 = vpop.permute.xlu0 %2763  ;;  %v3256_v63 = vadd.f32 %v3255_v11, %v3254_v17 }
 0x45c   : > { %v2978_v38 = vsel %vm1286_vm9, %v2946_v13, %v2732_v57  ;;  %v5938_v44 = vpop.f32.mrf.mxu1  ;;  %v3257_v57 = vsel %vm1191_vm6, %v5919_v47, 0.0  ;;  %v3358_v13 = vsel %vm1191_vm6, %v3323_v18, 0.0 }
 0x45d   : > { %v3010_v34 = vsel %vm1319_vm10, %v2978_v38, %v2764_v5  ;;  %v3259_v5 = vsel %vm1191_vm6, %v5930_v50, 0.0 }
 0x462   : > { %v2796_v32 = vpop.permute.xlu1 %2795 }
 0x463   : > { %v3042_v54 = vsel %vm1352_vm11, %v3010_v34, %v2796_v32  ;;  %v2856_v26 = vpop.permute.xlu0 %2855  ;;  %v3258_v34 = vadd.f32 %v3257_v57, %v3256_v63 }
 0x464   : > { %v3073_v25 = vsel %vm1384_vm12, %v3042_v54, %v2826_v15  ;;  %v5942_v39 = vpop.f32.mrf.mxu1  ;;  %v3325_v15 = vmul.f32 %v5934_v35, %v5934_v35  ;;  %v3360_v54 = vsel %vm1191_vm6, %v3324_v22, 0.0 }
 0x465   : > { %v3104_v49 = vsel %vm1416_vm13, %v3073_v25, %v2856_v26  ;;  %v3261_v26 = vsel %vm1191_vm6, %v5934_v35, 0.0  ;;  %v3326_v25 = vmul.f32 %v5938_v44, %v5938_v44 }
 0x466   : > { %3673 = vmatmul.msk.bf16.gmra.mxu3 %vm1468_vm14, %v3104_v49 }
 0x46a   : > { %v2640_v46 = vpop.permute.xlu1 %2639 }
 0x46b   : > { %v2886_v24 = vsel %vm1191_vm6, %v5132_v28, %v2640_v46  ;;  %v2702_v1 = vpop.permute.xlu0 %2701  ;;  %v3362_v46 = vsel %vm1191_vm6, %v3325_v15, 0.0 }
 0x46c   : > { %v2916_v7 = vsel %vm1222_vm7, %v2886_v24, %v2670_v27  ;;  %v5946_v8 = vpop.f32.mrf.mxu1  ;;  %v3260_v27 = vadd.f32 %v3259_v5, %v3258_v34  ;;  %v3263_v24 = vsel %vm1191_vm6, %v5938_v44, 0.0 }
 0x46d   : > { %v2948_v60 = vsel %vm1253_vm8, %v2916_v7, %v2702_v1  ;;  %v3327_v1 = vmul.f32 %v5942_v39, %v5942_v39  ;;  %v3267_v40 = vsel %vm1191_vm6, %v5946_v8, 0.0 }
 0x472   : > { %v2734_v51 = vpop.permute.xlu1 %2733 }
 0x473   : > { %v2980_v20 = vsel %vm1286_vm9, %v2948_v60, %v2734_v51  ;;  %v3262_v60 = vadd.f32 %v3261_v26, %v3260_v27 }
 0x474   : > { %v3012_v0 = vsel %vm1319_vm10, %v2980_v20, %v2766_v52  ;;  %v3364_v52 = vsel %vm1191_vm6, %v3326_v25, 0.0  ;;  %v3265_v20 = vsel %vm1191_vm6, %v5942_v39, 0.0 }
 0x475   : > { %v3043_v33 = vsel %vm1352_vm11, %v3012_v0, %v2794_v36  ;;  %v5940_v36 = vpop.f32.mrf.mxu3  ;;  %v3328_v0 = vmul.f32 %v5946_v8, %v5946_v8 }
 0x476   : > { %v3074_v37 = vsel %vm1384_vm12, %v3043_v33, %v5874_v59 }
 0x477   : > { %v3105_v28 = vsel %vm1416_vm13, %v3074_v37, %v2854_v10  ;;  %v3319_v10 = vmul.f32 %v5891_v19, %v5891_v19  ;;  %v3264_v37 = vadd.f32 %v3263_v24, %v3262_v60  ;;  %v3368_v2 = vsel %vm1191_vm6, %v3328_v0, 0.0 }
 0x478   : > { %3674 = vmatmul.msk.bf16.gmra.mxu3 %vm1468_vm14, %v3105_v28  ;;  %v3366_v28 = vsel %vm1191_vm6, %v3327_v1, 0.0 }
 0x479   : > { %v3351_v55 = vsel %vm1191_vm6, %v3319_v10, 0.0  ;;  %v3266_v48 = vadd.f32 %v3265_v20, %v3264_v37 }
 0x47a   : > { %v5950_v42 = vpop.f32.mrf.mxu1  ;;  %v3353_v23 = vadd.f32 %v3352_v3, %v3351_v55 }
 0x47b   : > { %v3329_v10 = vmul.f32 %v5950_v42, %v5950_v42  ;;  %v3269_v3 = vsel %vm1191_vm6, %v5950_v42, 0.0  ;;  %v3268_v56 = vadd.f32 %v3267_v40, %v3266_v48  ;;  %v3336_v40 = vmul.f32 %v5932_v41, %v5932_v41 }
 0x47c   : > { %v3355_v9 = vadd.f32 %v3354_v12, %v3353_v23 }
 0x47d   : > { %v5944_v59 = vpop.f32.mrf.mxu3  ;;  %v3370_v12 = vsel %vm1191_vm6, %v3329_v10, 0.0  ;;  %v3270_v17 = vadd.f32 %v3269_v3, %v3268_v56  ;;  %v3283_v3 = vsel %vm1191_vm6, %v5932_v41, 0.0 }
 0x47e   : > { %v3357_v38 = vadd.f32 %v3356_v16, %v3355_v9 }
 0x480   : > { %v3359_v49 = vadd.f32 %v3358_v13, %v3357_v38 }
 0x482   : > { %v5954_v6 = vpop.f32.mrf.mxu1  ;;  %v3361_v7 = vadd.f32 %v3360_v54, %v3359_v49 }
 0x483   : > { %v3330_v31 = vmul.f32 %v5954_v6, %v5954_v6  ;;  %v3271_v11 = vsel %vm1191_vm6, %v5954_v6, 0.0 }
 0x484   : > { %v3363_v33 = vadd.f32 %v3362_v46, %v3361_v7  ;;  %v3272_v13 = vadd.f32 %v3271_v11, %v3270_v17  ;;  %v3285_v11 = vsel %vm1191_vm6, %v5936_v43, 0.0 }
 0x485   : > { %v5948_v62 = vpop.f32.mrf.mxu3  ;;  %v3372_v57 = vsel %vm1191_vm6, %v3330_v31, 0.0  ;;  %v3337_v31 = vmul.f32 %v5936_v43, %v5936_v43 }
 0x486   : > { %v3365_v45 = vadd.f32 %v3364_v52, %v3363_v33  ;;  %v3335_v52 = vmul.f32 %v5928_v53, %v5928_v53 }
 0x488   : > { %v3367_v4 = vadd.f32 %v3366_v28, %v3365_v45  ;;  %v3281_v28 = vsel %vm1191_vm6, %v5928_v53, 0.0 }
 0x48a   : > { %v3369_v23 = vadd.f32 %v3368_v2, %v3367_v4  ;;  %v3382_v2 = vsel %vm1191_vm6, %v3335_v52, 0.0 }
 0x48c   : > { %v3371_v63 = vadd.f32 %v3370_v12, %v3369_v23  ;;  %v3384_v12 = vsel %vm1191_vm6, %v3336_v40, 0.0 }
 0x48d   : > { %v5952_v21 = vpop.f32.mrf.mxu3 }
 0x48e   : > { %v3373_v34 = vadd.f32 %v3372_v57, %v3371_v63  ;;  %v3339_v63 = vmul.f32 %v5944_v59, %v5944_v59  ;;  %v3293_v52 = vsel %vm1191_vm6, %v5952_v21, 0.0 }
 0x495   : > { %v5964_v30 = vpop.f32.mrf.mxu3 }
 0x496   : > { %v3295_v40 = vsel %vm1191_vm6, %v5964_v30, 0.0 }
 0x49d   : > { %v5991_v32 = vpop.f32.mrf.mxu3 }
 0x4a3   : > { %v5973_v14 = vpop.f32.mrf.mxu1 }
 0x4a4   : > { %v3331_v18 = vmul.f32 %v5973_v14, %v5973_v14  ;;  %v3273_v22 = vsel %vm1191_vm6, %v5973_v14, 0.0 }
 0x4a5   : > { %v6020_v55 = vpop.f32.mrf.mxu3  ;;  %v3274_v54 = vadd.f32 %v3273_v22, %v3272_v13  ;;  %v3386_v22 = vsel %vm1191_vm6, %v3337_v31, 0.0 }
 0x4a6   : > { %v3374_v5 = vsel %vm1191_vm6, %v3331_v18, 0.0  ;;  %v3338_v18 = vmul.f32 %v5940_v36, %v5940_v36 }
 0x4a7   : > { %v3375_v49 = vadd.f32 %v3374_v5, %v3373_v34  ;;  %v3340_v34 = vmul.f32 %v5948_v62, %v5948_v62 }
 0x4ab   : > { %v6003_v51 = vpop.f32.mrf.mxu1 }
 0x4ac   : > { %v3332_v9 = vmul.f32 %v6003_v51, %v6003_v51  ;;  %v3275_v15 = vsel %vm1191_vm6, %v6003_v51, 0.0 }
 0x4ad   : > { %v3276_v27 = vadd.f32 %v3275_v15, %v3274_v54  ;;  %v3388_v15 = vsel %vm1191_vm6, %v3338_v18, 0.0  ;;  %v3299_v18 = vsel %vm1191_vm6, %v6020_v55, 0.0 }
 0x4ae   : > { %v3376_v26 = vsel %vm1191_vm6, %v3332_v9, 0.0  ;;  %v3287_v9 = vsel %vm1191_vm6, %v5940_v36, 0.0 }
 0x4af   : > { %v3377_v1 = vadd.f32 %v3376_v26, %v3375_v49  ;;  %v3291_v49 = vsel %vm1191_vm6, %v5948_v62, 0.0 }
 0x4c7   : > { %v6042_v46 = vpop.f32.mrf.mxu3 }
 0x4cf   : > { %v6068_v23 = vpop.f32.mrf.mxu3 }
 0x4d1   : > { %v6027_v16 = vpop.f32.mrf.mxu1 }
 0x4d2   : > { %v3333_v38 = vmul.f32 %v6027_v16, %v6027_v16  ;;  %v3277_v25 = vsel %vm1191_vm6, %v6027_v16, 0.0 }
 0x4d3   : > { %v3278_v7 = vadd.f32 %v3277_v25, %v3276_v27  ;;  %v3390_v25 = vsel %vm1191_vm6, %v3339_v63, 0.0  ;;  %v3341_v27 = vmul.f32 %v5952_v21, %v5952_v21 }
 0x4d4   : > { %v3378_v24 = vsel %vm1191_vm6, %v3333_v38, 0.0  ;;  %v3289_v38 = vsel %vm1191_vm6, %v5944_v59, 0.0 }
 0x4d5   : > { %v3379_v33 = vadd.f32 %v3378_v24, %v3377_v1 }
 0x4d9   : > { %v6045_v60 = vpop.f32.mrf.mxu1 }
 0x4da   : > { %v3279_v20 = vsel %vm1191_vm6, %v6045_v60, 0.0  ;;  %v3334_v0 = vmul.f32 %v6045_v60, %v6045_v60 }
 0x4db   : > { %v3280_v37 = vadd.f32 %v3279_v20, %v3278_v7  ;;  %v3392_v7 = vsel %vm1191_vm6, %v3340_v34, 0.0  ;;  %v3342_v20 = vmul.f32 %v5964_v30, %v5964_v30 }
 0x4dc   : > { %v3380_v10 = vsel %vm1191_vm6, %v3334_v0, 0.0 }
 0x4dd   : > { %v3282_v45 = vadd.f32 %v3281_v28, %v3280_v37  ;;  %v3381_v48 = vadd.f32 %v3380_v10, %v3379_v33  ;;  %v3394_v28 = vsel %vm1191_vm6, %v3341_v27, 0.0  ;;  %v3343_v10 = vmul.f32 %v5991_v32, %v5991_v32 }
 0x4df   : > { %v3284_v4 = vadd.f32 %v3283_v3, %v3282_v45  ;;  %v3383_v56 = vadd.f32 %v3382_v2, %v3381_v48  ;;  %v3396_v2 = vsel %vm1191_vm6, %v3342_v20, 0.0  ;;  %v3297_v3 = vsel %vm1191_vm6, %v5991_v32, 0.0 }
 0x4e1   : > { %v3286_v17 = vadd.f32 %v3285_v11, %v3284_v4  ;;  %v3385_v57 = vadd.f32 %v3384_v12, %v3383_v56  ;;  %v3398_v56 = vsel %vm1191_vm6, %v3343_v10, 0.0  ;;  %v3344_v12 = vmul.f32 %v6020_v55, %v6020_v55 }
 0x4e3   : > { %v3288_v13 = vadd.f32 %v3287_v9, %v3286_v17  ;;  %v3387_v5 = vadd.f32 %v3386_v22, %v3385_v57  ;;  %v3400_v22 = vsel %vm1191_vm6, %v3344_v12, 0.0  ;;  %v3345_v9 = vmul.f32 %v6042_v46, %v6042_v46 }
 0x4e5   : > { %v3290_v54 = vadd.f32 %v3289_v38, %v3288_v13  ;;  %v3389_v26 = vadd.f32 %v3388_v15, %v3387_v5  ;;  %v3301_v13 = vsel %vm1191_vm6, %v6042_v46, 0.0  ;;  %v3402_v15 = vsel %vm1191_vm6, %v3345_v9, 0.0 }
 0x4e6   : > { %v3346_v38 = vmul.f32 %v6068_v23, %v6068_v23 }
 0x4e7   : > { %v3292_v24 = vadd.f32 %v3291_v49, %v3290_v54  ;;  %v3391_v1 = vadd.f32 %v3390_v25, %v3389_v26  ;;  %v3303_v54 = vsel %vm1191_vm6, %v6068_v23, 0.0 }
 0x4e8   : > { %v3404_v25 = vsel %vm1191_vm6, %v3346_v38, 0.0 }
 0x4e9   : > { %v3393_v0 = vadd.f32 %v3392_v7, %v3391_v1  ;;  %v6090_v33 = vpop.f32.mrf.mxu3  ;;  %v3294_v37 = vadd.f32 %v3293_v52, %v3292_v24 }
 0x4ea   : > { %v3347_v49 = vmul.f32 %v6090_v33, %v6090_v33  ;;  %v3305_v1 = vsel %vm1191_vm6, %v6090_v33, 0.0 }
 0x4eb   : > { %v3296_v45 = vadd.f32 %v3295_v40, %v3294_v37  ;;  %v3395_v48 = vadd.f32 %v3394_v28, %v3393_v0 }
 0x4ec   : > { %v3406_v20 = vsel %vm1191_vm6, %v3347_v49, 0.0 }
 0x4ed   : > { %v3298_v31 = vadd.f32 %v3297_v3, %v3296_v45  ;;  %v3397_v4 = vadd.f32 %v3396_v2, %v3395_v48 }
 0x4ef   : > { %v3399_v11 = vadd.f32 %v3398_v56, %v3397_v4  ;;  %v3300_v17 = vadd.f32 %v3299_v18, %v3298_v31 }
 0x4f1   : > { %v6105_v57 = vpop.f32.mrf.mxu3  ;;  %v3401_v63 = vadd.f32 %v3400_v22, %v3399_v11  ;;  %v3302_v5 = vadd.f32 %v3301_v13, %v3300_v17 }
 0x4f2   : > { %v3348_v7 = vmul.f32 %v6105_v57, %v6105_v57  ;;  %v3307_v0 = vsel %vm1191_vm6, %v6105_v57, 0.0 }
 0x4f3   : > { %v3403_v34 = vadd.f32 %v3402_v15, %v3401_v63  ;;  %v3304_v26 = vadd.f32 %v3303_v54, %v3302_v5 }
 0x4f4   : > { %v3408_v40 = vsel %vm1191_vm6, %v3348_v7, 0.0 }
 0x4f5   : > { %v3405_v27 = vadd.f32 %v3404_v25, %v3403_v34  ;;  %v3306_v52 = vadd.f32 %v3305_v1, %v3304_v26 }
 0x4f7   : > { %v3407_v28 = vadd.f32 %v3406_v20, %v3405_v27  ;;  %v3308_v45 = vadd.f32 %v3307_v0, %v3306_v52 }
 0x4f9   : > { %v3409_v2 = vadd.f32 %v3408_v40, %v3407_v28 }
 0x4fb   : > { %v6120_v24 = vpop.f32.mrf.mxu3 }
 0x4fc   : > { %v3349_v37 = vmul.f32 %v6120_v24, %v6120_v24  ;;  %v3309_v10 = vsel %vm1191_vm6, %v6120_v24, 0.0 }
 0x4fd   : > { %v3310_v3 = vadd.f32 %v3309_v10, %v3308_v45 }
 0x4fe   : > { %v3410_v48 = vsel %vm1191_vm6, %v3349_v37, 0.0 }
 0x4ff   : > { %v3411_v12 = vadd.f32 %v3410_v48, %v3409_v2 }
 0x503   : > { %v6135_v31 = vpop.f32.mrf.mxu3 }
 0x504   : > { %v3311_v4 = vsel %vm1191_vm6, %v6135_v31, 0.0  ;;  %v3350_v56 = vmul.f32 %v6135_v31, %v6135_v31 }
 0x505   : > { %v3312_v11 = vadd.f32 %v3311_v4, %v3310_v3 }
 0x506   : > { %v3412_v18 = vsel %vm1191_vm6, %v3350_v56, 0.0 }
 0x507   : > { %v3313_v17 = vrot.slane %v3312_v11, 4  ;;  %v3413_v22 = vadd.f32 %v3412_v18, %v3411_v12 }
 0x509   : > { %v3314_v9 = vadd.f32 %v3313_v17, %v3312_v11  ;;  %v3414_v63 = vrot.slane %v3413_v22, 4 }
 0x50b   : > { %v3315_v13 = vrot.slane %v3314_v9, 2  ;;  %v3415_v5 = vadd.f32 %v3414_v63, %v3413_v22 }
 0x50d   : > { %v3316_v15 = vadd.f32 %v3315_v13, %v3314_v9  ;;  %v3416_v38 = vrot.slane %v3415_v5, 2  ;;  %v3709_v9 = vld [vmem:[%s3793_s17] sm:$0xff]  ;;  %v3710_v13 = vld [vmem:[%s3793_s17 + $0x8] sm:$0xff] }
 0x50f   : > { %v3317_v34 = vrot.slane %v3316_v15, 1  ;;  %v3417_v54 = vadd.f32 %v3416_v38, %v3415_v5 }
 0x511   : > { %v3318_v26 = vadd.f32 %v3317_v34, %v3316_v15  ;;  %v3418_v25 = vrot.slane %v3417_v54, 1  ;;  %v3711_v15 = vld [vmem:[%s3793_s17 + $0x10] sm:$0xff] }
 0x513   : > { %v3419_v49 = vadd.f32 %v3418_v25, %v3417_v54  ;;  %v6142_v27 = vmul.f32 0.00390625, %v3318_v26 }
 0x515   : > { %v3421_v1 = vmul.f32 0.00390625, %v3419_v49  ;;  %v3422_v7 = vmul.f32 %v6142_v27, %v6142_v27  ;;  %v3424_v2 = vsub.f32 %v5891_v19, %v6142_v27  ;;  %v3425_v3 = vsub.f32 %v5897_v58, %v6142_v27  ;;  %v3713_v49 = vld [vmem:[%s3793_s17 + $0x20] sm:$0xff] }
 0x516   : > { %v3426_v4 = vsub.f32 %v5905_v61, %v6142_v27  ;;  %v3427_v56 = vsub.f32 %v5913_v29, %v6142_v27  ;;  %v3428_v12 = vsub.f32 %v5919_v47, %v6142_v27  ;;  %v3429_v58 = vsub.f32 %v5930_v50, %v6142_v27 }
 0x517   : > { %v3423_v52 = vsub.f32 %v3421_v1, %v3422_v7  ;;  %v3430_v61 = vsub.f32 %v5934_v35, %v6142_v27  ;;  %v3431_v47 = vsub.f32 %v5938_v44, %v6142_v27  ;;  %v3432_v50 = vsub.f32 %v5942_v39, %v6142_v27  ;;  %v3712_v39 = vld [vmem:[%s3793_s17 + $0x18] sm:$0xff] }
 0x518   : > { %v3433_v44 = vsub.f32 %v5946_v8, %v6142_v27  ;;  %v3434_v26 = vsub.f32 %v5950_v42, %v6142_v27  ;;  %v3435_v8 = vsub.f32 %v5954_v6, %v6142_v27  ;;  %v3436_v42 = vsub.f32 %v5973_v14, %v6142_v27 }
 0x519   : > { %v3456_v20 = vadd.f32 1e-05, %v3423_v52  ;;  %v3714_v52 = vld [vmem:[%s3793_s17 + $0x28] sm:$0xff]  ;;  %v3437_v6 = vsub.f32 %v6003_v51, %v6142_v27  ;;  %v3438_v14 = vsub.f32 %v6027_v16, %v6142_v27  ;;  %v3439_v51 = vsub.f32 %v6045_v60, %v6142_v27 }
 0x51a   : > { %v3440_v16 = vsub.f32 %v5928_v53, %v6142_v27  ;;  %v3441_v60 = vsub.f32 %v5932_v41, %v6142_v27  ;;  %v3442_v53 = vsub.f32 %v5936_v43, %v6142_v27  ;;  %v3443_v41 = vsub.f32 %v5940_v36, %v6142_v27 }
 0x51b   : > { %3707 = vrsqrt.f32 %v3456_v20  ;;  %vm3463_vm3 = vweird.f32 %v3456_v20  ;;  %v3444_v43 = vsub.f32 %v5944_v59, %v6142_v27  ;;  %v3445_v36 = vsub.f32 %v5948_v62, %v6142_v27 }
 0x51c   : > { %v3446_v59 = vsub.f32 %v5952_v21, %v6142_v27  ;;  %v3447_v62 = vsub.f32 %v5964_v30, %v6142_v27  ;;  %v3448_v21 = vsub.f32 %v5991_v32, %v6142_v27  ;;  %v3449_v30 = vsub.f32 %v6020_v55, %v6142_v27 }
 0x51d   : > { %v3450_v32 = vsub.f32 %v6042_v46, %v6142_v27  ;;  %v3451_v55 = vsub.f32 %v6068_v23, %v6142_v27  ;;  %v3452_v46 = vsub.f32 %v6090_v33, %v6142_v27  ;;  %v3453_v23 = vsub.f32 %v6105_v57, %v6142_v27 }
 0x51e   : > { %v3454_v33 = vsub.f32 %v6120_v24, %v6142_v27  ;;  %v3455_v57 = vsub.f32 %v6135_v31, %v6142_v27  ;;  %v3736_v27 = vld [vmem:[%s3793_s17 + $0xd8] sm:$0xff] }
 0x521   : > { %v3708_v0 = vpop.eup %3707 }
 0x522   : > { %v3458_v37 = vmul.f32 %v3708_v0, %v3456_v20  ;;  %vm3464_vm2 = vweird.f32 %v3708_v0 }
 0x523   : > { %vm3465_vm4 = vmor %vm3463_vm3, %vm3464_vm2 }
 0x524   : > { %v3459_v28 = vmul.f32 %v3708_v0, %v3458_v37  ;;  %v3715_v37 = vld [vmem:[%s3793_s17 + $0x30] sm:$0xff] }
 0x526   : > { %v3460_v40 = vmul.f32 0.5, %v3459_v28 }
 0x528   : > { %v3461_v10 = vsub.f32 1.5, %v3460_v40 }
 0x52a   : > { %v3462_v45 = vmul.f32 %v3708_v0, %v3461_v10  ;;  %v3716_v10 = vld [vmem:[%s3793_s17 + $0x38] sm:$0xff] }
 0x52c   : > { %v6146_v48 = vsel %vm3465_vm4, %v3708_v0, %v3462_v45 }
 0x52d   : > { %v3467_v11 = vmul.f32 %v6146_v48, %v3424_v2  ;;  %v3468_v18 = vmul.f32 %v6146_v48, %v3425_v3  ;;  %v3469_v19 = vmul.f32 %v6146_v48, %v3426_v4  ;;  %v3470_v17 = vmul.f32 %v6146_v48, %v3427_v56  ;;  %v3717_v3 = vld [vmem:[%s3793_s17 + $0x40] sm:$0xff] }
 0x52e   : > { %v3471_v29 = vmul.f32 %v6146_v48, %v3428_v12  ;;  %v3472_v22 = vmul.f32 %v6146_v48, %v3429_v58  ;;  %v3473_v35 = vmul.f32 %v6146_v48, %v3430_v61  ;;  %v3474_v34 = vmul.f32 %v6146_v48, %v3431_v47  ;;  %v3718_v12 = vld [vmem:[%s3793_s17 + $0x48] sm:$0xff]  ;;  %v3720_v61 = vld [vmem:[%s3793_s17 + $0x58] sm:$0xff] }
 0x52f   : > { %v3499_v63 = vadd.f32 %v3709_v9, %v3467_v11  ;;  %v3500_v5 = vadd.f32 %v3710_v13, %v3468_v18  ;;  %v3501_v38 = vadd.f32 %v3711_v15, %v3469_v19  ;;  %v3502_v54 = vadd.f32 %v3712_v39, %v3470_v17  ;;  %v3719_v19 = vld [vmem:[%s3793_s17 + $0x50] sm:$0xff]  ;;  %v3722_v9 = vld [vmem:[%s3793_s17 + $0x68] sm:$0xff] }
 0x530   : > { %v3475_v25 = vmul.f32 %v6146_v48, %v3432_v50  ;;  %v3503_v1 = vadd.f32 %v3713_v49, %v3471_v29  ;;  %v3476_v7 = vmul.f32 %v6146_v48, %v3433_v44  ;;  %v3504_v20 = vadd.f32 %v3714_v52, %v3472_v22  ;;  %v3721_v50 = vld [vmem:[%s3793_s17 + $0x60] sm:$0xff]  ;;  %v3724_v44 = vld [vmem:[%s3793_s17 + $0x78] sm:$0xff]  ;;  %v3726_v49 = vld [vmem:[%s3793_s17 + $0x88] sm:$0xff] }
 0x531   : > { %3531 = vst.msk [vmem:[%s6172_s16] sm:$0xff] %vm1191_vm6, %v3499_v63  ;;  %v3477_v0 = vmul.f32 %v6146_v48, %v3434_v26  ;;  %v3505_v28 = vadd.f32 %v3715_v37, %v3473_v35  ;;  %v3478_v40 = vmul.f32 %v6146_v48, %v3435_v8  ;;  %v3506_v45 = vadd.f32 %v3716_v10, %v3474_v34  ;;  %v3730_v10 = vld [vmem:[%s3793_s17 + $0xa8] sm:$0xff] }
 0x532   : > { %3532 = vst.msk [vmem:[%s6172_s16 + $0x8] sm:$0xff] %vm1191_vm6, %v3500_v5  ;;  %v3479_v2 = vmul.f32 %v6146_v48, %v3436_v42  ;;  %v3507_v4 = vadd.f32 %v3717_v3, %v3475_v25  ;;  %v3480_v56 = vmul.f32 %v6146_v48, %v3437_v6  ;;  %v3508_v11 = vadd.f32 %v3718_v12, %v3476_v7  ;;  %v3723_v5 = vld [vmem:[%s3793_s17 + $0x70] sm:$0xff]  ;;  %v3728_v42 = vld [vmem:[%s3793_s17 + $0x98] sm:$0xff] }
 0x533   : > { %3533 = vst.msk [vmem:[%s6172_s16 + $0x10] sm:$0xff] %vm1191_vm6, %v3501_v38  ;;  %v3481_v18 = vmul.f32 %v6146_v48, %v3438_v14  ;;  %v3509_v58 = vadd.f32 %v3719_v19, %v3477_v0  ;;  %v3482_v17 = vmul.f32 %v6146_v48, %v3439_v51  ;;  %v3510_v29 = vadd.f32 %v3720_v61, %v3478_v40  ;;  %v3727_v7 = vld [vmem:[%s3793_s17 + $0x90] sm:$0xff]  ;;  %v3732_v51 = vld [vmem:[%s3793_s17 + $0xb8] sm:$0xff]  ;;  %v3734_v19 = vld [vmem:[%s3793_s17 + $0xc8] sm:$0xff] }
 0x534   : > { %3534 = vst.msk [vmem:[%s6172_s16 + $0x18] sm:$0xff] %vm1191_vm6, %v3502_v54  ;;  %v3483_v47 = vmul.f32 %v6146_v48, %v3440_v16  ;;  %v3511_v22 = vadd.f32 %v3721_v50, %v3479_v2  ;;  %v3484_v35 = vmul.f32 %v6146_v48, %v3441_v60  ;;  %v3512_v63 = vadd.f32 %v3722_v9, %v3480_v56  ;;  %v3725_v54 = vld [vmem:[%s3793_s17 + $0x80] sm:$0xff]  ;;  %v3731_v2 = vld [vmem:[%s3793_s17 + $0xb0] sm:$0xff] }
 0x535   : > { %3535 = vst.msk [vmem:[%s6172_s16 + $0x20] sm:$0xff] %vm1191_vm6, %v3503_v1  ;;  %v3485_v13 = vmul.f32 %v6146_v48, %v3442_v53  ;;  %v3513_v15 = vadd.f32 %v3723_v5, %v3481_v18  ;;  %v3486_v38 = vmul.f32 %v6146_v48, %v3443_v41  ;;  %v3514_v34 = vadd.f32 %v3724_v44, %v3482_v17  ;;  %v3735_v60 = vld [vmem:[%s3793_s17 + $0xd0] sm:$0xff] }
 0x536   : > { %3536 = vst.msk [vmem:[%s6172_s16 + $0x28] sm:$0xff] %vm1191_vm6, %v3504_v20  ;;  %v3487_v39 = vmul.f32 %v6146_v48, %v3444_v43  ;;  %v3515_v26 = vadd.f32 %v3725_v54, %v3483_v47  ;;  %v3488_v25 = vmul.f32 %v6146_v48, %v3445_v36  ;;  %v3516_v1 = vadd.f32 %v3726_v49, %v3484_v35  ;;  %v3738_v47 = vld [vmem:[%s3793_s17 + $0xe8] sm:$0xff] }
 0x537   : > { %3537 = vst.msk [vmem:[%s6172_s16 + $0x30] sm:$0xff] %vm1191_vm6, %v3505_v28  ;;  %v3489_v8 = vmul.f32 %v6146_v48, %v3446_v59  ;;  %v3517_v52 = vadd.f32 %v3727_v7, %v3485_v13  ;;  %v3490_v20 = vmul.f32 %v6146_v48, %v3447_v62  ;;  %v3518_v0 = vadd.f32 %v3728_v42, %v3486_v38  ;;  %v3729_v28 = vld [vmem:[%s3793_s17 + $0xa0] sm:$0xff] }
 0x538   : > { %3538 = vst.msk [vmem:[%s6172_s16 + $0x38] sm:$0xff] %vm1191_vm6, %v3506_v45  ;;  %v3491_v37 = vmul.f32 %v6146_v48, %v3448_v21  ;;  %v3519_v6 = vadd.f32 %v3729_v28, %v3487_v39  ;;  %v3492_v40 = vmul.f32 %v6146_v48, %v3449_v30  ;;  %v3520_v45 = vadd.f32 %v3730_v10, %v3488_v25 }
 0x539   : > { %3539 = vst.msk [vmem:[%s6172_s16 + $0x40] sm:$0xff] %vm1191_vm6, %v3507_v4  ;;  %v3493_v14 = vmul.f32 %v6146_v48, %v3450_v32  ;;  %v3521_v3 = vadd.f32 %v3731_v2, %v3489_v8  ;;  %v3494_v4 = vmul.f32 %v6146_v48, %v3451_v55  ;;  %v3522_v56 = vadd.f32 %v3732_v51, %v3490_v20 }
 0x53a   : > { %3540 = vst.msk [vmem:[%s6172_s16 + $0x48] sm:$0xff] %vm1191_vm6, %v3508_v11  ;;  %v3495_v12 = vmul.f32 %v6146_v48, %v3452_v46  ;;  %v3733_v11 = vld [vmem:[%s3793_s17 + $0xc0] sm:$0xff]  ;;  %v3496_v18 = vmul.f32 %v6146_v48, %v3453_v23  ;;  %v3497_v24 = vmul.f32 %v6146_v48, %v3454_v33  ;;  %v3498_v31 = vmul.f32 %v6146_v48, %v3455_v57  ;;  %v3740_v48 = vld [vmem:[%s3793_s17 + $0xf8] sm:$0xff] }
 0x53b   : > { %3541 = vst.msk [vmem:[%s6172_s16 + $0x50] sm:$0xff] %vm1191_vm6, %v3509_v58  ;;  %v3523_v16 = vadd.f32 %v3733_v11, %v3491_v37  ;;  %v3524_v58 = vadd.f32 %v3734_v19, %v3492_v40  ;;  %v3525_v17 = vadd.f32 %v3735_v60, %v3493_v14  ;;  %v3526_v61 = vadd.f32 %v3736_v27, %v3494_v4 }
 0x53c   : > { %3542 = vst.msk [vmem:[%s6172_s16 + $0x58] sm:$0xff] %vm1191_vm6, %v3510_v29  ;;  %v3737_v29 = vld [vmem:[%s3793_s17 + $0xe0] sm:$0xff]  ;;  %v3528_v50 = vadd.f32 %v3738_v47, %v3496_v18  ;;  %v3530_v35 = vadd.f32 %v3740_v48, %v3498_v31 }
 0x53d   : > { %3543 = vst.msk [vmem:[%s6172_s16 + $0x60] sm:$0xff] %vm1191_vm6, %v3511_v22  ;;  %v3527_v53 = vadd.f32 %v3737_v29, %v3495_v12  ;;  %v3739_v22 = vld [vmem:[%s3793_s17 + $0xf0] sm:$0xff] }
 0x53e   : > { %3544 = vst.msk [vmem:[%s6172_s16 + $0x68] sm:$0xff] %vm1191_vm6, %v3512_v63  ;;  %v3529_v41 = vadd.f32 %v3739_v22, %v3497_v24 }
 0x53f   : > { %3545 = vst.msk [vmem:[%s6172_s16 + $0x70] sm:$0xff] %vm1191_vm6, %v3513_v15 }
 0x540   : > { %3546 = vst.msk [vmem:[%s6172_s16 + $0x78] sm:$0xff] %vm1191_vm6, %v3514_v34 }
 0x541   : > { %3547 = vst.msk [vmem:[%s6172_s16 + $0x80] sm:$0xff] %vm1191_vm6, %v3515_v26 }
 0x542   : > { %3548 = vst.msk [vmem:[%s6172_s16 + $0x88] sm:$0xff] %vm1191_vm6, %v3516_v1 }
 0x543   : > { %3549 = vst.msk [vmem:[%s6172_s16 + $0x90] sm:$0xff] %vm1191_vm6, %v3517_v52 }
 0x544   : > { %3550 = vst.msk [vmem:[%s6172_s16 + $0x98] sm:$0xff] %vm1191_vm6, %v3518_v0 }
 0x545   : > { %3551 = vst.msk [vmem:[%s6172_s16 + $0xa0] sm:$0xff] %vm1191_vm6, %v3519_v6 }
 0x546   : > { %3552 = vst.msk [vmem:[%s6172_s16 + $0xa8] sm:$0xff] %vm1191_vm6, %v3520_v45 }
 0x547   : > { %3553 = vst.msk [vmem:[%s6172_s16 + $0xb0] sm:$0xff] %vm1191_vm6, %v3521_v3 }
 0x548   : > { %3554 = vst.msk [vmem:[%s6172_s16 + $0xb8] sm:$0xff] %vm1191_vm6, %v3522_v56 }
 0x549   : > { %3555 = vst.msk [vmem:[%s6172_s16 + $0xc0] sm:$0xff] %vm1191_vm6, %v3523_v16 }
 0x54a   : > { %3556 = vst.msk [vmem:[%s6172_s16 + $0xc8] sm:$0xff] %vm1191_vm6, %v3524_v58 }
 0x54b   : > { %3557 = vst.msk [vmem:[%s6172_s16 + $0xd0] sm:$0xff] %vm1191_vm6, %v3525_v17 }
 0x54c   : > { %3558 = vst.msk [vmem:[%s6172_s16 + $0xd8] sm:$0xff] %vm1191_vm6, %v3526_v61 }
 0x54d   : > { %3559 = vst.msk [vmem:[%s6172_s16 + $0xe0] sm:$0xff] %vm1191_vm6, %v3527_v53 }
 0x54e   : > { %3560 = vst.msk [vmem:[%s6172_s16 + $0xe8] sm:$0xff] %vm1191_vm6, %v3528_v50 }
 0x54f   : > { %3561 = vst.msk [vmem:[%s6172_s16 + $0xf0] sm:$0xff] %vm1191_vm6, %v3529_v41 }
 0x550   : > { %3562 = vst.msk [vmem:[%s6172_s16 + $0xf8] sm:$0xff] %vm1191_vm6, %v3530_v35 }
 0x551 PF: > { %s13_s12 = sadd.s32 1, %s3747_s12  }
 0x552   : > { %p10_p4 = scmp.ge.s32.totalorder %s13_s12, 4  }
 0x554   :  { %12 = sbr.rel (!%p10_p4) target bundleno = 1 (0x1), region = 62 }

</bundles_post_ra>
